<compile_context>
chip_gen: v7x
topology: tpu7x:2x2x1
jax: 0.10.0
libtpu: 0.0.40
codegen_flags: <defaults>
</compile_context>

<pallas_src>
import numpy as np
import jax
import jax.numpy as jnp
from jax.experimental import pallas as pl
from jax.experimental.pallas import tpu as pltpu

# ------------------------- small synthetic config ---------------------------
CONV_CHANNELS = [16, 32, 32]   # PyTorch default was [32, 64, 128]
IN_CHANNELS = 4
IMG_SIDE = 32                  # input spatial size (32 -> 16 -> 8 -> 4)
FINAL_DIM = 2                  # PyTorch default was 4 (scaled down with spatial)
LATENT_DIM = 32                # PyTorch default was 512
BATCH = 2
KSIZE, STRIDE, PAD = 4, 2, 1


# ----------------------------- in-kernel GELU -------------------------------
_SQRT1_2 = 0.7071067811865476


def _erf(x):
    # Abramowitz & Stegun 7.1.26 (|err| < 1.5e-7), built from exp only so the
    # exact-erf GELU of nn.GELU() is matched to f32 accuracy inside Mosaic.
    a1, a2, a3, a4, a5 = (0.254829592, -0.284496736, 1.421413741,
                          -1.453152027, 1.061405429)
    p = 0.3275911
    sign = jnp.where(x >= 0.0, 1.0, -1.0)
    ax = jnp.abs(x)
    t = 1.0 / (1.0 + p * ax)
    poly = ((((a5 * t + a4) * t + a3) * t + a2) * t + a1) * t
    return sign * (1.0 - poly * jnp.exp(-ax * ax))


def _gelu(x):
    return 0.5 * x * (1.0 + _erf(x * _SQRT1_2))


# ------------------------------ fused kernel --------------------------------
def _encoder_kernel(*refs):
    """Whole ConvEncoder forward on VMEM-resident data.

    refs = (A0, S_0, T_0, b_0, ..., S_{L-1}, T_{L-1}, b_{L-1}, PH, G, lin_b, out)

    A0:   (B*H, W*Cin)          channels-last input as a 2-D matrix
    S_i:  (4, B*OH, B*H)        per-dy row-selection (padding folded in)
    T_i:  (4, W*Cin, OW*Cout)   per-dy Toeplitz weight (stride/pad/im2col folded)
    b_i:  (1, OW*Cout)          bias tiled over output columns
    PH:   (final_dim, B, B*H3)  adaptive row-pooling matrices
    G:    (final_dim, W3*C3, L) col-pooling folded into re-packed Linear weight
    lin_b:(1, L)
    """
    n_layers = len(CONV_CHANNELS)
    a_ref = refs[0]
    o_ref = refs[-1]
    conv_refs = refs[1:1 + 3 * n_layers]
    ph_ref, g_ref, lb_ref = refs[1 + 3 * n_layers:-1]

    a = a_ref[...]                                     # (B*H, W*Cin)
    for li in range(n_layers):
        s_ref, t_ref, b_ref = conv_refs[3 * li: 3 * li + 3]
        acc = b_ref[...]                               # (1, OW*Cout) broadcasts
        for dy in range(KSIZE):
            rows = jnp.dot(s_ref[dy], a,
                           preferred_element_type=jnp.float32)
            acc = acc + jnp.dot(rows, t_ref[dy],
                                preferred_element_type=jnp.float32)
        a = _gelu(acc)                                 # (B*OH, OW*Cout)

    # AdaptiveAvgPool2d(final_dim) + Flatten + Linear, as 2*final_dim matmuls.
    out = lb_ref[...]                                  # (1, L)
    for fy in range(FINAL_DIM):
        q = jnp.dot(ph_ref[fy], a, preferred_element_type=jnp.float32)
        out = out + jnp.dot(q, g_ref[fy], preferred_element_type=jnp.float32)
    o_ref[...] = out.astype(o_ref.dtype)


def conv_encoder_forward(x, packed):
    """x: (B, Cin, H, W) NCHW (PyTorch interface). Returns (B, latent_dim)."""
    b, c, h, w = x.shape
    # One-time NCHW -> channels-last 2-D layout: A0[b*H+iy, ix*Cin+ci].
    a0 = jnp.transpose(x, (0, 2, 3, 1)).reshape(b * h, w * c)
    n_in = 1 + len(packed)
    return pl.pallas_call(
        _encoder_kernel,
        out_shape=jax.ShapeDtypeStruct((b, LATENT_DIM), jnp.float32),
        # no grid: single program step, every operand fully resident in VMEM
        in_specs=[pl.BlockSpec(memory_space=pltpu.MemorySpace.VMEM)] * n_in,
        out_specs=pl.BlockSpec(memory_space=pltpu.MemorySpace.VMEM),
    )(a0, *packed)


# ----------------------- init-time parameter packing ------------------------
def _adaptive_windows(in_size, out_size):
    # PyTorch AdaptiveAvgPool window [start, end) for each output index.
    return [(int(np.floor(i * in_size / out_size)),
             int(np.ceil((i + 1) * in_size / out_size)))
            for i in range(out_size)]


def pack_params(params, batch):
    """Build the GEMM-ready constant matrices once (host-side numpy)."""
    packed = []
    spatial, in_c = IMG_SIDE, IN_CHANNELS
    for i, out_c in enumerate(CONV_CHANNELS):
        h = spatial
        oh = (h + 2 * PAD - KSIZE) // STRIDE + 1
        w = np.asarray(params[f"conv{i}_w"], np.float32)   # (Cout, Cin, k, k)
        bias = np.asarray(params[f"conv{i}_b"], np.float32)

        # S_dy: (B*OH, B*H) block-diag row selection, zero padding folded in.
        s_all = np.zeros((KSIZE, batch * oh, batch * h), np.float32)
        for dy in range(KSIZE):
            sel = np.zeros((oh, h), np.float32)
            for oy in range(oh):
                iy = STRIDE * oy - PAD + dy
                if 0 <= iy < h:
                    sel[oy, iy] = 1.0
            s_all[dy] = np.kron(np.eye(batch, dtype=np.float32), sel)

        # T_dy: (W*Cin, OW*Cout) Toeplitz-of-weights, W padding folded in.
        t_all = np.zeros((KSIZE, h * in_c, oh * out_c), np.float32)
        for dy in range(KSIZE):
            acc = np.zeros((h * in_c, oh * out_c), np.float32)
            for dx in range(KSIZE):
                m = np.zeros((h, oh), np.float32)
                for ox in range(oh):
                    ix = STRIDE * ox - PAD + dx
                    if 0 <= ix < h:
                        m[ix, ox] = 1.0
                acc += np.kron(m, w[:, :, dy, dx].T)        # (Cin, Cout) block
            t_all[dy] = acc

        brow = np.tile(bias, oh)[None, :]                   # (1, OW*Cout)
        packed += [jnp.asarray(s_all), jnp.asarray(t_all), jnp.asarray(brow)]
        spatial, in_c = oh, out_c

    # Head: adaptive avg-pool + flatten + linear folded into PH / G / lin_b.
    h3, c3, fd, lat = spatial, in_c, FINAL_DIM, LATENT_DIM
    lin_w = np.asarray(params["lin_w"], np.float32)         # (L, C3*fd*fd)
    lin_b = np.asarray(params["lin_b"], np.float32)
    wins = _adaptive_windows(h3, fd)

    ph = np.zeros((fd, batch, batch * h3), np.float32)      # row (y) pooling
    for fy, (s, e) in enumerate(wins):
        scale = 1.0 / (e - s)
        for bi in range(batch):
            for iy in range(s, e):
                ph[fy, bi, bi * h3 + iy] = scale

    g = np.zeros((fd, h3 * c3, lat), np.float32)            # col pooling + W_lin
    for fy in range(fd):
        for fx, (s, e) in enumerate(wins):
            scale = 1.0 / (e - s)
            for ix in range(s, e):
                for ci in range(c3):
                    g[fy, ix * c3 + ci, :] += scale * lin_w[:, ci * fd * fd
                                                            + fy * fd + fx]

    packed += [jnp.asarray(ph), jnp.asarray(g), jnp.asarray(lin_b[None, :])]
    return tuple(packed)


# ------------------------------- parameters ---------------------------------
def init_params(key):
    n_layers = len(CONV_CHANNELS)
    keys = jax.random.split(key, 2 * n_layers + 2)
    params = {}
    in_c = IN_CHANNELS
    for i, c in enumerate(CONV_CHANNELS):
        params[f"conv{i}_w"] = 0.1 * jax.random.normal(
            keys[2 * i], (c, in_c, KSIZE, KSIZE), jnp.float32)
        params[f"conv{i}_b"] = 0.1 * jax.random.normal(
            keys[2 * i + 1], (c,), jnp.float32)
        in_c = c
    feat = in_c * FINAL_DIM * FINAL_DIM
    params["lin_w"] = 0.1 * jax.random.normal(keys[-2], (LATENT_DIM, feat),
                                              jnp.float32)
    params["lin_b"] = 0.1 * jax.random.normal(keys[-1], (LATENT_DIM,),
                                              jnp.float32)
    return params


# ------------------------ pure-JAX reference (check) -------------------------
def reference_forward(x, params):
    h = x
    for i in range(len(CONV_CHANNELS)):
        h = jax.lax.conv_general_dilated(
            h, params[f"conv{i}_w"], window_strides=(STRIDE, STRIDE),
            padding=[(PAD, PAD), (PAD, PAD)],
            dimension_numbers=("NCHW", "OIHW", "NCHW"),
            precision=jax.lax.Precision.HIGHEST)
        h = h + params[f"conv{i}_b"].reshape(1, -1, 1, 1)
        h = jax.nn.gelu(h, approximate=False)
    b, c, hh, ww = h.shape
    # AdaptiveAvgPool2d(FINAL_DIM): spatial size divides FINAL_DIM here, so the
    # adaptive windows are exact uniform windows.
    h = h.reshape(b, c, FINAL_DIM, hh // FINAL_DIM,
                  FINAL_DIM, ww // FINAL_DIM).mean(axis=(3, 5))
    h = h.reshape(b, c * FINAL_DIM * FINAL_DIM)              # torch Flatten order
    return jnp.dot(h, params["lin_w"].T,
                   precision=jax.lax.Precision.HIGHEST) + params["lin_b"]


# ---------------------------------- main -------------------------------------
if __name__ == "__main__":
    key = jax.random.PRNGKey(0)
    params = init_params(key)
    packed = pack_params(params, BATCH)                      # one-time, host side

    x = jax.random.normal(jax.random.fold_in(key, 123),
                          (BATCH, IN_CHANNELS, IMG_SIDE, IMG_SIDE), jnp.float32)

    fwd = jax.jit(conv_encoder_forward)
    out = jax.block_until_ready(fwd(x, packed))
    assert out.shape == (BATCH, LATENT_DIM), out.shape

    ref = jax.block_until_ready(reference_forward(x, params))
    np.testing.assert_allclose(np.asarray(out), np.asarray(ref),
                               rtol=1e-4, atol=1e-4)

    print("KERNEL_OK")
</pallas_src>

<mosaic_0001>
module attributes {stable_mosaic.version = 11 : i64} {
  func.func @_encoder_kernel(%arg0: memref<64x128xf32, #tpu.memory_space<vmem>>, %arg1: memref<4x32x64xf32, #tpu.memory_space<vmem>>, %arg2: memref<4x128x256xf32, #tpu.memory_space<vmem>>, %arg3: memref<1x256xf32, #tpu.memory_space<vmem>>, %arg4: memref<4x16x32xf32, #tpu.memory_space<vmem>>, %arg5: memref<4x256x256xf32, #tpu.memory_space<vmem>>, %arg6: memref<1x256xf32, #tpu.memory_space<vmem>>, %arg7: memref<4x8x16xf32, #tpu.memory_space<vmem>>, %arg8: memref<4x256x128xf32, #tpu.memory_space<vmem>>, %arg9: memref<1x128xf32, #tpu.memory_space<vmem>>, %arg10: memref<2x2x8xf32, #tpu.memory_space<vmem>>, %arg11: memref<2x128x32xf32, #tpu.memory_space<vmem>>, %arg12: memref<1x32xf32, #tpu.memory_space<vmem>>, %arg13: memref<2x32xf32, #tpu.memory_space<vmem>>) attributes {dimension_semantics = [], scalar_prefetch = 0 : i64, scratch_operands = 0 : i64, tpu.core_type = #tpu.core_type<tc>} {
    %c0 = arith.constant 0 : index
    %c0_0 = arith.constant 0 : index
    %0 = vector.load %arg0[%c0, %c0_0] : memref<64x128xf32, #tpu.memory_space<vmem>>, vector<64x128xf32>
    %c0_1 = arith.constant 0 : index
    %c0_2 = arith.constant 0 : index
    %1 = vector.load %arg3[%c0_1, %c0_2] : memref<1x256xf32, #tpu.memory_space<vmem>>, vector<1x256xf32>
    %c0_3 = arith.constant 0 : index
    %c0_4 = arith.constant 0 : index
    %c0_5 = arith.constant 0 : index
    %2 = vector.load %arg1[%c0_3, %c0_4, %c0_5] : memref<4x32x64xf32, #tpu.memory_space<vmem>>, vector<1x32x64xf32>
    %3 = vector.shape_cast %2 : vector<1x32x64xf32> to vector<32x64xf32>
    %cst = arith.constant dense<0.000000e+00> : vector<32x128xf32>
    %4 = tpu.matmul %3, %0, %cst {dimension_numbers = #tpu.dot_dimension_numbers<[1], [0], [0], [1], [0, 0, 1, 1], [], []>} : vector<32x64xf32>, vector<64x128xf32>, vector<32x128xf32> -> vector<32x128xf32>
    %c0_6 = arith.constant 0 : index
    %c0_7 = arith.constant 0 : index
    %c0_8 = arith.constant 0 : index
    %5 = vector.load %arg2[%c0_6, %c0_7, %c0_8] : memref<4x128x256xf32, #tpu.memory_space<vmem>>, vector<1x128x256xf32>
    %6 = vector.shape_cast %5 : vector<1x128x256xf32> to vector<128x256xf32>
    %cst_9 = arith.constant dense<0.000000e+00> : vector<32x256xf32>
    %7 = tpu.matmul %4, %6, %cst_9 {dimension_numbers = #tpu.dot_dimension_numbers<[1], [0], [0], [1], [0, 0, 1, 1], [], []>} : vector<32x128xf32>, vector<128x256xf32>, vector<32x256xf32> -> vector<32x256xf32>
    %8 = vector.broadcast %1 : vector<1x256xf32> to vector<32x256xf32>
    %9 = arith.addf %8, %7 : vector<32x256xf32>
    %c1 = arith.constant 1 : index
    %c0_10 = arith.constant 0 : index
    %c0_11 = arith.constant 0 : index
    %10 = vector.load %arg1[%c1, %c0_10, %c0_11] : memref<4x32x64xf32, #tpu.memory_space<vmem>>, vector<1x32x64xf32>
    %11 = vector.shape_cast %10 : vector<1x32x64xf32> to vector<32x64xf32>
    %cst_12 = arith.constant dense<0.000000e+00> : vector<32x128xf32>
    %12 = tpu.matmul %11, %0, %cst_12 {dimension_numbers = #tpu.dot_dimension_numbers<[1], [0], [0], [1], [0, 0, 1, 1], [], []>} : vector<32x64xf32>, vector<64x128xf32>, vector<32x128xf32> -> vector<32x128xf32>
    %c1_13 = arith.constant 1 : index
    %c0_14 = arith.constant 0 : index
    %c0_15 = arith.constant 0 : index
    %13 = vector.load %arg2[%c1_13, %c0_14, %c0_15] : memref<4x128x256xf32, #tpu.memory_space<vmem>>, vector<1x128x256xf32>
    %14 = vector.shape_cast %13 : vector<1x128x256xf32> to vector<128x256xf32>
    %cst_16 = arith.constant dense<0.000000e+00> : vector<32x256xf32>
    %15 = tpu.matmul %12, %14, %cst_16 {dimension_numbers = #tpu.dot_dimension_numbers<[1], [0], [0], [1], [0, 0, 1, 1], [], []>} : vector<32x128xf32>, vector<128x256xf32>, vector<32x256xf32> -> vector<32x256xf32>
    %16 = arith.addf %9, %15 : vector<32x256xf32>
    %c2 = arith.constant 2 : index
    %c0_17 = arith.constant 0 : index
    %c0_18 = arith.constant 0 : index
    %17 = vector.load %arg1[%c2, %c0_17, %c0_18] : memref<4x32x64xf32, #tpu.memory_space<vmem>>, vector<1x32x64xf32>
    %18 = vector.shape_cast %17 : vector<1x32x64xf32> to vector<32x64xf32>
    %cst_19 = arith.constant dense<0.000000e+00> : vector<32x128xf32>
    %19 = tpu.matmul %18, %0, %cst_19 {dimension_numbers = #tpu.dot_dimension_numbers<[1], [0], [0], [1], [0, 0, 1, 1], [], []>} : vector<32x64xf32>, vector<64x128xf32>, vector<32x128xf32> -> vector<32x128xf32>
    %c2_20 = arith.constant 2 : index
    %c0_21 = arith.constant 0 : index
    %c0_22 = arith.constant 0 : index
    %20 = vector.load %arg2[%c2_20, %c0_21, %c0_22] : memref<4x128x256xf32, #tpu.memory_space<vmem>>, vector<1x128x256xf32>
    %21 = vector.shape_cast %20 : vector<1x128x256xf32> to vector<128x256xf32>
    %cst_23 = arith.constant dense<0.000000e+00> : vector<32x256xf32>
    %22 = tpu.matmul %19, %21, %cst_23 {dimension_numbers = #tpu.dot_dimension_numbers<[1], [0], [0], [1], [0, 0, 1, 1], [], []>} : vector<32x128xf32>, vector<128x256xf32>, vector<32x256xf32> -> vector<32x256xf32>
    %23 = arith.addf %16, %22 : vector<32x256xf32>
    %c3 = arith.constant 3 : index
    %c0_24 = arith.constant 0 : index
    %c0_25 = arith.constant 0 : index
    %24 = vector.load %arg1[%c3, %c0_24, %c0_25] : memref<4x32x64xf32, #tpu.memory_space<vmem>>, vector<1x32x64xf32>
    %25 = vector.shape_cast %24 : vector<1x32x64xf32> to vector<32x64xf32>
    %cst_26 = arith.constant dense<0.000000e+00> : vector<32x128xf32>
    %26 = tpu.matmul %25, %0, %cst_26 {dimension_numbers = #tpu.dot_dimension_numbers<[1], [0], [0], [1], [0, 0, 1, 1], [], []>} : vector<32x64xf32>, vector<64x128xf32>, vector<32x128xf32> -> vector<32x128xf32>
    %c3_27 = arith.constant 3 : index
    %c0_28 = arith.constant 0 : index
    %c0_29 = arith.constant 0 : index
    %27 = vector.load %arg2[%c3_27, %c0_28, %c0_29] : memref<4x128x256xf32, #tpu.memory_space<vmem>>, vector<1x128x256xf32>
    %28 = vector.shape_cast %27 : vector<1x128x256xf32> to vector<128x256xf32>
    %cst_30 = arith.constant dense<0.000000e+00> : vector<32x256xf32>
    %29 = tpu.matmul %26, %28, %cst_30 {dimension_numbers = #tpu.dot_dimension_numbers<[1], [0], [0], [1], [0, 0, 1, 1], [], []>} : vector<32x128xf32>, vector<128x256xf32>, vector<32x256xf32> -> vector<32x256xf32>
    %30 = arith.addf %23, %29 : vector<32x256xf32>
    %cst_31 = arith.constant 5.000000e-01 : f32
    %31 = vector.broadcast %cst_31 : f32 to vector<32x256xf32>
    %32 = arith.mulf %31, %30 : vector<32x256xf32>
    %cst_32 = arith.constant 0.707106769 : f32
    %33 = vector.broadcast %cst_32 : f32 to vector<32x256xf32>
    %34 = arith.mulf %30, %33 : vector<32x256xf32>
    %cst_33 = arith.constant 0.000000e+00 : f32
    %35 = vector.broadcast %cst_33 : f32 to vector<32x256xf32>
    %36 = arith.cmpf oge, %34, %35 : vector<32x256xf32>
    %cst_34 = arith.constant 1.000000e+00 : f32
    %cst_35 = arith.constant -1.000000e+00 : f32
    %37 = vector.broadcast %cst_34 : f32 to vector<32x256xf32>
    %38 = vector.broadcast %cst_35 : f32 to vector<32x256xf32>
    %39 = arith.select %36, %37, %38 : vector<32x256xi1>, vector<32x256xf32>
    %40 = math.absf %34 : vector<32x256xf32>
    %cst_36 = arith.constant 0.327591091 : f32
    %41 = vector.broadcast %cst_36 : f32 to vector<32x256xf32>
    %42 = arith.mulf %41, %40 : vector<32x256xf32>
    %cst_37 = arith.constant 1.000000e+00 : f32
    %43 = vector.broadcast %cst_37 : f32 to vector<32x256xf32>
    %44 = arith.addf %43, %42 : vector<32x256xf32>
    %cst_38 = arith.constant 1.000000e+00 : f32
    %45 = vector.broadcast %cst_38 : f32 to vector<32x256xf32>
    %46 = arith.divf %45, %44 : vector<32x256xf32>
    %cst_39 = arith.constant 1.06140542 : f32
    %47 = vector.broadcast %cst_39 : f32 to vector<32x256xf32>
    %48 = arith.mulf %47, %46 : vector<32x256xf32>
    %cst_40 = arith.constant -1.45315206 : f32
    %49 = vector.broadcast %cst_40 : f32 to vector<32x256xf32>
    %50 = arith.addf %48, %49 : vector<32x256xf32>
    %51 = arith.mulf %50, %46 : vector<32x256xf32>
    %cst_41 = arith.constant 1.42141378 : f32
    %52 = vector.broadcast %cst_41 : f32 to vector<32x256xf32>
    %53 = arith.addf %51, %52 : vector<32x256xf32>
    %54 = arith.mulf %53, %46 : vector<32x256xf32>
    %cst_42 = arith.constant -0.284496725 : f32
    %55 = vector.broadcast %cst_42 : f32 to vector<32x256xf32>
    %56 = arith.addf %54, %55 : vector<32x256xf32>
    %57 = arith.mulf %56, %46 : vector<32x256xf32>
    %cst_43 = arith.constant 0.254829586 : f32
    %58 = vector.broadcast %cst_43 : f32 to vector<32x256xf32>
    %59 = arith.addf %57, %58 : vector<32x256xf32>
    %60 = arith.mulf %59, %46 : vector<32x256xf32>
    %cst_44 = arith.constant 0.000000e+00 : f32
    %61 = vector.broadcast %cst_44 : f32 to vector<32x256xf32>
    %62 = arith.subf %61, %40 : vector<32x256xf32>
    %63 = arith.mulf %62, %40 : vector<32x256xf32>
    %64 = math.exp %63 : vector<32x256xf32>
    %65 = arith.mulf %60, %64 : vector<32x256xf32>
    %cst_45 = arith.constant 1.000000e+00 : f32
    %66 = vector.broadcast %cst_45 : f32 to vector<32x256xf32>
    %67 = arith.subf %66, %65 : vector<32x256xf32>
    %68 = arith.mulf %39, %67 : vector<32x256xf32>
    %cst_46 = arith.constant 1.000000e+00 : f32
    %69 = vector.broadcast %cst_46 : f32 to vector<32x256xf32>
    %70 = arith.addf %69, %68 : vector<32x256xf32>
    %71 = arith.mulf %32, %70 : vector<32x256xf32>
    %c0_47 = arith.constant 0 : index
    %c0_48 = arith.constant 0 : index
    %72 = vector.load %arg6[%c0_47, %c0_48] : memref<1x256xf32, #tpu.memory_space<vmem>>, vector<1x256xf32>
    %c0_49 = arith.constant 0 : index
    %c0_50 = arith.constant 0 : index
    %c0_51 = arith.constant 0 : index
    %73 = vector.load %arg4[%c0_49, %c0_50, %c0_51] : memref<4x16x32xf32, #tpu.memory_space<vmem>>, vector<1x16x32xf32>
    %74 = vector.shape_cast %73 : vector<1x16x32xf32> to vector<16x32xf32>
    %cst_52 = arith.constant dense<0.000000e+00> : vector<16x256xf32>
    %75 = tpu.matmul %74, %71, %cst_52 {dimension_numbers = #tpu.dot_dimension_numbers<[1], [0], [0], [1], [0, 0, 1, 1], [], []>} : vector<16x32xf32>, vector<32x256xf32>, vector<16x256xf32> -> vector<16x256xf32>
    %c0_53 = arith.constant 0 : index
    %c0_54 = arith.constant 0 : index
    %c0_55 = arith.constant 0 : index
    %76 = vector.load %arg5[%c0_53, %c0_54, %c0_55] : memref<4x256x256xf32, #tpu.memory_space<vmem>>, vector<1x256x256xf32>
    %77 = vector.shape_cast %76 : vector<1x256x256xf32> to vector<256x256xf32>
    %cst_56 = arith.constant dense<0.000000e+00> : vector<16x256xf32>
    %78 = tpu.matmul %75, %77, %cst_56 {dimension_numbers = #tpu.dot_dimension_numbers<[1], [0], [0], [1], [0, 0, 1, 1], [], []>} : vector<16x256xf32>, vector<256x256xf32>, vector<16x256xf32> -> vector<16x256xf32>
    %79 = vector.broadcast %72 : vector<1x256xf32> to vector<16x256xf32>
    %80 = arith.addf %79, %78 : vector<16x256xf32>
    %c1_57 = arith.constant 1 : index
    %c0_58 = arith.constant 0 : index
    %c0_59 = arith.constant 0 : index
    %81 = vector.load %arg4[%c1_57, %c0_58, %c0_59] : memref<4x16x32xf32, #tpu.memory_space<vmem>>, vector<1x16x32xf32>
    %82 = vector.shape_cast %81 : vector<1x16x32xf32> to vector<16x32xf32>
    %cst_60 = arith.constant dense<0.000000e+00> : vector<16x256xf32>
    %83 = tpu.matmul %82, %71, %cst_60 {dimension_numbers = #tpu.dot_dimension_numbers<[1], [0], [0], [1], [0, 0, 1, 1], [], []>} : vector<16x32xf32>, vector<32x256xf32>, vector<16x256xf32> -> vector<16x256xf32>
    %c1_61 = arith.constant 1 : index
    %c0_62 = arith.constant 0 : index
    %c0_63 = arith.constant 0 : index
    %84 = vector.load %arg5[%c1_61, %c0_62, %c0_63] : memref<4x256x256xf32, #tpu.memory_space<vmem>>, vector<1x256x256xf32>
    %85 = vector.shape_cast %84 : vector<1x256x256xf32> to vector<256x256xf32>
    %cst_64 = arith.constant dense<0.000000e+00> : vector<16x256xf32>
    %86 = tpu.matmul %83, %85, %cst_64 {dimension_numbers = #tpu.dot_dimension_numbers<[1], [0], [0], [1], [0, 0, 1, 1], [], []>} : vector<16x256xf32>, vector<256x256xf32>, vector<16x256xf32> -> vector<16x256xf32>
    %87 = arith.addf %80, %86 : vector<16x256xf32>
    %c2_65 = arith.constant 2 : index
    %c0_66 = arith.constant 0 : index
    %c0_67 = arith.constant 0 : index
    %88 = vector.load %arg4[%c2_65, %c0_66, %c0_67] : memref<4x16x32xf32, #tpu.memory_space<vmem>>, vector<1x16x32xf32>
    %89 = vector.shape_cast %88 : vector<1x16x32xf32> to vector<16x32xf32>
    %cst_68 = arith.constant dense<0.000000e+00> : vector<16x256xf32>
    %90 = tpu.matmul %89, %71, %cst_68 {dimension_numbers = #tpu.dot_dimension_numbers<[1], [0], [0], [1], [0, 0, 1, 1], [], []>} : vector<16x32xf32>, vector<32x256xf32>, vector<16x256xf32> -> vector<16x256xf32>
    %c2_69 = arith.constant 2 : index
    %c0_70 = arith.constant 0 : index
    %c0_71 = arith.constant 0 : index
    %91 = vector.load %arg5[%c2_69, %c0_70, %c0_71] : memref<4x256x256xf32, #tpu.memory_space<vmem>>, vector<1x256x256xf32>
    %92 = vector.shape_cast %91 : vector<1x256x256xf32> to vector<256x256xf32>
    %cst_72 = arith.constant dense<0.000000e+00> : vector<16x256xf32>
    %93 = tpu.matmul %90, %92, %cst_72 {dimension_numbers = #tpu.dot_dimension_numbers<[1], [0], [0], [1], [0, 0, 1, 1], [], []>} : vector<16x256xf32>, vector<256x256xf32>, vector<16x256xf32> -> vector<16x256xf32>
    %94 = arith.addf %87, %93 : vector<16x256xf32>
    %c3_73 = arith.constant 3 : index
    %c0_74 = arith.constant 0 : index
    %c0_75 = arith.constant 0 : index
    %95 = vector.load %arg4[%c3_73, %c0_74, %c0_75] : memref<4x16x32xf32, #tpu.memory_space<vmem>>, vector<1x16x32xf32>
    %96 = vector.shape_cast %95 : vector<1x16x32xf32> to vector<16x32xf32>
    %cst_76 = arith.constant dense<0.000000e+00> : vector<16x256xf32>
    %97 = tpu.matmul %96, %71, %cst_76 {dimension_numbers = #tpu.dot_dimension_numbers<[1], [0], [0], [1], [0, 0, 1, 1], [], []>} : vector<16x32xf32>, vector<32x256xf32>, vector<16x256xf32> -> vector<16x256xf32>
    %c3_77 = arith.constant 3 : index
    %c0_78 = arith.constant 0 : index
    %c0_79 = arith.constant 0 : index
    %98 = vector.load %arg5[%c3_77, %c0_78, %c0_79] : memref<4x256x256xf32, #tpu.memory_space<vmem>>, vector<1x256x256xf32>
    %99 = vector.shape_cast %98 : vector<1x256x256xf32> to vector<256x256xf32>
    %cst_80 = arith.constant dense<0.000000e+00> : vector<16x256xf32>
    %100 = tpu.matmul %97, %99, %cst_80 {dimension_numbers = #tpu.dot_dimension_numbers<[1], [0], [0], [1], [0, 0, 1, 1], [], []>} : vector<16x256xf32>, vector<256x256xf32>, vector<16x256xf32> -> vector<16x256xf32>
    %101 = arith.addf %94, %100 : vector<16x256xf32>
    %cst_81 = arith.constant 5.000000e-01 : f32
    %102 = vector.broadcast %cst_81 : f32 to vector<16x256xf32>
    %103 = arith.mulf %102, %101 : vector<16x256xf32>
    %cst_82 = arith.constant 0.707106769 : f32
    %104 = vector.broadcast %cst_82 : f32 to vector<16x256xf32>
    %105 = arith.mulf %101, %104 : vector<16x256xf32>
    %cst_83 = arith.constant 0.000000e+00 : f32
    %106 = vector.broadcast %cst_83 : f32 to vector<16x256xf32>
    %107 = arith.cmpf oge, %105, %106 : vector<16x256xf32>
    %cst_84 = arith.constant 1.000000e+00 : f32
    %cst_85 = arith.constant -1.000000e+00 : f32
    %108 = vector.broadcast %cst_84 : f32 to vector<16x256xf32>
    %109 = vector.broadcast %cst_85 : f32 to vector<16x256xf32>
    %110 = arith.select %107, %108, %109 : vector<16x256xi1>, vector<16x256xf32>
    %111 = math.absf %105 : vector<16x256xf32>
    %cst_86 = arith.constant 0.327591091 : f32
    %112 = vector.broadcast %cst_86 : f32 to vector<16x256xf32>
    %113 = arith.mulf %112, %111 : vector<16x256xf32>
    %cst_87 = arith.constant 1.000000e+00 : f32
    %114 = vector.broadcast %cst_87 : f32 to vector<16x256xf32>
    %115 = arith.addf %114, %113 : vector<16x256xf32>
    %cst_88 = arith.constant 1.000000e+00 : f32
    %116 = vector.broadcast %cst_88 : f32 to vector<16x256xf32>
    %117 = arith.divf %116, %115 : vector<16x256xf32>
    %cst_89 = arith.constant 1.06140542 : f32
    %118 = vector.broadcast %cst_89 : f32 to vector<16x256xf32>
    %119 = arith.mulf %118, %117 : vector<16x256xf32>
    %cst_90 = arith.constant -1.45315206 : f32
    %120 = vector.broadcast %cst_90 : f32 to vector<16x256xf32>
    %121 = arith.addf %119, %120 : vector<16x256xf32>
    %122 = arith.mulf %121, %117 : vector<16x256xf32>
    %cst_91 = arith.constant 1.42141378 : f32
    %123 = vector.broadcast %cst_91 : f32 to vector<16x256xf32>
    %124 = arith.addf %122, %123 : vector<16x256xf32>
    %125 = arith.mulf %124, %117 : vector<16x256xf32>
    %cst_92 = arith.constant -0.284496725 : f32
    %126 = vector.broadcast %cst_92 : f32 to vector<16x256xf32>
    %127 = arith.addf %125, %126 : vector<16x256xf32>
    %128 = arith.mulf %127, %117 : vector<16x256xf32>
    %cst_93 = arith.constant 0.254829586 : f32
    %129 = vector.broadcast %cst_93 : f32 to vector<16x256xf32>
    %130 = arith.addf %128, %129 : vector<16x256xf32>
    %131 = arith.mulf %130, %117 : vector<16x256xf32>
    %cst_94 = arith.constant 0.000000e+00 : f32
    %132 = vector.broadcast %cst_94 : f32 to vector<16x256xf32>
    %133 = arith.subf %132, %111 : vector<16x256xf32>
    %134 = arith.mulf %133, %111 : vector<16x256xf32>
    %135 = math.exp %134 : vector<16x256xf32>
    %136 = arith.mulf %131, %135 : vector<16x256xf32>
    %cst_95 = arith.constant 1.000000e+00 : f32
    %137 = vector.broadcast %cst_95 : f32 to vector<16x256xf32>
    %138 = arith.subf %137, %136 : vector<16x256xf32>
    %139 = arith.mulf %110, %138 : vector<16x256xf32>
    %cst_96 = arith.constant 1.000000e+00 : f32
    %140 = vector.broadcast %cst_96 : f32 to vector<16x256xf32>
    %141 = arith.addf %140, %139 : vector<16x256xf32>
    %142 = arith.mulf %103, %141 : vector<16x256xf32>
    %c0_97 = arith.constant 0 : index
    %c0_98 = arith.constant 0 : index
    %143 = vector.load %arg9[%c0_97, %c0_98] : memref<1x128xf32, #tpu.memory_space<vmem>>, vector<1x128xf32>
    %c0_99 = arith.constant 0 : index
    %c0_100 = arith.constant 0 : index
    %c0_101 = arith.constant 0 : index
    %144 = vector.load %arg7[%c0_99, %c0_100, %c0_101] : memref<4x8x16xf32, #tpu.memory_space<vmem>>, vector<1x8x16xf32>
    %145 = vector.shape_cast %144 : vector<1x8x16xf32> to vector<8x16xf32>
    %cst_102 = arith.constant dense<0.000000e+00> : vector<8x256xf32>
    %146 = tpu.matmul %145, %142, %cst_102 {dimension_numbers = #tpu.dot_dimension_numbers<[1], [0], [0], [1], [0, 0, 1, 1], [], []>} : vector<8x16xf32>, vector<16x256xf32>, vector<8x256xf32> -> vector<8x256xf32>
    %c0_103 = arith.constant 0 : index
    %c0_104 = arith.constant 0 : index
    %c0_105 = arith.constant 0 : index
    %147 = vector.load %arg8[%c0_103, %c0_104, %c0_105] : memref<4x256x128xf32, #tpu.memory_space<vmem>>, vector<1x256x128xf32>
    %148 = vector.shape_cast %147 : vector<1x256x128xf32> to vector<256x128xf32>
    %cst_106 = arith.constant dense<0.000000e+00> : vector<8x128xf32>
    %149 = tpu.matmul %146, %148, %cst_106 {dimension_numbers = #tpu.dot_dimension_numbers<[1], [0], [0], [1], [0, 0, 1, 1], [], []>} : vector<8x256xf32>, vector<256x128xf32>, vector<8x128xf32> -> vector<8x128xf32>
    %150 = vector.broadcast %143 : vector<1x128xf32> to vector<8x128xf32>
    %151 = arith.addf %150, %149 : vector<8x128xf32>
    %c1_107 = arith.constant 1 : index
    %c0_108 = arith.constant 0 : index
    %c0_109 = arith.constant 0 : index
    %152 = vector.load %arg7[%c1_107, %c0_108, %c0_109] : memref<4x8x16xf32, #tpu.memory_space<vmem>>, vector<1x8x16xf32>
    %153 = vector.shape_cast %152 : vector<1x8x16xf32> to vector<8x16xf32>
    %cst_110 = arith.constant dense<0.000000e+00> : vector<8x256xf32>
    %154 = tpu.matmul %153, %142, %cst_110 {dimension_numbers = #tpu.dot_dimension_numbers<[1], [0], [0], [1], [0, 0, 1, 1], [], []>} : vector<8x16xf32>, vector<16x256xf32>, vector<8x256xf32> -> vector<8x256xf32>
    %c1_111 = arith.constant 1 : index
    %c0_112 = arith.constant 0 : index
    %c0_113 = arith.constant 0 : index
    %155 = vector.load %arg8[%c1_111, %c0_112, %c0_113] : memref<4x256x128xf32, #tpu.memory_space<vmem>>, vector<1x256x128xf32>
    %156 = vector.shape_cast %155 : vector<1x256x128xf32> to vector<256x128xf32>
    %cst_114 = arith.constant dense<0.000000e+00> : vector<8x128xf32>
    %157 = tpu.matmul %154, %156, %cst_114 {dimension_numbers = #tpu.dot_dimension_numbers<[1], [0], [0], [1], [0, 0, 1, 1], [], []>} : vector<8x256xf32>, vector<256x128xf32>, vector<8x128xf32> -> vector<8x128xf32>
    %158 = arith.addf %151, %157 : vector<8x128xf32>
    %c2_115 = arith.constant 2 : index
    %c0_116 = arith.constant 0 : index
    %c0_117 = arith.constant 0 : index
    %159 = vector.load %arg7[%c2_115, %c0_116, %c0_117] : memref<4x8x16xf32, #tpu.memory_space<vmem>>, vector<1x8x16xf32>
    %160 = vector.shape_cast %159 : vector<1x8x16xf32> to vector<8x16xf32>
    %cst_118 = arith.constant dense<0.000000e+00> : vector<8x256xf32>
    %161 = tpu.matmul %160, %142, %cst_118 {dimension_numbers = #tpu.dot_dimension_numbers<[1], [0], [0], [1], [0, 0, 1, 1], [], []>} : vector<8x16xf32>, vector<16x256xf32>, vector<8x256xf32> -> vector<8x256xf32>
    %c2_119 = arith.constant 2 : index
    %c0_120 = arith.constant 0 : index
    %c0_121 = arith.constant 0 : index
    %162 = vector.load %arg8[%c2_119, %c0_120, %c0_121] : memref<4x256x128xf32, #tpu.memory_space<vmem>>, vector<1x256x128xf32>
    %163 = vector.shape_cast %162 : vector<1x256x128xf32> to vector<256x128xf32>
    %cst_122 = arith.constant dense<0.000000e+00> : vector<8x128xf32>
    %164 = tpu.matmul %161, %163, %cst_122 {dimension_numbers = #tpu.dot_dimension_numbers<[1], [0], [0], [1], [0, 0, 1, 1], [], []>} : vector<8x256xf32>, vector<256x128xf32>, vector<8x128xf32> -> vector<8x128xf32>
    %165 = arith.addf %158, %164 : vector<8x128xf32>
    %c3_123 = arith.constant 3 : index
    %c0_124 = arith.constant 0 : index
    %c0_125 = arith.constant 0 : index
    %166 = vector.load %arg7[%c3_123, %c0_124, %c0_125] : memref<4x8x16xf32, #tpu.memory_space<vmem>>, vector<1x8x16xf32>
    %167 = vector.shape_cast %166 : vector<1x8x16xf32> to vector<8x16xf32>
    %cst_126 = arith.constant dense<0.000000e+00> : vector<8x256xf32>
    %168 = tpu.matmul %167, %142, %cst_126 {dimension_numbers = #tpu.dot_dimension_numbers<[1], [0], [0], [1], [0, 0, 1, 1], [], []>} : vector<8x16xf32>, vector<16x256xf32>, vector<8x256xf32> -> vector<8x256xf32>
    %c3_127 = arith.constant 3 : index
    %c0_128 = arith.constant 0 : index
    %c0_129 = arith.constant 0 : index
    %169 = vector.load %arg8[%c3_127, %c0_128, %c0_129] : memref<4x256x128xf32, #tpu.memory_space<vmem>>, vector<1x256x128xf32>
    %170 = vector.shape_cast %169 : vector<1x256x128xf32> to vector<256x128xf32>
    %cst_130 = arith.constant dense<0.000000e+00> : vector<8x128xf32>
    %171 = tpu.matmul %168, %170, %cst_130 {dimension_numbers = #tpu.dot_dimension_numbers<[1], [0], [0], [1], [0, 0, 1, 1], [], []>} : vector<8x256xf32>, vector<256x128xf32>, vector<8x128xf32> -> vector<8x128xf32>
    %172 = arith.addf %165, %171 : vector<8x128xf32>
    %cst_131 = arith.constant 5.000000e-01 : f32
    %173 = vector.broadcast %cst_131 : f32 to vector<8x128xf32>
    %174 = arith.mulf %173, %172 : vector<8x128xf32>
    %cst_132 = arith.constant 0.707106769 : f32
    %175 = vector.broadcast %cst_132 : f32 to vector<8x128xf32>
    %176 = arith.mulf %172, %175 : vector<8x128xf32>
    %cst_133 = arith.constant 0.000000e+00 : f32
    %177 = vector.broadcast %cst_133 : f32 to vector<8x128xf32>
    %178 = arith.cmpf oge, %176, %177 : vector<8x128xf32>
    %cst_134 = arith.constant 1.000000e+00 : f32
    %cst_135 = arith.constant -1.000000e+00 : f32
    %179 = vector.broadcast %cst_134 : f32 to vector<8x128xf32>
    %180 = vector.broadcast %cst_135 : f32 to vector<8x128xf32>
    %181 = arith.select %178, %179, %180 : vector<8x128xi1>, vector<8x128xf32>
    %182 = math.absf %176 : vector<8x128xf32>
    %cst_136 = arith.constant 0.327591091 : f32
    %183 = vector.broadcast %cst_136 : f32 to vector<8x128xf32>
    %184 = arith.mulf %183, %182 : vector<8x128xf32>
    %cst_137 = arith.constant 1.000000e+00 : f32
    %185 = vector.broadcast %cst_137 : f32 to vector<8x128xf32>
    %186 = arith.addf %185, %184 : vector<8x128xf32>
    %cst_138 = arith.constant 1.000000e+00 : f32
    %187 = vector.broadcast %cst_138 : f32 to vector<8x128xf32>
    %188 = arith.divf %187, %186 : vector<8x128xf32>
    %cst_139 = arith.constant 1.06140542 : f32
    %189 = vector.broadcast %cst_139 : f32 to vector<8x128xf32>
    %190 = arith.mulf %189, %188 : vector<8x128xf32>
    %cst_140 = arith.constant -1.45315206 : f32
    %191 = vector.broadcast %cst_140 : f32 to vector<8x128xf32>
    %192 = arith.addf %190, %191 : vector<8x128xf32>
    %193 = arith.mulf %192, %188 : vector<8x128xf32>
    %cst_141 = arith.constant 1.42141378 : f32
    %194 = vector.broadcast %cst_141 : f32 to vector<8x128xf32>
    %195 = arith.addf %193, %194 : vector<8x128xf32>
    %196 = arith.mulf %195, %188 : vector<8x128xf32>
    %cst_142 = arith.constant -0.284496725 : f32
    %197 = vector.broadcast %cst_142 : f32 to vector<8x128xf32>
    %198 = arith.addf %196, %197 : vector<8x128xf32>
    %199 = arith.mulf %198, %188 : vector<8x128xf32>
    %cst_143 = arith.constant 0.254829586 : f32
    %200 = vector.broadcast %cst_143 : f32 to vector<8x128xf32>
    %201 = arith.addf %199, %200 : vector<8x128xf32>
    %202 = arith.mulf %201, %188 : vector<8x128xf32>
    %cst_144 = arith.constant 0.000000e+00 : f32
    %203 = vector.broadcast %cst_144 : f32 to vector<8x128xf32>
    %204 = arith.subf %203, %182 : vector<8x128xf32>
    %205 = arith.mulf %204, %182 : vector<8x128xf32>
    %206 = math.exp %205 : vector<8x128xf32>
    %207 = arith.mulf %202, %206 : vector<8x128xf32>
    %cst_145 = arith.constant 1.000000e+00 : f32
    %208 = vector.broadcast %cst_145 : f32 to vector<8x128xf32>
    %209 = arith.subf %208, %207 : vector<8x128xf32>
    %210 = arith.mulf %181, %209 : vector<8x128xf32>
    %cst_146 = arith.constant 1.000000e+00 : f32
    %211 = vector.broadcast %cst_146 : f32 to vector<8x128xf32>
    %212 = arith.addf %211, %210 : vector<8x128xf32>
    %213 = arith.mulf %174, %212 : vector<8x128xf32>
    %c0_147 = arith.constant 0 : index
    %c0_148 = arith.constant 0 : index
    %214 = vector.load %arg12[%c0_147, %c0_148] : memref<1x32xf32, #tpu.memory_space<vmem>>, vector<1x32xf32>
    %c0_149 = arith.constant 0 : index
    %c0_150 = arith.constant 0 : index
    %c0_151 = arith.constant 0 : index
    %215 = vector.load %arg10[%c0_149, %c0_150, %c0_151] : memref<2x2x8xf32, #tpu.memory_space<vmem>>, vector<1x2x8xf32>
    %216 = vector.shape_cast %215 : vector<1x2x8xf32> to vector<2x8xf32>
    %cst_152 = arith.constant dense<0.000000e+00> : vector<2x128xf32>
    %217 = tpu.matmul %216, %213, %cst_152 {dimension_numbers = #tpu.dot_dimension_numbers<[1], [0], [0], [1], [0, 0, 1, 1], [], []>} : vector<2x8xf32>, vector<8x128xf32>, vector<2x128xf32> -> vector<2x128xf32>
    %c0_153 = arith.constant 0 : index
    %c0_154 = arith.constant 0 : index
    %c0_155 = arith.constant 0 : index
    %218 = vector.load %arg11[%c0_153, %c0_154, %c0_155] : memref<2x128x32xf32, #tpu.memory_space<vmem>>, vector<1x128x32xf32>
    %219 = vector.shape_cast %218 : vector<1x128x32xf32> to vector<128x32xf32>
    %cst_156 = arith.constant dense<0.000000e+00> : vector<2x32xf32>
    %220 = tpu.matmul %217, %219, %cst_156 {dimension_numbers = #tpu.dot_dimension_numbers<[1], [0], [0], [1], [0, 0, 1, 1], [], []>} : vector<2x128xf32>, vector<128x32xf32>, vector<2x32xf32> -> vector<2x32xf32>
    %221 = vector.broadcast %214 : vector<1x32xf32> to vector<2x32xf32>
    %222 = arith.addf %221, %220 : vector<2x32xf32>
    %c1_157 = arith.constant 1 : index
    %c0_158 = arith.constant 0 : index
    %c0_159 = arith.constant 0 : index
    %223 = vector.load %arg10[%c1_157, %c0_158, %c0_159] : memref<2x2x8xf32, #tpu.memory_space<vmem>>, vector<1x2x8xf32>
    %224 = vector.shape_cast %223 : vector<1x2x8xf32> to vector<2x8xf32>
    %cst_160 = arith.constant dense<0.000000e+00> : vector<2x128xf32>
    %225 = tpu.matmul %224, %213, %cst_160 {dimension_numbers = #tpu.dot_dimension_numbers<[1], [0], [0], [1], [0, 0, 1, 1], [], []>} : vector<2x8xf32>, vector<8x128xf32>, vector<2x128xf32> -> vector<2x128xf32>
    %c1_161 = arith.constant 1 : index
    %c0_162 = arith.constant 0 : index
    %c0_163 = arith.constant 0 : index
    %226 = vector.load %arg11[%c1_161, %c0_162, %c0_163] : memref<2x128x32xf32, #tpu.memory_space<vmem>>, vector<1x128x32xf32>
    %227 = vector.shape_cast %226 : vector<1x128x32xf32> to vector<128x32xf32>
    %cst_164 = arith.constant dense<0.000000e+00> : vector<2x32xf32>
    %228 = tpu.matmul %225, %227, %cst_164 {dimension_numbers = #tpu.dot_dimension_numbers<[1], [0], [0], [1], [0, 0, 1, 1], [], []>} : vector<2x128xf32>, vector<128x32xf32>, vector<2x32xf32> -> vector<2x32xf32>
    %229 = arith.addf %222, %228 : vector<2x32xf32>
    %c0_165 = arith.constant 0 : index
    %c0_166 = arith.constant 0 : index
    %230 = vector.load %arg13[%c0_165, %c0_166] : memref<2x32xf32, #tpu.memory_space<vmem>>, vector<2x32xf32>
    tpu.vector_store %arg13[%c0_165, %c0_166], %229 {strides = array<i32>} : memref<2x32xf32, #tpu.memory_space<vmem>>, vector<2x32xf32>,
    return
  }
}

</mosaic_0001>

<bundles_post_ra>
// kernel: conv_encoder_forward.1
= control target key start
LH: loop header
LB: loop body
LE: loop exit
PB: predicated region body
PF: predicated region fallthrough
CT: control target
= control target key end

     0   :  { %18 = vsyncpa [#allocation3], 0  ;;  %s5903_s0 = inlined_call_operand.vmem [shape: f32[64,128], index: 0, kind: input, shape index: {}]   ;;  %s5904_s1 = inlined_call_operand.vmem [shape: f32[4,32,64], index: 1, kind: input, shape index: {}]   ;;  %s5905_s2 = inlined_call_operand.vmem [shape: f32[4,128,256], index: 2, kind: input, shape index: {}]   ;;  %s5906_s3 = inlined_call_operand.vmem [shape: f32[1,256], index: 3, kind: input, shape index: {}]   ;;  %s5907_s4 = inlined_call_operand.vmem [shape: f32[4,16,32], index: 4, kind: input, shape index: {}]   ;;  %s5908_s5 = inlined_call_operand.hbm [shape: f32[4,256,256], index: 5, kind: input, shape index: {}]   ;;  %s5909_s6 = inlined_call_operand.vmem [shape: f32[1,256], index: 6, kind: input, shape index: {}]   ;;  %s5910_s7 = inlined_call_operand.vmem [shape: f32[4,8,16], index: 7, kind: input, shape index: {}]   ;;  %s5911_s8 = inlined_call_operand.hbm [shape: f32[4,256,128], index: 8, kind: input, shape index: {}]   ;;  %s5912_s9 = inlined_call_operand.vmem [shape: f32[1,128], index: 9, kind: input, shape index: {}]   ;;  %s5913_s10 = inlined_call_operand.vmem [shape: f32[2,2,8], index: 10, kind: input, shape index: {}]   ;;  %s5914_s11 = inlined_call_operand.vmem [shape: f32[2,128,32], index: 11, kind: input, shape index: {}]   ;;  %s5915_s12 = inlined_call_operand.vmem [shape: f32[1,32], index: 12, kind: input, shape index: {}]   ;;  %s5916_s13 = inlined_call_operand.hbm [shape: f32[2,32], index: 13, kind: output, shape index: {}]  }
   0x1   :  { %19 = vsyncpa [#allocation6], 0 }
   0x2   :  { %20 = vsyncpa [#allocation4], 0  ;;  %s4804_s25 = smov [#allocation2]   ;;  %s4732_s29 = scalar_lea.hbm %s5908_s5, 32768 }
   0x3   :  { %s36_s26 = sshll.u32 %s4804_s25, 4  ;;  %p4733_p0 = scmp.ne.s32.totalorder %s5908_s5, %s4732_s29  ;;  %s37_s26 = int_to_ptr.vmem [resolvable:$true] %s36_s26 }
   0x4   :  { %p4736_p1 = scmp.lt.u32.totalorder %s4732_s29, %s5908_s5 }
   0x6   :  { %p4738_p2 = pnand %p4736_p1, %p4733_p0 }
   0x8   :  { %4741 = shalt.err (!%p4738_p2)
}
   0x9   :  { %s4742_s17 = scalar_lea.vmem %s37_s26, 32768  ;;  %p4747_p4 = scmp.lt.s32.totalorder %s37_s26, %s37_s26 }
   0xa   :  { %p4743_p3 = scmp.ne.s32.totalorder %s37_s26, %s4742_s17  ;;  %p4748_p5 = scmp.lt.s32.totalorder %s4742_s17, %s4742_s17 }
   0xc   :  { %p4749_p6 = por %p4748_p5, %p4747_p4 }
   0xe   :  { %p4750_p7 = pnand %p4749_p6, %p4743_p3 }
  0x10   :  { %4753 = shalt.err (!%p4750_p7)
}
  0x11   :  { %s4805_s18 = smov 256   ;;  %s4806_s19 = smov 16  }
  0x12   :  { %42 = dma.hbm_to_vmem [thread:$0]  %s5908_s5, 32768, %s37_s26, [#allocation3], %s4805_s18, %s4805_s18, %s4806_s19  }
  0x13   :  { %s4807_s22 = smov [#allocation5]   ;;  %s4754_s27 = scalar_lea.hbm %s5911_s8, 16384 }
  0x14   :  { %s52_s23 = sshll.u32 %s4807_s22, 4  ;;  %p4755_p8 = scmp.ne.s32.totalorder %s5911_s8, %s4754_s27  ;;  %s53_s23 = int_to_ptr.vmem [resolvable:$true] %s52_s23 }
  0x15   :  { %p4758_p9 = scmp.lt.u32.totalorder %s4754_s27, %s5911_s8 }
  0x17   :  { %p4760_p10 = pnand %p4758_p9, %p4755_p8 }
  0x19   :  { %4763 = shalt.err (!%p4760_p10)
}
  0x1a   :  { %s4764_s15 = scalar_lea.vmem %s53_s23, 16384  ;;  %p4769_p12 = scmp.lt.s32.totalorder %s53_s23, %s53_s23 }
  0x1b   :  { %p4765_p11 = scmp.ne.s32.totalorder %s53_s23, %s4764_s15  ;;  %p4770_p13 = scmp.lt.s32.totalorder %s4764_s15, %s4764_s15 }
  0x1d   :  { %p4771_p0 = por %p4770_p13, %p4769_p12 }
  0x1f   :  { %p4772_p1 = pnand %p4771_p0, %p4765_p11 }
  0x21   :  { %4775 = shalt.err (!%p4772_p1)
}
  0x22   :  { %s4808_s5 = smov 128   ;;  %s4809_s26 = smov 8  }
  0x23   :  { %58 = dma.hbm_to_vmem [thread:$0]  %s5911_s8, 16384, %s53_s23, [#allocation6], %s4808_s5, %s4808_s5, %s4809_s26  }
  0x24   :  { %4798 = dma.done.wait [#allocation3], 32768  }
  0x25   :  { %4799 = vsyncadd [#allocation3], 4294934528 }
  0x26   :  { %4800 = dma.done.wait [#allocation6], 16384  }
  0x27   :  { %4801 = vsyncadd [#allocation6], 4294950912  ;;  %v73_v0 = vld [vmem:[%s5903_s0] sm:$0xff]  ;;  %v74_v1 = vld [vmem:[%s5903_s0 + $0x8] sm:$0xff]  ;;  %vm86_vm0 = vcmask 523264   ;;  %vm1239_vm9 = vcmask 261120  }
  0x28   :  { %v75_v2 = vld [vmem:[%s5903_s0 + $0x10] sm:$0xff]  ;;  %v4918_v3 = vpack.c.bf16 %v74_v1, %v73_v0  ;;  %v76_v4 = vld [vmem:[%s5903_s0 + $0x18] sm:$0xff]  ;;  %v77_v6 = vld [vmem:[%s5903_s0 + $0x20] sm:$0xff]  ;;  %vm2285_vm14 = vcmask 130048   ;;  %vm4812_vm15 = vmmov 0  }
  0x29   :  { %v4923_v5 = vpack.c.bf16 %v76_v4, %v75_v2  ;;  %v78_v7 = vld [vmem:[%s5903_s0 + $0x28] sm:$0xff]  ;;  %v82_v8 = vld [vmem:[%s5904_s1] sm:$0xff]  ;;  %v79_v10 = vld [vmem:[%s5903_s0 + $0x30] sm:$0xff] }
  0x2a   :  { %3947 = vmatprep.subr.bf16.mxu0 %v4918_v3  ;;  %3794 = vmatprep.mubr.msk.f32.mxu0 %vm86_vm0, %v82_v8  ;;  %v4938_v9 = vpack.c.bf16 %v78_v7, %v77_v6  ;;  %v80_v11 = vld [vmem:[%s5903_s0 + $0x38] sm:$0xff]  ;;  %v185_v12 = vld [vmem:[%s5905_s2 + $0x8] sm:$0xff]  ;;  %v184_v14 = vld [vmem:[%s5905_s2] sm:$0xff] }
  0x2b   :  { %3949 = vmatpush3.bf16.msra.mxu0 %v4918_v3  ;;  %v187_v13 = vld [vmem:[%s5905_s2 + $0x18] sm:$0xff]  ;;  %v4957_v15 = vpack.c.bf16 %v80_v11, %v79_v10  ;;  %v186_v17 = vld [vmem:[%s5905_s2 + $0x10] sm:$0xff]  ;;  %v189_v18 = vld [vmem:[%s5905_s2 + $0x28] sm:$0xff] }
  0x2c   :  { %3951 = vmatprep.subr.bf16.mxu0 %v4923_v5  ;;  %v3962_v16 = vpack.c.bf16 %v187_v13, %v185_v12  ;;  %v191_v19 = vld [vmem:[%s5905_s2 + $0x38] sm:$0xff]  ;;  %v3964_v20 = vpack.c.bf16 %v186_v17, %v184_v14  ;;  %v188_v22 = vld [vmem:[%s5905_s2 + $0x20] sm:$0xff]  ;;  %v190_v23 = vld [vmem:[%s5905_s2 + $0x30] sm:$0xff] }
  0x2d   :  { %v3966_v21 = vpack.c.bf16 %v191_v19, %v189_v18  ;;  %v193_v24 = vld [vmem:[%s5905_s2 + $0x48] sm:$0xff]  ;;  %v195_v25 = vld [vmem:[%s5905_s2 + $0x58] sm:$0xff]  ;;  %v3968_v26 = vpack.c.bf16 %v190_v23, %v188_v22  ;;  %v192_v28 = vld [vmem:[%s5905_s2 + $0x40] sm:$0xff] }
  0x2e   :  { %3963 = vmatprep.subr.bf16.mxu1 %v3962_v16  ;;  %v3970_v27 = vpack.c.bf16 %v195_v25, %v193_v24  ;;  %v194_v29 = vld [vmem:[%s5905_s2 + $0x50] sm:$0xff]  ;;  %v197_v30 = vld [vmem:[%s5905_s2 + $0x68] sm:$0xff]  ;;  %v199_v31 = vld [vmem:[%s5905_s2 + $0x78] sm:$0xff] }
  0x2f   :  { %3953 = vmatpush3.bf16.msra.mxu0 %v4923_v5  ;;  %3965 = vmatpush1.bf16.msra.mxu1 %v3964_v20  ;;  %v83_v32 = vld [vmem:[%s5904_s1 + $0x8] sm:$0xff]  ;;  %v84_v33 = vld [vmem:[%s5904_s1 + $0x10] sm:$0xff]  ;;  %v3972_v34 = vpack.c.bf16 %v194_v29, %v192_v28  ;;  %v3974_v35 = vpack.c.bf16 %v199_v31, %v197_v30  ;;  %v196_v36 = vld [vmem:[%s5905_s2 + $0x60] sm:$0xff] }
  0x30   :  { %3955 = vmatprep.subr.bf16.mxu0 %v4938_v9  ;;  %3967 = vmatprep.subr.bf16.mxu1 %v3966_v21  ;;  %v198_v37 = vld [vmem:[%s5905_s2 + $0x70] sm:$0xff]  ;;  %v201_v38 = vld [vmem:[%s5905_s2 + $0x88] sm:$0xff]  ;;  %v203_v39 = vld [vmem:[%s5905_s2 + $0x98] sm:$0xff] }
  0x31   :  { %v85_v40 = vld [vmem:[%s5904_s1 + $0x18] sm:$0xff]  ;;  %v3390_v41 = vld [vmem:[%s5904_s1 + $0x20] sm:$0xff]  ;;  %v3976_v42 = vpack.c.bf16 %v198_v37, %v196_v36  ;;  %v3978_v43 = vpack.c.bf16 %v203_v39, %v201_v38  ;;  %v202_v45 = vld [vmem:[%s5905_s2 + $0x90] sm:$0xff] }
  0x32   :  { %v200_v44 = vld [vmem:[%s5905_s2 + $0x80] sm:$0xff]  ;;  %v205_v46 = vld [vmem:[%s5905_s2 + $0xa8] sm:$0xff]  ;;  %v207_v47 = vld [vmem:[%s5905_s2 + $0xb8] sm:$0xff] }
  0x33   :  { %3957 = vmatpush3.bf16.msra.mxu0 %v4938_v9  ;;  %3969 = vmatpush1.bf16.msra.mxu1 %v3968_v26  ;;  %v3980_v48 = vpack.c.bf16 %v202_v45, %v200_v44  ;;  %v3982_v49 = vpack.c.bf16 %v207_v47, %v205_v46  ;;  %v204_v50 = vld [vmem:[%s5905_s2 + $0xa0] sm:$0xff]  ;;  %v206_v51 = vld [vmem:[%s5905_s2 + $0xb0] sm:$0xff]  ;;  %v209_v52 = vld [vmem:[%s5905_s2 + $0xc8] sm:$0xff] }
  0x34   :  { %3959 = vmatprep.subr.bf16.mxu0 %v4957_v15  ;;  %3971 = vmatprep.subr.bf16.mxu1 %v3970_v27  ;;  %v211_v53 = vld [vmem:[%s5905_s2 + $0xd8] sm:$0xff]  ;;  %v3984_v54 = vpack.c.bf16 %v206_v51, %v204_v50  ;;  %v208_v56 = vld [vmem:[%s5905_s2 + $0xc0] sm:$0xff]  ;;  %v210_v57 = vld [vmem:[%s5905_s2 + $0xd0] sm:$0xff] }
  0x35   :  { %v3986_v55 = vpack.c.bf16 %v211_v53, %v209_v52  ;;  %v213_v58 = vld [vmem:[%s5905_s2 + $0xe8] sm:$0xff]  ;;  %v215_v59 = vld [vmem:[%s5905_s2 + $0xf8] sm:$0xff]  ;;  %v3392_v61 = vld [vmem:[%s5904_s1 + $0x30] sm:$0xff]  ;;  %v3988_v62 = vpack.c.bf16 %v210_v57, %v208_v56 }
  0x36   :  { %v3391_v60 = vld [vmem:[%s5904_s1 + $0x28] sm:$0xff]  ;;  %v3990_v63 = vpack.c.bf16 %v215_v59, %v213_v58  ;;  %v212_v0 = vld [vmem:[%s5905_s2 + $0xe0] sm:$0xff]  ;;  %v214_v1 = vld [vmem:[%s5905_s2 + $0xf0] sm:$0xff] }
  0x37   :  { %3961 = vmatpush3.bf16.msra.mxu0 %v4957_v15  ;;  %3973 = vmatpush1.bf16.msra.mxu1 %v3972_v34  ;;  %v3393_v2 = vld [vmem:[%s5904_s1 + $0x38] sm:$0xff]  ;;  %v3430_v4 = vld [vmem:[%s5904_s1 + $0x40] sm:$0xff]  ;;  %v3992_v6 = vpack.c.bf16 %v214_v1, %v212_v0  ;;  %v3431_v7 = vld [vmem:[%s5904_s1 + $0x48] sm:$0xff] }
  0x38   :  { %3995 = vmatprep.subr.bf16.mxu0 %v4918_v3  ;;  %3975 = vmatprep.subr.bf16.mxu1 %v3974_v35  ;;  %v3432_v8 = vld [vmem:[%s5904_s1 + $0x50] sm:$0xff]  ;;  %v3433_v10 = vld [vmem:[%s5904_s1 + $0x58] sm:$0xff]  ;;  %v3470_v11 = vld [vmem:[%s5904_s1 + $0x60] sm:$0xff] }
  0x39   :  { %v3472_v12 = vld [vmem:[%s5904_s1 + $0x70] sm:$0xff]  ;;  %v3401_v13 = vld [vmem:[%s5905_s2 + $0x118] sm:$0xff]  ;;  %v3398_v16 = vld [vmem:[%s5905_s2 + $0x100] sm:$0xff] }
  0x3a   :  { %3795 = vmatmul.mubr.msk.f32.vlgmr.msra.gmra.mrb[0].mxu0 %vm86_vm0, %v83_v32  ;;  %v3400_v17 = vld [vmem:[%s5905_s2 + $0x110] sm:$0xff]  ;;  %v3403_v18 = vld [vmem:[%s5905_s2 + $0x128] sm:$0xff]  ;;  %v3405_v19 = vld [vmem:[%s5905_s2 + $0x138] sm:$0xff] }
  0x3b   :  { %3997 = vmatpush3.bf16.msra.mxu0 %v4918_v3  ;;  %3797 = vmatprep.mubr.msk.f32.mxu0 %vm86_vm0, %v84_v33  ;;  %v4012_v20 = vpack.c.bf16 %v3400_v17, %v3398_v16  ;;  %v4014_v22 = vpack.c.bf16 %v3405_v19, %v3403_v18  ;;  %v3402_v23 = vld [vmem:[%s5905_s2 + $0x120] sm:$0xff]  ;;  %v3404_v24 = vld [vmem:[%s5905_s2 + $0x130] sm:$0xff]  ;;  %v3407_v26 = vld [vmem:[%s5905_s2 + $0x148] sm:$0xff] }
  0x3c   :  { %3999 = vmatprep.subr.bf16.mxu0 %v4923_v5  ;;  %3977 = vmatpush1.bf16.msra.mxu1 %v3976_v42  ;;  %v3409_v27 = vld [vmem:[%s5905_s2 + $0x158] sm:$0xff]  ;;  %v4016_v28 = vpack.c.bf16 %v3404_v24, %v3402_v23  ;;  %v3406_v30 = vld [vmem:[%s5905_s2 + $0x140] sm:$0xff]  ;;  %v3408_v31 = vld [vmem:[%s5905_s2 + $0x150] sm:$0xff] }
  0x3d   :  { %3979 = vmatprep.subr.bf16.mxu1 %v3978_v43  ;;  %v4018_v29 = vpack.c.bf16 %v3409_v27, %v3407_v26  ;;  %v3411_v33 = vld [vmem:[%s5905_s2 + $0x168] sm:$0xff]  ;;  %v3413_v34 = vld [vmem:[%s5905_s2 + $0x178] sm:$0xff]  ;;  %v4020_v36 = vpack.c.bf16 %v3408_v31, %v3406_v30  ;;  %v3410_v38 = vld [vmem:[%s5905_s2 + $0x160] sm:$0xff] }
  0x3e   :  { %3798 = vmatmul.mubr.msk.f32.gmra.mrb[2].mxu0 %vm86_vm0, %v85_v40  ;;  %v4022_v37 = vpack.c.bf16 %v3413_v34, %v3411_v33  ;;  %v3412_v39 = vld [vmem:[%s5905_s2 + $0x170] sm:$0xff]  ;;  %v3415_v40 = vld [vmem:[%s5905_s2 + $0x188] sm:$0xff]  ;;  %v3414_v44 = vld [vmem:[%s5905_s2 + $0x180] sm:$0xff] }
  0x3f   :  { %4001 = vmatpush3.bf16.msra.mxu0 %v4923_v5  ;;  %3816 = vmatprep.mubr.msk.f32.mxu0 %vm86_vm0, %v3390_v41  ;;  %v3417_v41 = vld [vmem:[%s5905_s2 + $0x198] sm:$0xff]  ;;  %v4024_v42 = vpack.c.bf16 %v3412_v39, %v3410_v38  ;;  %v3416_v45 = vld [vmem:[%s5905_s2 + $0x190] sm:$0xff]  ;;  %v3419_v46 = vld [vmem:[%s5905_s2 + $0x1a8] sm:$0xff] }
  0x40   :  { %4003 = vmatprep.subr.bf16.mxu0 %v4938_v9  ;;  %3981 = vmatpush1.bf16.msra.mxu1 %v3980_v48  ;;  %v4026_v43 = vpack.c.bf16 %v3417_v41, %v3415_v40  ;;  %v3421_v47 = vld [vmem:[%s5905_s2 + $0x1b8] sm:$0xff]  ;;  %v4028_v48 = vpack.c.bf16 %v3416_v45, %v3414_v44  ;;  %v3418_v50 = vld [vmem:[%s5905_s2 + $0x1a0] sm:$0xff]  ;;  %v3420_v51 = vld [vmem:[%s5905_s2 + $0x1b0] sm:$0xff] }
  0x41   :  { %3983 = vmatprep.subr.bf16.mxu1 %v3982_v49  ;;  %v4030_v49 = vpack.c.bf16 %v3421_v47, %v3419_v46  ;;  %v3423_v53 = vld [vmem:[%s5905_s2 + $0x1c8] sm:$0xff]  ;;  %v4032_v56 = vpack.c.bf16 %v3420_v51, %v3418_v50  ;;  %v3422_v58 = vld [vmem:[%s5905_s2 + $0x1c0] sm:$0xff]  ;;  %v3424_v59 = vld [vmem:[%s5905_s2 + $0x1d0] sm:$0xff] }
  0x42   :  { %v4036_v0 = vpack.c.bf16 %v3424_v59, %v3422_v58  ;;  %v3444_v16 = vld [vmem:[%s5905_s2 + $0x230] sm:$0xff]  ;;  %v3447_v18 = vld [vmem:[%s5905_s2 + $0x248] sm:$0xff]  ;;  %v3449_v19 = vld [vmem:[%s5905_s2 + $0x258] sm:$0xff] }
  0x43   :  { %4005 = vmatpush3.bf16.msra.mxu0 %v4938_v9  ;;  %v3446_v23 = vld [vmem:[%s5905_s2 + $0x240] sm:$0xff]  ;;  %v3448_v24 = vld [vmem:[%s5905_s2 + $0x250] sm:$0xff]  ;;  %v3451_v26 = vld [vmem:[%s5905_s2 + $0x268] sm:$0xff] }
  0x44   :  { %4007 = vmatprep.subr.bf16.mxu0 %v4957_v15  ;;  %3985 = vmatpush1.bf16.msra.mxu1 %v3984_v54  ;;  %v3425_v54 = vld [vmem:[%s5905_s2 + $0x1d8] sm:$0xff]  ;;  %v3450_v31 = vld [vmem:[%s5905_s2 + $0x260] sm:$0xff]  ;;  %v3455_v33 = vld [vmem:[%s5905_s2 + $0x288] sm:$0xff] }
  0x45   :  { %3987 = vmatprep.subr.bf16.mxu1 %v3986_v55  ;;  %v4034_v57 = vpack.c.bf16 %v3425_v54, %v3423_v53  ;;  %v3453_v27 = vld [vmem:[%s5905_s2 + $0x278] sm:$0xff]  ;;  %v3456_v38 = vld [vmem:[%s5905_s2 + $0x290] sm:$0xff]  ;;  %v3459_v39 = vld [vmem:[%s5905_s2 + $0x2a8] sm:$0xff] }
  0x46   :  { %v4070_v30 = vpack.c.bf16 %v3453_v27, %v3451_v26  ;;  %v3457_v34 = vld [vmem:[%s5905_s2 + $0x298] sm:$0xff]  ;;  %v3460_v44 = vld [vmem:[%s5905_s2 + $0x2b0] sm:$0xff]  ;;  %v3463_v46 = vld [vmem:[%s5905_s2 + $0x2c8] sm:$0xff] }
  0x47   :  { %4009 = vmatpush3.bf16.msra.mxu0 %v4957_v15  ;;  %v3461_v40 = vld [vmem:[%s5905_s2 + $0x2b8] sm:$0xff]  ;;  %v3462_v51 = vld [vmem:[%s5905_s2 + $0x2c0] sm:$0xff]  ;;  %v3467_v54 = vld [vmem:[%s5905_s2 + $0x2e8] sm:$0xff] }
  0x48   :  { %4043 = vmatprep.subr.bf16.mxu0 %v4918_v3  ;;  %3989 = vmatpush1.bf16.msra.mxu1 %v3988_v62  ;;  %v3429_v62 = vld [vmem:[%s5905_s2 + $0x1f8] sm:$0xff]  ;;  %v3466_v59 = vld [vmem:[%s5905_s2 + $0x2e0] sm:$0xff] }
  0x49   :  { %3991 = vmatprep.subr.bf16.mxu1 %v3990_v63  ;;  %v3465_v47 = vld [vmem:[%s5905_s2 + $0x2d8] sm:$0xff]  ;;  %v3494_v27 = vld [vmem:[%s5905_s2 + $0x380] sm:$0xff] }
  0x4a   :  { %3817 = vmatmul.mubr.msk.f32.vlgmr.msra.gmra.mrb[4].mxu0 %vm86_vm0, %v3391_v60  ;;  %v4082_v50 = vpack.c.bf16 %v3465_v47, %v3463_v46  ;;  %v3508_v46 = vld [vmem:[%s5905_s2 + $0x3f0] sm:$0xff] }
  0x4b   :  { %4045 = vmatpush3.bf16.msra.mxu0 %v4918_v3  ;;  %3819 = vmatprep.mubr.msk.f32.mxu0 %vm86_vm0, %v3392_v61  ;;  %v3427_v61 = vld [vmem:[%s5905_s2 + $0x1e8] sm:$0xff] }
  0x4c   :  { %4047 = vmatprep.subr.bf16.mxu0 %v4923_v5  ;;  %3993 = vmatpush1.bf16.msra.mxu1 %v3992_v6  ;;  %v4038_v1 = vpack.c.bf16 %v3429_v62, %v3427_v61  ;;  %v3439_v6 = vld [vmem:[%s5905_s2 + $0x208] sm:$0xff]  ;;  %v3481_v62 = vld [vmem:[%s5905_s2 + $0x318] sm:$0xff] }
  0x4d   :  { %v3479_v61 = vld [vmem:[%s5905_s2 + $0x308] sm:$0xff] }
  0x4e   :  { %3820 = vmatmul.mubr.msk.f32.gmra.mrb[6].mxu0 %vm86_vm0, %v3393_v2  ;;  %v3426_v2 = vld [vmem:[%s5905_s2 + $0x1e0] sm:$0xff] }
  0x4f   :  { %4049 = vmatpush3.bf16.msra.mxu0 %v4923_v5  ;;  %3838 = vmatprep.mubr.msk.f32.mxu0 %vm86_vm0, %v3430_v4  ;;  %v3428_v4 = vld [vmem:[%s5905_s2 + $0x1f0] sm:$0xff] }
  0x50   :  { %4051 = vmatprep.subr.bf16.mxu0 %v4938_v9 }
  0x53   :  { %4053 = vmatpush3.bf16.msra.mxu0 %v4938_v9 }
  0x54   :  { %4055 = vmatprep.subr.bf16.mxu0 %v4957_v15 }
  0x57   :  { %4057 = vmatpush3.bf16.msra.mxu0 %v4957_v15 }
  0x58   :  { %4091 = vmatprep.subr.bf16.mxu0 %v4918_v3 }
  0x5a   :  { %3839 = vmatmul.mubr.msk.f32.vlgmr.msra.gmra.mrb[8].mxu0 %vm86_vm0, %v3431_v7  ;;  %v3441_v7 = vld [vmem:[%s5905_s2 + $0x218] sm:$0xff] }
  0x5b   :  { %4093 = vmatpush3.bf16.msra.mxu0 %v4918_v3  ;;  %3841 = vmatprep.mubr.msk.f32.mxu0 %vm86_vm0, %v3432_v8  ;;  %v3471_v3 = vld [vmem:[%s5904_s1 + $0x68] sm:$0xff]  ;;  %v4040_v8 = vpack.c.bf16 %v3428_v4, %v3426_v2  ;;  %v3480_v2 = vld [vmem:[%s5905_s2 + $0x310] sm:$0xff] }
  0x5c   :  { %4095 = vmatprep.subr.bf16.mxu0 %v4923_v5  ;;  %v3483_v4 = vld [vmem:[%s5905_s2 + $0x328] sm:$0xff] }
  0x5e   :  { %3842 = vmatmul.mubr.msk.f32.gmra.mrb[10].mxu0 %vm86_vm0, %v3433_v10  ;;  %v4058_v10 = vpack.c.bf16 %v3441_v7, %v3439_v6  ;;  %v3485_v6 = vld [vmem:[%s5905_s2 + $0x338] sm:$0xff] }
  0x5f   :  { %4097 = vmatpush3.bf16.msra.mxu0 %v4923_v5  ;;  %3860 = vmatprep.mubr.msk.f32.mxu0 %vm86_vm0, %v3470_v11  ;;  %v3473_v5 = vld [vmem:[%s5904_s1 + $0x78] sm:$0xff]  ;;  %v3438_v11 = vld [vmem:[%s5905_s2 + $0x200] sm:$0xff] }
  0x60   :  { %4099 = vmatprep.subr.bf16.mxu0 %v4938_v9 }
  0x63   :  { %4101 = vmatpush3.bf16.msra.mxu0 %v4938_v9  ;;  %v3399_v9 = vld [vmem:[%s5905_s2 + $0x108] sm:$0xff] }
  0x64   :  { %4103 = vmatprep.subr.bf16.mxu0 %v4957_v15  ;;  %v4010_v14 = vpack.c.bf16 %v3401_v13, %v3399_v9 }
  0x66   :  { %4011 = vmatprep.subr.bf16.mxu1 %v4010_v14  ;;  %v3442_v14 = vld [vmem:[%s5905_s2 + $0x220] sm:$0xff] }
  0x67   :  { %4105 = vmatpush3.bf16.msra.mxu0 %v4957_v15  ;;  %v4810_v15 = vmov 0.0  }
  0x68   :  { %280 = vmatprep.mubr.f32.mxu1 %v4810_v15 }
  0x6a   :  { %3861 = vmatmul.mubr.msk.f32.vlgmr.msra.gmra.mrb[12].mxu0 %vm86_vm0, %v3471_v3  ;;  %v3440_v3 = vld [vmem:[%s5905_s2 + $0x210] sm:$0xff] }
  0x6b   :  { %3863 = vmatprep.mubr.msk.f32.mxu0 %vm86_vm0, %v3472_v12  ;;  %v3443_v12 = vld [vmem:[%s5905_s2 + $0x228] sm:$0xff]  ;;  %v4060_v9 = vpack.c.bf16 %v3440_v3, %v3438_v11  ;;  %v3484_v11 = vld [vmem:[%s5905_s2 + $0x330] sm:$0xff] }
  0x6c   :  { %v3487_v3 = vld [vmem:[%s5905_s2 + $0x348] sm:$0xff] }
  0x6e   :  { %3864 = vmatmul.mubr.msk.f32.gmra.mrb[14].mxu0 %vm86_vm0, %v3473_v5  ;;  %v3445_v5 = vld [vmem:[%s5905_s2 + $0x238] sm:$0xff] }
  0x6f   :  { %1310 = vmatprep.mubr.f32.mxu0 %v4810_v15  ;;  %v4062_v13 = vpack.c.bf16 %v3445_v5, %v3443_v12  ;;  %v3489_v12 = vld [vmem:[%s5905_s2 + $0x358] sm:$0xff] }
 0x10d   :  { %v3796_v21 = vpop.f32.mrb[0].mxu0 }
 0x10e   :  { %v165_v25 = vpop.f32.mrb[1].mxu0 }
 0x10f   :  { %281 = vmatmul.mubr.f32.vlgmr.msra.gmra.mrb[0].mxu1 %v165_v25 }
 0x110   :  { %4013 = vmatpush1.bf16.msra.mxu1 %v4012_v20  ;;  %286 = vmatprep.mubr.f32.mxu1 %v4810_v15 }
 0x111   :  { %4015 = vmatprep.subr.bf16.mxu1 %v4014_v22  ;;  %v3799_v32 = vpop.f32.mrb[2].mxu0  ;;  %v4066_v22 = vpack.c.bf16 %v3449_v19, %v3447_v18  ;;  %v3493_v18 = vld [vmem:[%s5905_s2 + $0x378] sm:$0xff] }
 0x112   :  { %v175_v35 = vpop.f32.mrb[3].mxu0 }
 0x113   :  { %287 = vmatmul.mubr.f32.gmra.mrb[2].mxu1 %v3796_v21  ;;  %v4064_v21 = vpack.c.bf16 %v3444_v16, %v3442_v14  ;;  %v3488_v14 = vld [vmem:[%s5905_s2 + $0x350] sm:$0xff]  ;;  %v3491_v16 = vld [vmem:[%s5905_s2 + $0x368] sm:$0xff] }
 0x114   :  { %4017 = vmatpush1.bf16.msra.mxu1 %v4016_v28  ;;  %292 = vmatprep.mubr.f32.mxu1 %v4810_v15 }
 0x115   :  { %4019 = vmatprep.subr.bf16.mxu1 %v4018_v29  ;;  %v4068_v29 = vpack.c.bf16 %v3448_v24, %v3446_v23  ;;  %v3495_v23 = vld [vmem:[%s5905_s2 + $0x388] sm:$0xff] }
 0x117   :  { %293 = vmatmul.mubr.f32.gmra.mrb[4].mxu1 %v175_v35 }
 0x118   :  { %4021 = vmatpush1.bf16.msra.mxu1 %v4020_v36  ;;  %298 = vmatprep.mubr.f32.mxu1 %v4810_v15  ;;  %v4074_v36 = vpack.c.bf16 %v3457_v34, %v3455_v33  ;;  %v3498_v33 = vld [vmem:[%s5905_s2 + $0x3a0] sm:$0xff]  ;;  %v3500_v34 = vld [vmem:[%s5905_s2 + $0x3b0] sm:$0xff] }
 0x119   :  { %4023 = vmatprep.subr.bf16.mxu1 %v4022_v37  ;;  %v3454_v37 = vld [vmem:[%s5905_s2 + $0x280] sm:$0xff] }
 0x11a   :  { %v4076_v41 = vpack.c.bf16 %v3456_v38, %v3454_v37  ;;  %v3502_v38 = vld [vmem:[%s5905_s2 + $0x3c0] sm:$0xff] }
 0x11b   :  { %299 = vmatmul.mubr.f32.gmra.mrb[6].mxu1 %v3799_v32  ;;  %v3452_v32 = vld [vmem:[%s5905_s2 + $0x270] sm:$0xff] }
 0x11c   :  { %4025 = vmatpush1.bf16.msra.mxu1 %v4024_v42  ;;  %523 = vmatprep.mubr.f32.mxu1 %v4810_v15  ;;  %v4072_v35 = vpack.c.bf16 %v3452_v32, %v3450_v31  ;;  %v4078_v42 = vpack.c.bf16 %v3461_v40, %v3459_v39  ;;  %v3504_v39 = vld [vmem:[%s5905_s2 + $0x3d0] sm:$0xff]  ;;  %v3507_v40 = vld [vmem:[%s5905_s2 + $0x3e8] sm:$0xff] }
 0x11d   :  { %4027 = vmatprep.subr.bf16.mxu1 %v4026_v43  ;;  %v3818_v52 = vpop.f32.mrb[4].mxu0  ;;  %v3458_v43 = vld [vmem:[%s5905_s2 + $0x2a0] sm:$0xff] }
 0x11e   :  { %v407_v55 = vpop.f32.mrb[5].mxu0 }
 0x120   :  { %4029 = vmatpush1.bf16.msra.mxu1 %v4028_v48 }
 0x121   :  { %4031 = vmatprep.subr.bf16.mxu1 %v4030_v49  ;;  %v3821_v60 = vpop.f32.mrb[6].mxu0  ;;  %v4080_v49 = vpack.c.bf16 %v3460_v44, %v3458_v43  ;;  %v3506_v44 = vld [vmem:[%s5905_s2 + $0x3e0] sm:$0xff] }
 0x122   :  { %v417_v63 = vpop.f32.mrb[7].mxu0  ;;  %v4136_v47 = vpack.c.bf16 %v3508_v46, %v3506_v44 }
 0x124   :  { %4033 = vmatpush1.bf16.msra.mxu1 %v4032_v56 }
 0x125   :  { %4035 = vmatprep.subr.bf16.mxu1 %v4034_v57 }
 0x128   :  { %4037 = vmatpush1.bf16.msra.mxu1 %v4036_v0  ;;  %v4106_v0 = vpack.c.bf16 %v3481_v62, %v3479_v61 }
 0x129   :  { %4039 = vmatprep.subr.bf16.mxu1 %v4038_v1  ;;  %v3478_v1 = vld [vmem:[%s5905_s2 + $0x300] sm:$0xff] }
 0x12a   :  { %v4108_v7 = vpack.c.bf16 %v3480_v2, %v3478_v1 }
 0x12c   :  { %4041 = vmatpush1.bf16.msra.mxu1 %v4040_v8  ;;  %v4110_v8 = vpack.c.bf16 %v3485_v6, %v3483_v4 }
 0x12d   :  { %4059 = vmatprep.subr.bf16.mxu1 %v4058_v10  ;;  %v5259_v17 = vpop.f32.mrb[8].mxu0  ;;  %v3482_v10 = vld [vmem:[%s5905_s2 + $0x320] sm:$0xff] }
 0x12e   :  { %v5267_v20 = vpop.f32.mrb[9].mxu0  ;;  %v4112_v5 = vpack.c.bf16 %v3484_v11, %v3482_v10 }
 0x12f   :  { %524 = vmatmul.mubr.f32.vlgmr.msra.gmra.mrb[0].mxu1 %v407_v55  ;;  %v3469_v55 = vld [vmem:[%s5905_s2 + $0x2f8] sm:$0xff] }
 0x130   :  { %4061 = vmatpush1.bf16.msra.mxu1 %v4060_v9  ;;  %529 = vmatprep.mubr.f32.mxu1 %v4810_v15  ;;  %v4086_v58 = vpack.c.bf16 %v3469_v55, %v3467_v54  ;;  %v4114_v9 = vpack.c.bf16 %v3489_v12, %v3487_v3 }
 0x131   :  { %4063 = vmatprep.subr.bf16.mxu1 %v4062_v13  ;;  %v5276_v25 = vpop.f32.mrb[10].mxu0  ;;  %v3486_v13 = vld [vmem:[%s5905_s2 + $0x340] sm:$0xff] }
 0x132   :  { %v5284_v28 = vpop.f32.mrb[11].mxu0  ;;  %v4116_v19 = vpack.c.bf16 %v3488_v14, %v3486_v13 }
 0x133   :  { %530 = vmatmul.mubr.f32.gmra.mrb[2].mxu1 %v3818_v52  ;;  %v3464_v52 = vld [vmem:[%s5905_s2 + $0x2d0] sm:$0xff] }
 0x134   :  { %4065 = vmatpush1.bf16.msra.mxu1 %v4064_v21  ;;  %535 = vmatprep.mubr.f32.mxu1 %v4810_v15  ;;  %v4084_v57 = vpack.c.bf16 %v3464_v52, %v3462_v51  ;;  %v3490_v21 = vld [vmem:[%s5905_s2 + $0x360] sm:$0xff] }
 0x135   :  { %4067 = vmatprep.subr.bf16.mxu1 %v4066_v22  ;;  %v3492_v22 = vld [vmem:[%s5905_s2 + $0x370] sm:$0xff] }
 0x136   :  { %v4120_v24 = vpack.c.bf16 %v3492_v22, %v3490_v21 }
 0x137   :  { %536 = vmatmul.mubr.f32.gmra.mrb[4].mxu1 %v417_v63 }
 0x138   :  { %4069 = vmatpush1.bf16.msra.mxu1 %v4068_v29  ;;  %541 = vmatprep.mubr.f32.mxu1 %v4810_v15  ;;  %v3496_v29 = vld [vmem:[%s5905_s2 + $0x390] sm:$0xff] }
 0x139   :  { %4071 = vmatprep.subr.bf16.mxu1 %v4070_v30  ;;  %v3499_v30 = vld [vmem:[%s5905_s2 + $0x3a8] sm:$0xff]  ;;  %v4124_v31 = vpack.c.bf16 %v3496_v29, %v3494_v27 }
 0x13b   :  { %542 = vmatmul.mubr.f32.gmra.mrb[6].mxu1 %v3821_v60  ;;  %v3468_v60 = vld [vmem:[%s5905_s2 + $0x2f0] sm:$0xff] }
 0x13c   :  { %4073 = vmatpush1.bf16.msra.mxu1 %v4072_v35  ;;  %755 = vmatprep.mubr.f32.mxu1 %v4810_v15  ;;  %v4088_v63 = vpack.c.bf16 %v3468_v60, %v3466_v59  ;;  %v3503_v35 = vld [vmem:[%s5905_s2 + $0x3c8] sm:$0xff] }
 0x13d   :  { %4075 = vmatprep.subr.bf16.mxu1 %v4074_v36  ;;  %v5319_v45 = vpop.f32.mrb[12].mxu0  ;;  %v4128_v36 = vpack.c.bf16 %v3500_v34, %v3498_v33 }
 0x13e   :  { %v5327_v48 = vpop.f32.mrb[13].mxu0 }
 0x140   :  { %4077 = vmatpush1.bf16.msra.mxu1 %v4076_v41  ;;  %v3509_v41 = vld [vmem:[%s5905_s2 + $0x3f8] sm:$0xff] }
 0x141   :  { %4079 = vmatprep.subr.bf16.mxu1 %v4078_v42  ;;  %v5335_v53 = vpop.f32.mrb[14].mxu0  ;;  %v4132_v42 = vpack.c.bf16 %v3504_v39, %v3502_v38  ;;  %v4134_v43 = vpack.c.bf16 %v3509_v41, %v3507_v40 }
 0x142   :  { %v5343_v56 = vpop.f32.mrb[15].mxu0 }
 0x144   :  { %4081 = vmatpush1.bf16.msra.mxu1 %v4080_v49  ;;  %v306_v49 = vlaneseq }
 0x145   :  { %4083 = vmatprep.subr.bf16.mxu1 %v4082_v50 }
 0x146   :  { %v5463_v50 = vshrl.u32 %v306_v49, 7 }
 0x148   :  { %4085 = vmatpush1.bf16.msra.mxu1 %v4084_v57  ;;  %v308_v51 = vsub.s32 0, %v5463_v50 }
 0x149   :  { %4087 = vmatprep.subr.bf16.mxu1 %v4086_v58 }
 0x14c   :  { %4089 = vmatpush1.bf16.msra.mxu1 %v4088_v63 }
 0x14d   :  { %4107 = vmatprep.subr.bf16.mxu1 %v4106_v0 }
 0x14f   :  { %756 = vmatmul.mubr.f32.vlgmr.msra.gmra.mrb[0].mxu1 %v5267_v20  ;;  %v4118_v20 = vpack.c.bf16 %v3493_v18, %v3491_v16 }
 0x150   :  { %4109 = vmatpush1.bf16.msra.mxu1 %v4108_v7  ;;  %761 = vmatprep.mubr.f32.mxu1 %v4810_v15 }
 0x151   :  { %4111 = vmatprep.subr.bf16.mxu1 %v4110_v8 }
 0x153   :  { %762 = vmatmul.mubr.f32.gmra.mrb[2].mxu1 %v5259_v17  ;;  %v3497_v17 = vld [vmem:[%s5905_s2 + $0x398] sm:$0xff] }
 0x154   :  { %4113 = vmatpush1.bf16.msra.mxu1 %v4112_v5  ;;  %767 = vmatprep.mubr.f32.mxu1 %v4810_v15  ;;  %v4122_v26 = vpack.c.bf16 %v3497_v17, %v3495_v23 }
 0x155   :  { %4115 = vmatprep.subr.bf16.mxu1 %v4114_v9 }
 0x157   :  { %768 = vmatmul.mubr.f32.gmra.mrb[4].mxu1 %v5284_v28  ;;  %v3501_v28 = vld [vmem:[%s5905_s2 + $0x3b8] sm:$0xff] }
 0x158   :  { %4117 = vmatpush1.bf16.msra.mxu1 %v4116_v19  ;;  %773 = vmatprep.mubr.f32.mxu1 %v4810_v15  ;;  %v4126_v32 = vpack.c.bf16 %v3501_v28, %v3499_v30 }
 0x159   :  { %4119 = vmatprep.subr.bf16.mxu1 %v4118_v20 }
 0x15b   :  { %774 = vmatmul.mubr.f32.gmra.mrb[6].mxu1 %v5276_v25  ;;  %v3505_v25 = vld [vmem:[%s5905_s2 + $0x3d8] sm:$0xff] }
 0x15c   :  { %4121 = vmatpush1.bf16.msra.mxu1 %v4120_v24  ;;  %987 = vmatprep.mubr.f32.mxu1 %v4810_v15  ;;  %v4130_v37 = vpack.c.bf16 %v3505_v25, %v3503_v35  ;;  %v4811_v25 = vmov -1.0  }
 0x15d   :  { %4123 = vmatprep.subr.bf16.mxu1 %v4122_v26 }
 0x160   :  { %4125 = vmatpush1.bf16.msra.mxu1 %v4124_v31 }
 0x161   :  { %4127 = vmatprep.subr.bf16.mxu1 %v4126_v32 }
 0x164   :  { %4129 = vmatpush1.bf16.msra.mxu1 %v4128_v36 }
 0x165   :  { %4131 = vmatprep.subr.bf16.mxu1 %v4130_v37 }
 0x168   :  { %4133 = vmatpush1.bf16.msra.mxu1 %v4132_v42 }
 0x169   :  { %4135 = vmatprep.subr.bf16.mxu1 %v4134_v43 }
 0x16c   :  { %4137 = vmatpush1.bf16.msra.mxu1 %v4136_v47 }
 0x16f   :  { %988 = vmatmul.mubr.f32.vlgmr.msra.gmra.mrb[0].mxu1 %v5327_v48  ;;  %v81_v48 = vld [vmem:[%s5906_s3] sm:$0x3] }
 0x170   :  { %993 = vmatprep.mubr.f32.mxu1 %v4810_v15  ;;  %v309_v52 = vrot.slane %v81_v48, %v308_v51 }
 0x173   :  { %994 = vmatmul.mubr.f32.gmra.mrb[2].mxu1 %v5319_v45  ;;  %v312_v45 = vsub.s32 1, %v5463_v50 }
 0x174   :  { %999 = vmatprep.mubr.f32.mxu1 %v4810_v15 }
 0x175   :  { %v313_v54 = vrot.slane %v81_v48, %v312_v45 }
 0x177   :  { %1000 = vmatmul.mubr.f32.gmra.mrb[4].mxu1 %v5343_v56 }
 0x178   :  { %1005 = vmatprep.mubr.f32.mxu1 %v4810_v15 }
 0x17b   :  { %1006 = vmatmul.mubr.f32.gmra.mrb[6].mxu1 %v5335_v53 }
 0x17c   :  { %2353 = vmatprep.mubr.f32.mxu1 %v4810_v15 }
 0x242   :  { %v989_v53 = vpop.f32.mrb[0].mxu1 }
 0x243   :  { %v4618_v55 = vadd.f32 %v989_v53, %v309_v52  ;;  %v991_v56 = vpop.f32.mrb[1].mxu1 }
 0x244   :  { %v5474_v57 = vadd.f32 %v991_v56, %v313_v54 }
 0x245   :  { %v1028_v58 = vmul.f32 0.70710677, %v4618_v55  ;;  %v5497_v30 = vmul.f32 0.5, %v4618_v55 }
 0x246   :  { %v1029_v59 = vmul.f32 0.70710677, %v5474_v57  ;;  %v995_v60 = vpop.f32.mrb[2].mxu1 }
 0x247   :  { %v1052_v61 = vand.u32 2147483647, %v1028_v58  ;;  %v4620_v62 = vadd.f32 %v995_v60, %v309_v52  ;;  %v997_v63 = vpop.f32.mrb[3].mxu1  ;;  %vm1036_vm1 = vcmp.ge.f32.partialorder %v1028_v58, 0.0 }
 0x248   :  { %v1053_v0 = vand.u32 2147483647, %v1029_v59  ;;  %v5477_v1 = vadd.f32 %v997_v63, %v313_v54  ;;  %vm1037_vm2 = vcmp.ge.f32.partialorder %v1029_v59, 0.0  ;;  %v5505_v36 = vsel %vm1036_vm1, 1.0, %v4811_v25 }
 0x249   :  { %v1060_v2 = vmul.f32 0.3275911, %v1052_v61  ;;  %v1030_v6 = vmul.f32 0.70710677, %v4620_v62  ;;  %v1164_v13 = vsub.f32 0.0, %v1052_v61  ;;  %v5514_v44 = vsel %vm1037_vm2, 1.0, %v4811_v25 }
 0x24a   :  { %v1061_v4 = vmul.f32 0.3275911, %v1053_v0  ;;  %v5480_v8 = vmul.f32 0.70710677, %v5477_v1  ;;  %v1001_v10 = vpop.f32.mrb[4].mxu1  ;;  %v1165_v23 = vsub.f32 0.0, %v1053_v0 }
 0x24b   :  { %v1068_v7 = vadd.f32 1.0, %v1060_v2  ;;  %v1054_v3 = vand.u32 2147483647, %v1030_v6  ;;  %v1003_v12 = vpop.f32.mrb[5].mxu1  ;;  %v5483_v16 = vadd.f32 %v1001_v10, %v309_v52  ;;  %v1172_v24 = vmul.f32 %v1164_v13, %v1052_v61 }
 0x24c   :  { %v1069_v11 = vadd.f32 1.0, %v1061_v4  ;;  %v1055_v14 = vand.u32 2147483647, %v5480_v8  ;;  %v5485_v20 = vadd.f32 %v1003_v12, %v313_v54  ;;  %v1173_v31 = vmul.f32 %v1165_v23, %v1053_v0 }
 0x24d   :  { %4680 = vrcp.f32 %v1068_v7  ;;  %v1062_v5 = vmul.f32 0.3275911, %v1054_v3  ;;  %v5488_v22 = vmul.f32 0.70710677, %v5483_v16  ;;  %v1166_v32 = vsub.f32 0.0, %v1054_v3 }
 0x24e   :  { %4682 = vrcp.f32 %v1069_v11  ;;  %v1007_v9 = vpop.f32.mrb[6].mxu1  ;;  %v1063_v21 = vmul.f32 0.3275911, %v1055_v14  ;;  %v5491_v17 = vmul.f32 0.70710677, %v5485_v20  ;;  %vm1038_vm3 = vcmp.ge.f32.partialorder %v1030_v6, 0.0 }
 0x24f   :  { %v1009_v18 = vpop.f32.mrb[7].mxu1  ;;  %v1070_v19 = vadd.f32 1.0, %v1062_v5  ;;  %v1056_v27 = vand.u32 2147483647, %v5488_v22  ;;  %v5500_v34 = vadd.f32 %v1007_v9, %v309_v52  ;;  %v1180_v37 = vmul.f32 1.442695, %v1172_v24 }
 0x250   :  { %v1071_v26 = vadd.f32 1.0, %v1063_v21  ;;  %v5495_v29 = vand.u32 2147483647, %v5491_v17  ;;  %v1167_v41 = vsub.f32 0.0, %v1055_v14  ;;  %v5510_v43 = vadd.f32 %v1009_v18, %v313_v54 }
 0x251   :  { %4684 = vrcp.f32 %v1070_v19  ;;  %v1064_v28 = vmul.f32 0.3275911, %v1056_v27  ;;  %v5518_v47 = vmul.f32 0.70710677, %v5500_v34  ;;  %v1182_v48 = vmul.f32 1.442695, %v1173_v31 }
 0x252   :  { %4686 = vrcp.f32 %v1071_v26  ;;  %v1065_v33 = vmul.f32 0.3275911, %v5495_v29  ;;  %v1174_v52 = vmul.f32 %v1166_v32, %v1054_v3  ;;  %v5520_v55 = vmul.f32 0.5, %v4620_v62 }
 0x253   :  { %v1072_v38 = vadd.f32 1.0, %v1064_v28  ;;  %v5524_v54 = vsel %vm1038_vm3, 1.0, %v4811_v25  ;;  %v1058_v56 = vand.u32 2147483647, %v5518_v47  ;;  %v1175_v60 = vmul.f32 %v1167_v41, %v1055_v14 }
 0x254   :  { %v1073_v42 = vadd.f32 1.0, %v1065_v33  ;;  %v5531_v61 = vmul.f32 0.70710677, %v5510_v43  ;;  %v1168_v0 = vsub.f32 0.0, %v1056_v27  ;;  %v1184_v6 = vmul.f32 1.442695, %v1174_v52 }
 0x255   :  { %4688 = vrcp.f32 %v1072_v38  ;;  %v1066_v2 = vmul.f32 0.3275911, %v1058_v56  ;;  %v1169_v12 = vsub.f32 0.0, %v5495_v29  ;;  %v1186_v14 = vmul.f32 1.442695, %v1175_v60 }
 0x256   :  { %4690 = vrcp.f32 %v1073_v42  ;;  %v5536_v7 = vand.u32 2147483647, %v5531_v61  ;;  %v1176_v23 = vmul.f32 %v1168_v0, %v1056_v27  ;;  %v1170_v38 = vsub.f32 0.0, %v1058_v56 }
 0x257   :  { %v5502_v35 = vpop.eup %4680  ;;  %4692 = vpow2.f32 %v1180_v37  ;;  %v1074_v5 = vadd.f32 1.0, %v1066_v2  ;;  %v1177_v37 = vmul.f32 %v1169_v12, %v5495_v29  ;;  %vm1039_vm4 = vcmp.ge.f32.partialorder %v5480_v8, 0.0 }
 0x258   :  { %v5507_v39 = vpop.eup %4682  ;;  %v1092_v40 = vmul.f32 1.0614054, %v5502_v35  ;;  %4694 = vpow2.f32 %v1182_v48  ;;  %v1067_v18 = vmul.f32 0.3275911, %v5536_v7  ;;  %v1188_v48 = vmul.f32 1.442695, %v1176_v23 }
 0x259   :  { %v1093_v46 = vmul.f32 1.0614054, %v5507_v39  ;;  %4696 = vrcp.f32 %v1074_v5  ;;  %v1178_v2 = vmul.f32 %v1170_v38, %v1058_v56  ;;  %v1190_v12 = vmul.f32 1.442695, %v1177_v37 }
 0x25a   :  { %v1100_v49 = vadd.f32 -1.4531521, %v1092_v40  ;;  %4698 = vpow2.f32 %v1184_v6  ;;  %v1075_v28 = vadd.f32 1.0, %v1067_v18  ;;  %vm1040_vm5 = vcmp.ge.f32.partialorder %v5488_v22, 0.0 }
 0x25b   :  { %v1101_v53 = vadd.f32 -1.4531521, %v1093_v46  ;;  %v5527_v58 = vpop.eup %4684  ;;  %vm1041_vm6 = vcmp.ge.f32.partialorder %v5491_v17, 0.0  ;;  %vm1042_vm7 = vcmp.ge.f32.partialorder %v5518_v47, 0.0  ;;  %vm1043_vm8 = vcmp.ge.f32.partialorder %v5531_v61, 0.0 }
 0x25c   :  { %v1108_v59 = vmul.f32 %v5502_v35, %v1100_v49  ;;  %v1094_v62 = vmul.f32 1.0614054, %v5527_v58  ;;  %v5538_v10 = vpop.eup %4686  ;;  %4700 = vrcp.f32 %v1075_v28  ;;  %vm3038_vm1 = vcmask 64512  }
 0x25d   :  { %v1109_v63 = vmul.f32 %v5507_v39, %v1101_v53  ;;  %v1095_v13 = vmul.f32 1.0614054, %v5538_v10  ;;  %4702 = vpow2.f32 %v1186_v14  ;;  %v1171_v14 = vsub.f32 0.0, %v5536_v7 }
 0x25e   :  { %v1116_v4 = vadd.f32 1.4214138, %v1108_v59  ;;  %v1102_v3 = vadd.f32 -1.4531521, %v1094_v62  ;;  %4704 = vpow2.f32 %v1188_v48  ;;  %vm3368_vm2 = vcmask 254976  }
 0x25f   :  { %v1117_v11 = vadd.f32 1.4214138, %v1109_v63  ;;  %v1103_v26 = vadd.f32 -1.4531521, %v1095_v13  ;;  %v5546_v31 = vpop.eup %4688  ;;  %4706 = vpow2.f32 %v1190_v12 }
 0x260   :  { %v1124_v9 = vmul.f32 %v5502_v35, %v1116_v4  ;;  %v1110_v21 = vmul.f32 %v5527_v58, %v1102_v3  ;;  %v5549_v40 = vpop.eup %4690  ;;  %v1096_v27 = vmul.f32 1.0614054, %v5546_v31 }
 0x261   :  { %v1125_v19 = vmul.f32 %v5507_v39, %v1117_v11  ;;  %v1111_v42 = vmul.f32 %v5538_v10, %v1103_v26  ;;  %v1097_v52 = vmul.f32 1.0614054, %v5549_v40  ;;  %v4693_v53 = vpop.eup %4692  ;;  %v1192_v26 = vmul.f32 1.442695, %v1178_v2 }
 0x262   :  { %v1132_v24 = vadd.f32 -0.28449672, %v1124_v9  ;;  %v1118_v33 = vadd.f32 1.4214138, %v1110_v21  ;;  %v1104_v60 = vadd.f32 -1.4531521, %v1096_v27  ;;  %v4695_v4 = vpop.eup %4694  ;;  %v1179_v27 = vmul.f32 %v1171_v14, %v5536_v7 }
 0x263   :  { %v1133_v32 = vadd.f32 -0.28449672, %v1125_v19  ;;  %v1119_v29 = vadd.f32 1.4214138, %v1111_v42  ;;  %v1105_v0 = vadd.f32 -1.4531521, %v1097_v52  ;;  %4708 = vpow2.f32 %v1192_v26 }
 0x264   :  { %v1140_v41 = vmul.f32 %v5502_v35, %v1132_v24  ;;  %v1126_v49 = vmul.f32 %v5527_v58, %v1118_v33  ;;  %v1112_v3 = vmul.f32 %v5546_v31, %v1104_v60 }
 0x265   :  { %v1141_v46 = vmul.f32 %v5507_v39, %v1133_v32  ;;  %v1127_v11 = vmul.f32 %v5538_v10, %v1119_v29  ;;  %v1113_v13 = vmul.f32 %v5549_v40, %v1105_v0 }
 0x266   :  { %v1148_v59 = vadd.f32 0.2548296, %v1140_v41  ;;  %v1134_v62 = vadd.f32 -0.28449672, %v1126_v49  ;;  %v1120_v19 = vadd.f32 1.4214138, %v1112_v3 }
 0x267   :  { %v1149_v63 = vadd.f32 0.2548296, %v1141_v46  ;;  %v1135_v56 = vadd.f32 -0.28449672, %v1127_v11  ;;  %v1121_v24 = vadd.f32 1.4214138, %v1113_v13 }
 0x268   :  { %v1156_v6 = vmul.f32 %v5502_v35, %v1148_v59  ;;  %v1142_v9 = vmul.f32 %v5527_v58, %v1134_v62  ;;  %v5565_v35 = vpop.eup %4696  ;;  %v1128_v33 = vmul.f32 %v5546_v31, %v1120_v19 }
 0x269   :  { %v1157_v5 = vmul.f32 %v5507_v39, %v1149_v63  ;;  %v4699_v28 = vpop.eup %4698  ;;  %v1143_v32 = vmul.f32 %v5538_v10, %v1135_v56  ;;  %v1098_v37 = vmul.f32 1.0614054, %v5565_v35  ;;  %v1129_v42 = vmul.f32 %v5549_v40, %v1121_v24 }
 0x26a   :  { %v1196_v18 = vmul.f32 %v4693_v53, %v1156_v6  ;;  %v1150_v23 = vadd.f32 0.2548296, %v1142_v9  ;;  %v5573_v46 = vpop.eup %4700  ;;  %v1136_v48 = vadd.f32 -0.28449672, %v1128_v33  ;;  %v1194_v6 = vmul.f32 1.442695, %v1179_v27 }
 0x26b   :  { %v1197_v21 = vmul.f32 %v4695_v4, %v1157_v5  ;;  %v1151_v49 = vadd.f32 0.2548296, %v1143_v32  ;;  %v1106_v52 = vadd.f32 -1.4531521, %v1098_v37  ;;  %v1137_v29 = vadd.f32 -0.28449672, %v1129_v42  ;;  %v4703_v63 = vpop.eup %4702 }
 0x26c   :  { %v1204_v39 = vsub.f32 1.0, %v1196_v18  ;;  %v1158_v41 = vmul.f32 %v5527_v58, %v1150_v23  ;;  %v1099_v60 = vmul.f32 1.0614054, %v5573_v46  ;;  %v1144_v58 = vmul.f32 %v5546_v31, %v1136_v48  ;;  %v4705_v14 = vpop.eup %4704 }
 0x26d   :  { %v1205_v38 = vsub.f32 1.0, %v1197_v21  ;;  %v1159_v62 = vmul.f32 %v5538_v10, %v1151_v49  ;;  %v1114_v0 = vmul.f32 %v5565_v35, %v1106_v52  ;;  %v1145_v2 = vmul.f32 %v5549_v40, %v1137_v29  ;;  %v4707_v37 = vpop.eup %4706 }
 0x26e   :  { %v1212_v53 = vmul.f32 %v1204_v39, %v5505_v36  ;;  %v1198_v59 = vmul.f32 %v4699_v28, %v1158_v41  ;;  %v1107_v4 = vadd.f32 -1.4531521, %v1099_v60  ;;  %v1152_v3 = vadd.f32 0.2548296, %v1144_v58  ;;  %v4709_v48 = vpop.eup %4708 }
 0x26f   :  { %v1213_v11 = vmul.f32 %v1205_v38, %v5514_v44  ;;  %v1199_v36 = vmul.f32 %v4703_v63, %v1159_v62  ;;  %v1122_v12 = vadd.f32 1.4214138, %v1114_v0  ;;  %v1153_v13 = vadd.f32 0.2548296, %v1145_v2 }
 0x270   :  { %v1206_v7 = vsub.f32 1.0, %v1198_v59  ;;  %v1220_v5 = vadd.f32 1.0, %v1212_v53  ;;  %v1115_v10 = vmul.f32 %v5573_v46, %v1107_v4  ;;  %v1047_v18 = vsel %vm1039_vm4, 1.0, %v4811_v25 }
 0x271   :  { %v1207_v56 = vsub.f32 1.0, %v1199_v36  ;;  %v1160_v19 = vmul.f32 %v5546_v31, %v1152_v3  ;;  %v1130_v21 = vmul.f32 %v5565_v35, %v1122_v12  ;;  %v1161_v23 = vmul.f32 %v5549_v40, %v1153_v13 }
 0x272   :  { %v1214_v9 = vmul.f32 %v1206_v7, %v5524_v54  ;;  %v1123_v24 = vadd.f32 1.4214138, %v1115_v10  ;;  %4710 = vpow2.f32 %v1194_v6  ;;  %v1221_v26 = vadd.f32 1.0, %v1213_v11 }
 0x273   :  { %v1215_v54 = vmul.f32 %v1207_v56, %v1047_v18  ;;  %v1200_v28 = vmul.f32 %v4705_v14, %v1160_v19  ;;  %v1138_v39 = vadd.f32 -0.28449672, %v1130_v21  ;;  %v1228_v32 = vmul.f32 %v1220_v5, %v5497_v30  ;;  %v1324_v19 = vld [vmem:[#allocation2 + $0x8] sm:$0xff]  ;;  %v1326_v21 = vld [vmem:[#allocation2 + $0x18] sm:$0xff] }
 0x274   :  { %v1222_v44 = vadd.f32 1.0, %v1214_v9  ;;  %v1131_v8 = vmul.f32 %v5573_v46, %v1123_v24  ;;  %v1021_v31 = vmul.f32 0.5, %v5474_v57  ;;  %v1023_v38 = vmul.f32 0.5, %v5477_v1  ;;  %v1323_v24 = vld [vmem:[#allocation2] sm:$0xff] }
 0x275   :  { %v1223_v41 = vadd.f32 1.0, %v1215_v54  ;;  %v1146_v40 = vmul.f32 %v5565_v35, %v1138_v39  ;;  %v1201_v27 = vmul.f32 %v4707_v37, %v1161_v23  ;;  %v1048_v1 = vsel %vm1040_vm5, 1.0, %v4811_v25  ;;  %v1328_v54 = vld [vmem:[#allocation2 + $0x28] sm:$0xff]  ;;  %v1334_v37 = vld [vmem:[#allocation2 + $0x58] sm:$0xff] }
 0x276   :  { %v1230_v33 = vmul.f32 %v1222_v44, %v5520_v55  ;;  %v1139_v49 = vadd.f32 -0.28449672, %v1131_v8  ;;  %v1229_v30 = vmul.f32 %v1221_v26, %v1021_v31  ;;  %v1208_v55 = vsub.f32 1.0, %v1200_v28  ;;  %v1325_v26 = vld [vmem:[#allocation2 + $0x10] sm:$0xff]  ;;  %v1330_v28 = vld [vmem:[#allocation2 + $0x38] sm:$0xff]  ;;  %v1332_v8 = vld [vmem:[#allocation2 + $0x48] sm:$0xff] }
 0x277   :  { %v1231_v52 = vmul.f32 %v1223_v41, %v1023_v38  ;;  %v1154_v53 = vadd.f32 0.2548296, %v1146_v40  ;;  %v1209_v60 = vsub.f32 1.0, %v1201_v27  ;;  %v1049_v7 = vsel %vm1041_vm6, 1.0, %v4811_v25  ;;  %v1238_v31 = vld [vmem:[%s5907_s4 + $0x8] sm:$0xff]  ;;  %v1331_v40 = vld [vmem:[#allocation2 + $0x40] sm:$0xff] }
 0x278   :  { %v5596_v42 = vpack.c.bf16 %v1230_v33, %v1228_v32  ;;  %v1147_v59 = vmul.f32 %v5573_v46, %v1139_v49  ;;  %v1216_v22 = vmul.f32 %v1208_v55, %v1048_v1  ;;  %v1050_v4 = vsel %vm1042_vm7, 1.0, %v4811_v25  ;;  %v1327_v32 = vld [vmem:[#allocation2 + $0x20] sm:$0xff]  ;;  %v1329_v33 = vld [vmem:[#allocation2 + $0x30] sm:$0xff]  ;;  %v1336_v49 = vld [vmem:[#allocation2 + $0x68] sm:$0xff] }
 0x279   :  { %v5600_v29 = vpack.c.bf16 %v1231_v52, %v1229_v30  ;;  %v1162_v57 = vmul.f32 %v5565_v35, %v1154_v53  ;;  %v1217_v2 = vmul.f32 %v1209_v60, %v1049_v7  ;;  %v1024_v36 = vmul.f32 0.5, %v5483_v16  ;;  %v1333_v27 = vld [vmem:[#allocation2 + $0x50] sm:$0xff]  ;;  %v1335_v55 = vld [vmem:[#allocation2 + $0x60] sm:$0xff] }
 0x27a   :  { %v1155_v63 = vadd.f32 0.2548296, %v1147_v59  ;;  %v1224_v6 = vadd.f32 1.0, %v1216_v22  ;;  %v1026_v3 = vmul.f32 0.5, %v5500_v34  ;;  %v1025_v14 = vmul.f32 0.5, %v5485_v20  ;;  %v1237_v20 = vld [vmem:[%s5907_s4] sm:$0xff] }
 0x27b   :  { %v1202_v62 = vmul.f32 %v4709_v48, %v1162_v57  ;;  %4139 = vmatprep.subr.bf16.mxu0 %v5600_v29  ;;  %v1225_v5 = vadd.f32 1.0, %v1217_v2  ;;  %v1027_v18 = vmul.f32 0.5, %v5510_v43  ;;  %v4146_v34 = vpack.c.bf16 %v1326_v21, %v1324_v19  ;;  %v1338_v48 = vld [vmem:[#allocation2 + $0x78] sm:$0xff]  ;;  %v1337_v53 = vld [vmem:[#allocation2 + $0x70] sm:$0xff]  ;;  %v1340_v59 = vld [vmem:[#allocation2 + $0x88] sm:$0xff] }
 0x27c   :  { %v4711_v58 = vpop.eup %4710  ;;  %v1163_v0 = vmul.f32 %v5573_v46, %v1155_v63  ;;  %4141 = vmatpush1.bf16.msra.mxu0 %v5596_v42  ;;  %v1051_v46 = vsel %vm1043_vm8, 1.0, %v4811_v25  ;;  %v1232_v13 = vmul.f32 %v1224_v6, %v1024_v36  ;;  %v4148_v43 = vpack.c.bf16 %v1325_v26, %v1323_v24  ;;  %v1342_v57 = vld [vmem:[#allocation2 + $0x98] sm:$0xff]  ;;  %v1339_v63 = vld [vmem:[#allocation2 + $0x80] sm:$0xff]  ;;  %v1341_v22 = vld [vmem:[#allocation2 + $0x90] sm:$0xff] }
 0x27d   :  { %v1210_v35 = vsub.f32 1.0, %v1202_v62  ;;  %v1233_v44 = vmul.f32 %v1225_v5, %v1025_v14  ;;  %v4150_v39 = vpack.c.bf16 %v1330_v28, %v1328_v54  ;;  %v4152_v38 = vpack.c.bf16 %v1329_v33, %v1327_v32  ;;  %v1344_v62 = vld [vmem:[#allocation2 + $0xa8] sm:$0xff]  ;;  %v1345_v2 = vld [vmem:[#allocation2 + $0xb0] sm:$0xff]  ;;  %v1358_v14 = vld [vmem:[#allocation2 + $0x118] sm:$0xff] }
 0x27e   :  { %v1203_v17 = vmul.f32 %v4711_v58, %v1163_v0  ;;  %v4154_v41 = vpack.c.bf16 %v1334_v37, %v1332_v8  ;;  %v4156_v30 = vpack.c.bf16 %v1333_v27, %v1331_v40  ;;  %v4158_v52 = vpack.c.bf16 %v1338_v48, %v1336_v49  ;;  %v1346_v58 = vld [vmem:[#allocation2 + $0xb8] sm:$0xff]  ;;  %v1349_v36 = vld [vmem:[#allocation2 + $0xd0] sm:$0xff]  ;;  %v1355_v19 = vld [vmem:[#allocation2 + $0x100] sm:$0xff] }
 0x27f   :  { %v1218_v11 = vmul.f32 %v1210_v35, %v1050_v4  ;;  %v4160_v1 = vpack.c.bf16 %v1337_v53, %v1335_v55  ;;  %v4162_v60 = vpack.c.bf16 %v1342_v57, %v1340_v59  ;;  %v4164_v0 = vpack.c.bf16 %v1341_v22, %v1339_v63  ;;  %v1343_v35 = vld [vmem:[#allocation2 + $0xa0] sm:$0xff]  ;;  %v1348_v4 = vld [vmem:[#allocation2 + $0xc8] sm:$0xff]  ;;  %v1357_v21 = vld [vmem:[#allocation2 + $0x110] sm:$0xff] }
 0x280   :  { %v1211_v47 = vsub.f32 1.0, %v1203_v17  ;;  %v4166_v7 = vpack.c.bf16 %v1346_v58, %v1344_v62  ;;  %v1350_v17 = vld [vmem:[#allocation2 + $0xd8] sm:$0xff]  ;;  %v4168_v6 = vpack.c.bf16 %v1345_v2, %v1343_v35  ;;  %v1359_v26 = vld [vmem:[#allocation2 + $0x120] sm:$0xff]  ;;  %v1361_v54 = vld [vmem:[#allocation2 + $0x130] sm:$0xff] }
 0x281   :  { %v1226_v12 = vadd.f32 1.0, %v1218_v11  ;;  %v4170_v11 = vpack.c.bf16 %v1350_v17, %v1348_v4  ;;  %v1364_v28 = vld [vmem:[#allocation2 + $0x148] sm:$0xff]  ;;  %v1363_v32 = vld [vmem:[#allocation2 + $0x140] sm:$0xff]  ;;  %v1365_v33 = vld [vmem:[#allocation2 + $0x150] sm:$0xff] }
 0x282   :  { %v1219_v9 = vmul.f32 %v1211_v47, %v1051_v46  ;;  %v1347_v47 = vld [vmem:[#allocation2 + $0xc0] sm:$0xff]  ;;  %v1368_v8 = vld [vmem:[#allocation2 + $0x168] sm:$0xff]  ;;  %v1370_v37 = vld [vmem:[#allocation2 + $0x178] sm:$0xff] }
 0x283   :  { %v1234_v10 = vmul.f32 %v1226_v12, %v1026_v3  ;;  %v1352_v3 = vld [vmem:[#allocation2 + $0xe8] sm:$0xff]  ;;  %v1354_v12 = vld [vmem:[#allocation2 + $0xf8] sm:$0xff]  ;;  %v4172_v46 = vpack.c.bf16 %v1349_v36, %v1347_v47  ;;  %v1369_v40 = vld [vmem:[#allocation2 + $0x170] sm:$0xff] }
 0x284   :  { %v1227_v61 = vadd.f32 1.0, %v1219_v9  ;;  %v4174_v5 = vpack.c.bf16 %v1354_v12, %v1352_v3  ;;  %v1351_v9 = vld [vmem:[#allocation2 + $0xe0] sm:$0xff]  ;;  %v1372_v27 = vld [vmem:[#allocation2 + $0x188] sm:$0xff]  ;;  %v1374_v49 = vld [vmem:[#allocation2 + $0x198] sm:$0xff] }
 0x285   :  { %v5617_v56 = vpack.c.bf16 %v1234_v10, %v1232_v13  ;;  %v1353_v13 = vld [vmem:[#allocation2 + $0xf0] sm:$0xff]  ;;  %v1356_v10 = vld [vmem:[#allocation2 + $0x108] sm:$0xff]  ;;  %v1378_v59 = vld [vmem:[#allocation2 + $0x1b8] sm:$0xff] }
 0x286   :  { %v1235_v16 = vmul.f32 %v1227_v61, %v1027_v18  ;;  %v4176_v18 = vpack.c.bf16 %v1353_v13, %v1351_v9  ;;  %v4178_v61 = vpack.c.bf16 %v1358_v14, %v1356_v10  ;;  %v1373_v55 = vld [vmem:[#allocation2 + $0x190] sm:$0xff]  ;;  %v1376_v53 = vld [vmem:[#allocation2 + $0x1a8] sm:$0xff]  ;;  %v1382_v62 = vld [vmem:[#allocation2 + $0x1d8] sm:$0xff] }
 0x287   :  { %v1377_v63 = vld [vmem:[#allocation2 + $0x1b0] sm:$0xff]  ;;  %v1380_v22 = vld [vmem:[#allocation2 + $0x1c8] sm:$0xff]  ;;  %v1386_v4 = vld [vmem:[#allocation2 + $0x1f8] sm:$0xff] }
 0x288   :  { %v5619_v23 = vpack.c.bf16 %v1235_v16, %v1233_v44  ;;  %v1360_v44 = vld [vmem:[#allocation2 + $0x128] sm:$0xff]  ;;  %v1362_v16 = vld [vmem:[#allocation2 + $0x138] sm:$0xff]  ;;  %v1381_v35 = vld [vmem:[#allocation2 + $0x1d0] sm:$0xff] }
 0x289   :  { %v4182_v24 = vpack.c.bf16 %v1362_v16, %v1360_v44  ;;  %v1384_v2 = vld [vmem:[#allocation2 + $0x1e8] sm:$0xff]  ;;  %v1385_v47 = vld [vmem:[#allocation2 + $0x1f0] sm:$0xff]  ;;  %v1566_v14 = vld [vmem:[#allocation2 + $0x200] sm:$0xff] }
 0x28a   :  { %4143 = vmatprep.subr.bf16.mxu0 %v5619_v23 }
 0x28b   :  { %4145 = vmatpush1.bf16.msra.mxu0 %v5617_v56 }
 0x28c   :  { %4147 = vmatprep.subr.bf16.mxu0 %v4146_v34  ;;  %v4180_v34 = vpack.c.bf16 %v1357_v21, %v1355_v19  ;;  %v1573_v19 = vld [vmem:[#allocation2 + $0x238] sm:$0xff]  ;;  %v3512_v21 = vld [vmem:[%s5907_s4 + $0x10] sm:$0xff] }
 0x28e   :  { %3510 = vmatmul.mubr.msk.f32.vlgmr.msra.gmra.mrb[16].mxu0 %vm1239_vm9, %v1237_v20  ;;  %v1366_v20 = vld [vmem:[#allocation2 + $0x158] sm:$0xff] }
 0x28f   :  { %4149 = vmatpush1.bf16.msra.mxu0 %v4148_v43  ;;  %1316 = vmatprep.mubr.f32.mxu0 %v4810_v15  ;;  %v4184_v43 = vpack.c.bf16 %v1361_v54, %v1359_v26  ;;  %v1575_v26 = vld [vmem:[#allocation2 + $0x248] sm:$0xff]  ;;  %v1577_v54 = vld [vmem:[#allocation2 + $0x258] sm:$0xff] }
 0x290   :  { %4151 = vmatprep.subr.bf16.mxu0 %v4150_v39  ;;  %v4186_v39 = vpack.c.bf16 %v1366_v20, %v1364_v28  ;;  %v3513_v28 = vld [vmem:[%s5907_s4 + $0x18] sm:$0xff] }
 0x292   :  { %3511 = vmatmul.mubr.msk.f32.gmra.mrb[18].mxu0 %vm1239_vm9, %v1238_v31  ;;  %v4188_v31 = vpack.c.bf16 %v1365_v33, %v1363_v32  ;;  %v1576_v32 = vld [vmem:[#allocation2 + $0x250] sm:$0xff]  ;;  %v1579_v33 = vld [vmem:[#allocation2 + $0x268] sm:$0xff] }
 0x293   :  { %4153 = vmatpush1.bf16.msra.mxu0 %v4152_v38  ;;  %v4190_v38 = vpack.c.bf16 %v1370_v37, %v1368_v8  ;;  %v1581_v8 = vld [vmem:[#allocation2 + $0x278] sm:$0xff] }
 0x294   :  { %4155 = vmatprep.subr.bf16.mxu0 %v4154_v41  ;;  %v1367_v41 = vld [vmem:[#allocation2 + $0x160] sm:$0xff] }
 0x295   :  { %v4192_v48 = vpack.c.bf16 %v1369_v40, %v1367_v41  ;;  %v1580_v41 = vld [vmem:[#allocation2 + $0x270] sm:$0xff]  ;;  %v1583_v40 = vld [vmem:[#allocation2 + $0x288] sm:$0xff] }
 0x297   :  { %4157 = vmatpush1.bf16.msra.mxu0 %v4156_v30  ;;  %v4194_v30 = vpack.c.bf16 %v1374_v49, %v1372_v27  ;;  %v1585_v27 = vld [vmem:[#allocation2 + $0x298] sm:$0xff] }
 0x298   :  { %4159 = vmatprep.subr.bf16.mxu0 %v4158_v52  ;;  %v1371_v52 = vld [vmem:[#allocation2 + $0x180] sm:$0xff] }
 0x299   :  { %v4196_v57 = vpack.c.bf16 %v1373_v55, %v1371_v52  ;;  %v1584_v52 = vld [vmem:[#allocation2 + $0x290] sm:$0xff]  ;;  %v1587_v55 = vld [vmem:[#allocation2 + $0x2a8] sm:$0xff] }
 0x29b   :  { %4161 = vmatpush1.bf16.msra.mxu0 %v4160_v1  ;;  %v4198_v1 = vpack.c.bf16 %v1378_v59, %v1376_v53  ;;  %v1589_v53 = vld [vmem:[#allocation2 + $0x2b8] sm:$0xff] }
 0x29c   :  { %4163 = vmatprep.subr.bf16.mxu0 %v4162_v60  ;;  %v1375_v60 = vld [vmem:[#allocation2 + $0x1a0] sm:$0xff] }
 0x29d   :  { %v4200_v58 = vpack.c.bf16 %v1377_v63, %v1375_v60  ;;  %v1588_v60 = vld [vmem:[#allocation2 + $0x2b0] sm:$0xff]  ;;  %v1591_v63 = vld [vmem:[#allocation2 + $0x2c8] sm:$0xff] }
 0x29f   :  { %4165 = vmatpush1.bf16.msra.mxu0 %v4164_v0  ;;  %v4202_v0 = vpack.c.bf16 %v1382_v62, %v1380_v22  ;;  %v1593_v22 = vld [vmem:[#allocation2 + $0x2d8] sm:$0xff] }
 0x2a0   :  { %4167 = vmatprep.subr.bf16.mxu0 %v4166_v7  ;;  %v1379_v7 = vld [vmem:[#allocation2 + $0x1c0] sm:$0xff] }
 0x2a1   :  { %v4204_v17 = vpack.c.bf16 %v1381_v35, %v1379_v7  ;;  %v1592_v7 = vld [vmem:[#allocation2 + $0x2d0] sm:$0xff]  ;;  %v1595_v35 = vld [vmem:[#allocation2 + $0x2e8] sm:$0xff] }
 0x2a3   :  { %4169 = vmatpush1.bf16.msra.mxu0 %v4168_v6  ;;  %v4206_v6 = vpack.c.bf16 %v1386_v4, %v1384_v2  ;;  %v1597_v2 = vld [vmem:[#allocation2 + $0x2f8] sm:$0xff] }
 0x2a4   :  { %4171 = vmatprep.subr.bf16.mxu0 %v4170_v11  ;;  %v1383_v11 = vld [vmem:[#allocation2 + $0x1e0] sm:$0xff] }
 0x2a5   :  { %v4208_v36 = vpack.c.bf16 %v1385_v47, %v1383_v11  ;;  %v1596_v11 = vld [vmem:[#allocation2 + $0x2f0] sm:$0xff]  ;;  %v1599_v47 = vld [vmem:[#allocation2 + $0x308] sm:$0xff] }
 0x2a7   :  { %4173 = vmatpush1.bf16.msra.mxu0 %v4172_v46  ;;  %v1567_v46 = vld [vmem:[#allocation2 + $0x208] sm:$0xff] }
 0x2a8   :  { %4175 = vmatprep.subr.bf16.mxu0 %v4174_v5  ;;  %v1569_v5 = vld [vmem:[#allocation2 + $0x218] sm:$0xff] }
 0x2a9   :  { %v4218_v10 = vpack.c.bf16 %v1569_v5, %v1567_v46  ;;  %v1598_v46 = vld [vmem:[#allocation2 + $0x300] sm:$0xff]  ;;  %v1600_v5 = vld [vmem:[#allocation2 + $0x310] sm:$0xff] }
 0x2ab   :  { %4177 = vmatpush1.bf16.msra.mxu0 %v4176_v18  ;;  %v1568_v18 = vld [vmem:[#allocation2 + $0x210] sm:$0xff] }
 0x2ac   :  { %4179 = vmatprep.subr.bf16.mxu0 %v4178_v61  ;;  %v1571_v61 = vld [vmem:[#allocation2 + $0x228] sm:$0xff]  ;;  %v4220_v44 = vpack.c.bf16 %v1568_v18, %v1566_v14  ;;  %v1602_v18 = vld [vmem:[#allocation2 + $0x320] sm:$0xff] }
 0x2ad   :  { %v4222_v16 = vpack.c.bf16 %v1573_v19, %v1571_v61  ;;  %v1604_v61 = vld [vmem:[#allocation2 + $0x330] sm:$0xff]  ;;  %v1607_v19 = vld [vmem:[#allocation2 + $0x348] sm:$0xff] }
 0x2af   :  { %4181 = vmatpush1.bf16.msra.mxu0 %v4180_v34  ;;  %v1570_v34 = vld [vmem:[#allocation2 + $0x220] sm:$0xff] }
 0x2b0   :  { %4183 = vmatprep.subr.bf16.mxu0 %v4182_v24  ;;  %v1572_v24 = vld [vmem:[#allocation2 + $0x230] sm:$0xff] }
 0x2b1   :  { %v4224_v20 = vpack.c.bf16 %v1572_v24, %v1570_v34  ;;  %v1606_v34 = vld [vmem:[#allocation2 + $0x340] sm:$0xff]  ;;  %v1608_v24 = vld [vmem:[#allocation2 + $0x350] sm:$0xff] }
 0x2b3   :  { %4185 = vmatpush1.bf16.msra.mxu0 %v4184_v43  ;;  %v4226_v43 = vpack.c.bf16 %v1577_v54, %v1575_v26  ;;  %v1611_v26 = vld [vmem:[#allocation2 + $0x368] sm:$0xff]  ;;  %v1613_v54 = vld [vmem:[#allocation2 + $0x378] sm:$0xff] }
 0x2b4   :  { %4187 = vmatprep.subr.bf16.mxu0 %v4186_v39  ;;  %v1574_v39 = vld [vmem:[#allocation2 + $0x240] sm:$0xff] }
 0x2b5   :  { %v4228_v37 = vpack.c.bf16 %v1576_v32, %v1574_v39  ;;  %v1612_v39 = vld [vmem:[#allocation2 + $0x370] sm:$0xff]  ;;  %v1615_v32 = vld [vmem:[#allocation2 + $0x388] sm:$0xff] }
 0x2b7   :  { %4189 = vmatpush1.bf16.msra.mxu0 %v4188_v31  ;;  %v4230_v31 = vpack.c.bf16 %v1581_v8, %v1579_v33  ;;  %v1617_v33 = vld [vmem:[#allocation2 + $0x398] sm:$0xff] }
 0x2b8   :  { %4191 = vmatprep.subr.bf16.mxu0 %v4190_v38  ;;  %v1578_v38 = vld [vmem:[#allocation2 + $0x260] sm:$0xff] }
 0x2b9   :  { %v4232_v49 = vpack.c.bf16 %v1580_v41, %v1578_v38  ;;  %v1616_v38 = vld [vmem:[#allocation2 + $0x390] sm:$0xff]  ;;  %v1619_v41 = vld [vmem:[#allocation2 + $0x3a8] sm:$0xff] }
 0x2bb   :  { %4193 = vmatpush1.bf16.msra.mxu0 %v4192_v48  ;;  %v4234_v48 = vpack.c.bf16 %v1585_v27, %v1583_v40  ;;  %v1621_v40 = vld [vmem:[#allocation2 + $0x3b8] sm:$0xff] }
 0x2bc   :  { %4195 = vmatprep.subr.bf16.mxu0 %v4194_v30  ;;  %v1582_v30 = vld [vmem:[#allocation2 + $0x280] sm:$0xff] }
 0x2bd   :  { %v4236_v59 = vpack.c.bf16 %v1584_v52, %v1582_v30  ;;  %v1620_v30 = vld [vmem:[#allocation2 + $0x3b0] sm:$0xff]  ;;  %v1623_v52 = vld [vmem:[#allocation2 + $0x3c8] sm:$0xff] }
 0x2bf   :  { %4197 = vmatpush1.bf16.msra.mxu0 %v4196_v57  ;;  %v4238_v57 = vpack.c.bf16 %v1589_v53, %v1587_v55  ;;  %v1625_v55 = vld [vmem:[#allocation2 + $0x3d8] sm:$0xff] }
 0x2c0   :  { %4199 = vmatprep.subr.bf16.mxu0 %v4198_v1  ;;  %v1586_v1 = vld [vmem:[#allocation2 + $0x2a0] sm:$0xff] }
 0x2c1   :  { %v4240_v62 = vpack.c.bf16 %v1588_v60, %v1586_v1  ;;  %v1624_v1 = vld [vmem:[#allocation2 + $0x3d0] sm:$0xff]  ;;  %v1627_v60 = vld [vmem:[#allocation2 + $0x3e8] sm:$0xff] }
 0x2c3   :  { %4201 = vmatpush1.bf16.msra.mxu0 %v4200_v58  ;;  %v4242_v58 = vpack.c.bf16 %v1593_v22, %v1591_v63  ;;  %v1629_v63 = vld [vmem:[#allocation2 + $0x3f8] sm:$0xff] }
 0x2c4   :  { %4203 = vmatprep.subr.bf16.mxu0 %v4202_v0  ;;  %v1590_v0 = vld [vmem:[#allocation2 + $0x2c0] sm:$0xff] }
 0x2c5   :  { %v4244_v4 = vpack.c.bf16 %v1592_v7, %v1590_v0  ;;  %v1628_v0 = vld [vmem:[#allocation2 + $0x3f0] sm:$0xff] }
 0x2c7   :  { %4205 = vmatpush1.bf16.msra.mxu0 %v4204_v17  ;;  %v4246_v17 = vpack.c.bf16 %v1597_v2, %v1595_v35 }
 0x2c8   :  { %4207 = vmatprep.subr.bf16.mxu0 %v4206_v6  ;;  %v1594_v6 = vld [vmem:[#allocation2 + $0x2e0] sm:$0xff] }
 0x2cb   :  { %4209 = vmatpush1.bf16.msra.mxu0 %v4208_v36  ;;  %v1601_v36 = vld [vmem:[#allocation2 + $0x318] sm:$0xff] }
 0x2cc   :  { %4211 = vmatprep.subr.bf16.mxu0 %v5600_v29 }
 0x361   :  { %v1312_v3 = vpop.f32.mrb[16].mxu0 }
 0x362   :  { %v1314_v12 = vpop.f32.mrb[17].mxu0 }
 0x363   :  { %1451 = vmatprep.mubr.f32.mxu0 %v1314_v12  ;;  %v4250_v12 = vpack.c.bf16 %v1601_v36, %v1599_v47  ;;  %v1798_v36 = vld [vmem:[#allocation2 + $0x400] sm:$0xff] }
 0x364   :  { %1452 = vmatmul.mubr.f32.vlgmr.msra.gmra.mrb[20].mxu0 %v1312_v3  ;;  %v4248_v3 = vpack.c.bf16 %v1596_v11, %v1594_v6 }
 0x365   :  { %4213 = vmatpush1.bf16.msra.mxu0 %v5596_v42  ;;  %v1318_v9 = vpop.f32.mrb[18].mxu0 }
 0x366   :  { %4215 = vmatprep.subr.bf16.mxu0 %v5619_v23  ;;  %v1320_v13 = vpop.f32.mrb[19].mxu0 }
 0x367   :  { %1457 = vmatprep.mubr.f32.mxu0 %v1320_v13  ;;  %v1605_v13 = vld [vmem:[#allocation2 + $0x338] sm:$0xff] }
 0x368   :  { %1458 = vmatmul.mubr.f32.gmra.mrb[22].mxu0 %v1318_v9  ;;  %v1603_v9 = vld [vmem:[#allocation2 + $0x328] sm:$0xff] }
 0x369   :  { %4217 = vmatpush1.bf16.msra.mxu0 %v5617_v56  ;;  %1552 = vmatprep.mubr.f32.mxu0 %v4810_v15  ;;  %v4254_v14 = vpack.c.bf16 %v1605_v13, %v1603_v9 }
 0x36a   :  { %4219 = vmatprep.subr.bf16.mxu0 %v4218_v10  ;;  %v4252_v10 = vpack.c.bf16 %v1600_v5, %v1598_v46  ;;  %v1805_v46 = vld [vmem:[#allocation2 + $0x438] sm:$0xff]  ;;  %v3516_v5 = vld [vmem:[%s5907_s4 + $0x20] sm:$0xff] }
 0x36c   :  { %3514 = vmatmul.mubr.msk.f32.vlgmr.msra.gmra.mrb[24].mxu0 %vm1239_vm9, %v3512_v21  ;;  %v1609_v21 = vld [vmem:[#allocation2 + $0x358] sm:$0xff] }
 0x36d   :  { %4221 = vmatpush1.bf16.msra.mxu0 %v4220_v44  ;;  %1558 = vmatprep.mubr.f32.mxu0 %v4810_v15  ;;  %v4256_v44 = vpack.c.bf16 %v1604_v61, %v1602_v18  ;;  %v1807_v18 = vld [vmem:[#allocation2 + $0x448] sm:$0xff]  ;;  %v1809_v61 = vld [vmem:[#allocation2 + $0x458] sm:$0xff] }
 0x36e   :  { %4223 = vmatprep.subr.bf16.mxu0 %v4222_v16  ;;  %v4258_v16 = vpack.c.bf16 %v1609_v21, %v1607_v19  ;;  %v3517_v19 = vld [vmem:[%s5907_s4 + $0x28] sm:$0xff] }
 0x370   :  { %3515 = vmatmul.mubr.msk.f32.gmra.mrb[26].mxu0 %vm1239_vm9, %v3513_v28  ;;  %v4260_v28 = vpack.c.bf16 %v1608_v24, %v1606_v34  ;;  %v1808_v34 = vld [vmem:[#allocation2 + $0x450] sm:$0xff]  ;;  %v1811_v24 = vld [vmem:[#allocation2 + $0x468] sm:$0xff] }
 0x371   :  { %4225 = vmatpush1.bf16.msra.mxu0 %v4224_v20  ;;  %v4262_v20 = vpack.c.bf16 %v1613_v54, %v1611_v26  ;;  %v1813_v26 = vld [vmem:[#allocation2 + $0x478] sm:$0xff] }
 0x372   :  { %4227 = vmatprep.subr.bf16.mxu0 %v4226_v43  ;;  %v1610_v43 = vld [vmem:[#allocation2 + $0x360] sm:$0xff] }
 0x373   :  { %v4264_v8 = vpack.c.bf16 %v1612_v39, %v1610_v43  ;;  %v1812_v43 = vld [vmem:[#allocation2 + $0x470] sm:$0xff]  ;;  %v1815_v39 = vld [vmem:[#allocation2 + $0x488] sm:$0xff] }
 0x375   :  { %4229 = vmatpush1.bf16.msra.mxu0 %v4228_v37  ;;  %v4266_v37 = vpack.c.bf16 %v1617_v33, %v1615_v32  ;;  %v1817_v32 = vld [vmem:[#allocation2 + $0x498] sm:$0xff] }
 0x376   :  { %4231 = vmatprep.subr.bf16.mxu0 %v4230_v31  ;;  %v1614_v31 = vld [vmem:[#allocation2 + $0x380] sm:$0xff] }
 0x377   :  { %v4268_v27 = vpack.c.bf16 %v1616_v38, %v1614_v31  ;;  %v1816_v31 = vld [vmem:[#allocation2 + $0x490] sm:$0xff]  ;;  %v1819_v38 = vld [vmem:[#allocation2 + $0x4a8] sm:$0xff] }
 0x379   :  { %4233 = vmatpush1.bf16.msra.mxu0 %v4232_v49  ;;  %v4270_v49 = vpack.c.bf16 %v1621_v40, %v1619_v41  ;;  %v1821_v41 = vld [vmem:[#allocation2 + $0x4b8] sm:$0xff] }
 0x37a   :  { %4235 = vmatprep.subr.bf16.mxu0 %v4234_v48  ;;  %v1618_v48 = vld [vmem:[#allocation2 + $0x3a0] sm:$0xff] }
 0x37b   :  { %v4272_v53 = vpack.c.bf16 %v1620_v30, %v1618_v48  ;;  %v1820_v48 = vld [vmem:[#allocation2 + $0x4b0] sm:$0xff]  ;;  %v1823_v30 = vld [vmem:[#allocation2 + $0x4c8] sm:$0xff] }
 0x37d   :  { %4237 = vmatpush1.bf16.msra.mxu0 %v4236_v59  ;;  %v4274_v59 = vpack.c.bf16 %v1625_v55, %v1623_v52  ;;  %v1825_v52 = vld [vmem:[#allocation2 + $0x4d8] sm:$0xff] }
 0x37e   :  { %4239 = vmatprep.subr.bf16.mxu0 %v4238_v57  ;;  %v1622_v57 = vld [vmem:[#allocation2 + $0x3c0] sm:$0xff] }
 0x37f   :  { %v4276_v22 = vpack.c.bf16 %v1624_v1, %v1622_v57  ;;  %v1824_v57 = vld [vmem:[#allocation2 + $0x4d0] sm:$0xff]  ;;  %v1827_v1 = vld [vmem:[#allocation2 + $0x4e8] sm:$0xff] }
 0x381   :  { %4241 = vmatpush1.bf16.msra.mxu0 %v4240_v62  ;;  %v4278_v62 = vpack.c.bf16 %v1629_v63, %v1627_v60  ;;  %v1829_v60 = vld [vmem:[#allocation2 + $0x4f8] sm:$0xff] }
 0x382   :  { %4243 = vmatprep.subr.bf16.mxu0 %v4242_v58  ;;  %v1626_v58 = vld [vmem:[#allocation2 + $0x3e0] sm:$0xff] }
 0x383   :  { %v4280_v7 = vpack.c.bf16 %v1628_v0, %v1626_v58  ;;  %v1828_v58 = vld [vmem:[#allocation2 + $0x4f0] sm:$0xff]  ;;  %v1831_v0 = vld [vmem:[#allocation2 + $0x508] sm:$0xff] }
 0x385   :  { %4245 = vmatpush1.bf16.msra.mxu0 %v4244_v4  ;;  %v1799_v4 = vld [vmem:[#allocation2 + $0x408] sm:$0xff] }
 0x386   :  { %4247 = vmatprep.subr.bf16.mxu0 %v4246_v17  ;;  %v1801_v17 = vld [vmem:[#allocation2 + $0x418] sm:$0xff] }
 0x387   :  { %v4290_v47 = vpack.c.bf16 %v1801_v17, %v1799_v4  ;;  %v1830_v4 = vld [vmem:[#allocation2 + $0x500] sm:$0xff]  ;;  %v1832_v17 = vld [vmem:[#allocation2 + $0x510] sm:$0xff] }
 0x389   :  { %4249 = vmatpush1.bf16.msra.mxu0 %v4248_v3  ;;  %v1800_v3 = vld [vmem:[#allocation2 + $0x410] sm:$0xff] }
 0x38a   :  { %4251 = vmatprep.subr.bf16.mxu0 %v4250_v12  ;;  %v1803_v12 = vld [vmem:[#allocation2 + $0x428] sm:$0xff]  ;;  %v4292_v9 = vpack.c.bf16 %v1800_v3, %v1798_v36  ;;  %v1834_v3 = vld [vmem:[#allocation2 + $0x520] sm:$0xff] }
 0x38b   :  { %v4294_v13 = vpack.c.bf16 %v1805_v46, %v1803_v12  ;;  %v1836_v12 = vld [vmem:[#allocation2 + $0x530] sm:$0xff]  ;;  %v1839_v46 = vld [vmem:[#allocation2 + $0x548] sm:$0xff] }
 0x38d   :  { %4253 = vmatpush1.bf16.msra.mxu0 %v4252_v10  ;;  %v1802_v10 = vld [vmem:[#allocation2 + $0x420] sm:$0xff] }
 0x38e   :  { %4255 = vmatprep.subr.bf16.mxu0 %v4254_v14  ;;  %v1804_v14 = vld [vmem:[#allocation2 + $0x430] sm:$0xff] }
 0x38f   :  { %v4296_v21 = vpack.c.bf16 %v1804_v14, %v1802_v10  ;;  %v1838_v10 = vld [vmem:[#allocation2 + $0x540] sm:$0xff]  ;;  %v1840_v14 = vld [vmem:[#allocation2 + $0x550] sm:$0xff] }
 0x391   :  { %4257 = vmatpush1.bf16.msra.mxu0 %v4256_v44  ;;  %v4298_v44 = vpack.c.bf16 %v1809_v61, %v1807_v18  ;;  %v1843_v18 = vld [vmem:[#allocation2 + $0x568] sm:$0xff]  ;;  %v1845_v61 = vld [vmem:[#allocation2 + $0x578] sm:$0xff] }
 0x392   :  { %4259 = vmatprep.subr.bf16.mxu0 %v4258_v16  ;;  %v1806_v16 = vld [vmem:[#allocation2 + $0x440] sm:$0xff] }
 0x393   :  { %v4300_v54 = vpack.c.bf16 %v1808_v34, %v1806_v16  ;;  %v1844_v16 = vld [vmem:[#allocation2 + $0x570] sm:$0xff]  ;;  %v1847_v34 = vld [vmem:[#allocation2 + $0x588] sm:$0xff] }
 0x395   :  { %4261 = vmatpush1.bf16.msra.mxu0 %v4260_v28  ;;  %v4302_v28 = vpack.c.bf16 %v1813_v26, %v1811_v24  ;;  %v1849_v24 = vld [vmem:[#allocation2 + $0x598] sm:$0xff] }
 0x396   :  { %4263 = vmatprep.subr.bf16.mxu0 %v4262_v20  ;;  %v1810_v20 = vld [vmem:[#allocation2 + $0x460] sm:$0xff] }
 0x397   :  { %v4304_v33 = vpack.c.bf16 %v1812_v43, %v1810_v20  ;;  %v1848_v20 = vld [vmem:[#allocation2 + $0x590] sm:$0xff]  ;;  %v1851_v43 = vld [vmem:[#allocation2 + $0x5a8] sm:$0xff] }
 0x399   :  { %4265 = vmatpush1.bf16.msra.mxu0 %v4264_v8  ;;  %v4306_v8 = vpack.c.bf16 %v1817_v32, %v1815_v39  ;;  %v1853_v39 = vld [vmem:[#allocation2 + $0x5b8] sm:$0xff] }
 0x39a   :  { %4267 = vmatprep.subr.bf16.mxu0 %v4266_v37  ;;  %v1814_v37 = vld [vmem:[#allocation2 + $0x480] sm:$0xff] }
 0x39b   :  { %v4308_v40 = vpack.c.bf16 %v1816_v31, %v1814_v37  ;;  %v1852_v37 = vld [vmem:[#allocation2 + $0x5b0] sm:$0xff]  ;;  %v1855_v31 = vld [vmem:[#allocation2 + $0x5c8] sm:$0xff] }
 0x39d   :  { %4269 = vmatpush1.bf16.msra.mxu0 %v4268_v27  ;;  %v4310_v27 = vpack.c.bf16 %v1821_v41, %v1819_v38  ;;  %v1857_v38 = vld [vmem:[#allocation2 + $0x5d8] sm:$0xff] }
 0x39e   :  { %4271 = vmatprep.subr.bf16.mxu0 %v4270_v49  ;;  %v1818_v49 = vld [vmem:[#allocation2 + $0x4a0] sm:$0xff] }
 0x39f   :  { %v4312_v55 = vpack.c.bf16 %v1820_v48, %v1818_v49  ;;  %v1856_v49 = vld [vmem:[#allocation2 + $0x5d0] sm:$0xff]  ;;  %v1859_v48 = vld [vmem:[#allocation2 + $0x5e8] sm:$0xff] }
 0x3a1   :  { %4273 = vmatpush1.bf16.msra.mxu0 %v4272_v53  ;;  %v4314_v53 = vpack.c.bf16 %v1825_v52, %v1823_v30  ;;  %v1861_v30 = vld [vmem:[#allocation2 + $0x5f8] sm:$0xff] }
 0x3a2   :  { %4275 = vmatprep.subr.bf16.mxu0 %v4274_v59  ;;  %v1822_v59 = vld [vmem:[#allocation2 + $0x4c0] sm:$0xff] }
 0x3a3   :  { %v4316_v63 = vpack.c.bf16 %v1824_v57, %v1822_v59  ;;  %v1860_v59 = vld [vmem:[#allocation2 + $0x5f0] sm:$0xff] }
 0x3a5   :  { %4277 = vmatpush1.bf16.msra.mxu0 %v4276_v22  ;;  %v4318_v22 = vpack.c.bf16 %v1829_v60, %v1827_v1 }
 0x3a6   :  { %4279 = vmatprep.subr.bf16.mxu0 %v4278_v62  ;;  %v1826_v62 = vld [vmem:[#allocation2 + $0x4e0] sm:$0xff] }
 0x3a9   :  { %4281 = vmatpush1.bf16.msra.mxu0 %v4280_v7  ;;  %v1833_v7 = vld [vmem:[#allocation2 + $0x518] sm:$0xff] }
 0x3aa   :  { %4283 = vmatprep.subr.bf16.mxu0 %v5600_v29 }
 0x43f   :  { %v1554_v35 = vpop.f32.mrb[24].mxu0 }
 0x440   :  { %v1556_v2 = vpop.f32.mrb[25].mxu0 }
 0x441   :  { %1694 = vmatprep.mubr.f32.mxu0 %v1556_v2  ;;  %v4322_v2 = vpack.c.bf16 %v1833_v7, %v1831_v0  ;;  %v2030_v7 = vld [vmem:[#allocation2 + $0x600] sm:$0xff] }
 0x442   :  { %1695 = vmatmul.mubr.f32.vlgmr.msra.gmra.mrb[20].mxu0 %v1554_v35  ;;  %v4320_v35 = vpack.c.bf16 %v1828_v58, %v1826_v62 }
 0x443   :  { %4285 = vmatpush1.bf16.msra.mxu0 %v5596_v42  ;;  %v1560_v6 = vpop.f32.mrb[26].mxu0 }
 0x444   :  { %4287 = vmatprep.subr.bf16.mxu0 %v5619_v23  ;;  %v1562_v11 = vpop.f32.mrb[27].mxu0 }
 0x445   :  { %1700 = vmatprep.mubr.f32.mxu0 %v1562_v11  ;;  %v1837_v11 = vld [vmem:[#allocation2 + $0x538] sm:$0xff] }
 0x446   :  { %1701 = vmatmul.mubr.f32.gmra.mrb[22].mxu0 %v1560_v6  ;;  %v1835_v6 = vld [vmem:[#allocation2 + $0x528] sm:$0xff] }
 0x447   :  { %4289 = vmatpush1.bf16.msra.mxu0 %v5617_v56  ;;  %1784 = vmatprep.mubr.f32.mxu0 %v4810_v15  ;;  %v4326_v36 = vpack.c.bf16 %v1837_v11, %v1835_v6  ;;  %v2036_v6 = vld [vmem:[#allocation2 + $0x630] sm:$0xff]  ;;  %v2039_v11 = vld [vmem:[#allocation2 + $0x648] sm:$0xff] }
 0x448   :  { %4291 = vmatprep.subr.bf16.mxu0 %v4290_v47  ;;  %v4324_v47 = vpack.c.bf16 %v1832_v17, %v1830_v4  ;;  %v2037_v4 = vld [vmem:[#allocation2 + $0x638] sm:$0xff] }
 0x44a   :  { %3518 = vmatmul.mubr.msk.f32.vlgmr.msra.gmra.mrb[28].mxu0 %vm1239_vm9, %v3516_v5  ;;  %v1841_v5 = vld [vmem:[#allocation2 + $0x558] sm:$0xff] }
 0x44b   :  { %4293 = vmatpush1.bf16.msra.mxu0 %v4292_v9  ;;  %1790 = vmatprep.mubr.f32.mxu0 %v4810_v15  ;;  %v4328_v9 = vpack.c.bf16 %v1836_v12, %v1834_v3  ;;  %v2038_v12 = vld [vmem:[#allocation2 + $0x640] sm:$0xff] }
 0x44c   :  { %4295 = vmatprep.subr.bf16.mxu0 %v4294_v13  ;;  %v4330_v13 = vpack.c.bf16 %v1841_v5, %v1839_v46  ;;  %v2040_v46 = vld [vmem:[#allocation2 + $0x650] sm:$0xff]  ;;  %v2043_v5 = vld [vmem:[#allocation2 + $0x668] sm:$0xff] }
 0x44e   :  { %3519 = vmatmul.mubr.msk.f32.gmra.mrb[30].mxu0 %vm1239_vm9, %v3517_v19  ;;  %v4332_v19 = vpack.c.bf16 %v1840_v14, %v1838_v10  ;;  %v2042_v14 = vld [vmem:[#allocation2 + $0x660] sm:$0xff] }
 0x44f   :  { %4297 = vmatpush1.bf16.msra.mxu0 %v4296_v21  ;;  %v4334_v21 = vpack.c.bf16 %v1845_v61, %v1843_v18  ;;  %v2044_v18 = vld [vmem:[#allocation2 + $0x670] sm:$0xff]  ;;  %v2047_v61 = vld [vmem:[#allocation2 + $0x688] sm:$0xff] }
 0x450   :  { %4299 = vmatprep.subr.bf16.mxu0 %v4298_v44  ;;  %v1842_v44 = vld [vmem:[#allocation2 + $0x560] sm:$0xff] }
 0x451   :  { %v4336_v26 = vpack.c.bf16 %v1844_v16, %v1842_v44  ;;  %v2046_v16 = vld [vmem:[#allocation2 + $0x680] sm:$0xff] }
 0x453   :  { %4301 = vmatpush1.bf16.msra.mxu0 %v4300_v54  ;;  %v4338_v54 = vpack.c.bf16 %v1849_v24, %v1847_v34  ;;  %v2048_v34 = vld [vmem:[#allocation2 + $0x690] sm:$0xff]  ;;  %v2051_v24 = vld [vmem:[#allocation2 + $0x6a8] sm:$0xff] }
 0x454   :  { %4303 = vmatprep.subr.bf16.mxu0 %v4302_v28  ;;  %v1846_v28 = vld [vmem:[#allocation2 + $0x580] sm:$0xff] }
 0x455   :  { %v4340_v32 = vpack.c.bf16 %v1848_v20, %v1846_v28  ;;  %v2050_v20 = vld [vmem:[#allocation2 + $0x6a0] sm:$0xff] }
 0x457   :  { %4305 = vmatpush1.bf16.msra.mxu0 %v4304_v33  ;;  %v4342_v33 = vpack.c.bf16 %v1853_v39, %v1851_v43  ;;  %v2052_v43 = vld [vmem:[#allocation2 + $0x6b0] sm:$0xff]  ;;  %v2055_v39 = vld [vmem:[#allocation2 + $0x6c8] sm:$0xff] }
 0x458   :  { %4307 = vmatprep.subr.bf16.mxu0 %v4306_v8  ;;  %v1850_v8 = vld [vmem:[#allocation2 + $0x5a0] sm:$0xff] }
 0x459   :  { %v4344_v41 = vpack.c.bf16 %v1852_v37, %v1850_v8  ;;  %v2054_v37 = vld [vmem:[#allocation2 + $0x6c0] sm:$0xff] }
 0x45b   :  { %4309 = vmatpush1.bf16.msra.mxu0 %v4308_v40  ;;  %v4346_v40 = vpack.c.bf16 %v1857_v38, %v1855_v31  ;;  %v2056_v31 = vld [vmem:[#allocation2 + $0x6d0] sm:$0xff]  ;;  %v2059_v38 = vld [vmem:[#allocation2 + $0x6e8] sm:$0xff] }
 0x45c   :  { %4311 = vmatprep.subr.bf16.mxu0 %v4310_v27  ;;  %v1854_v27 = vld [vmem:[#allocation2 + $0x5c0] sm:$0xff] }
 0x45d   :  { %v4348_v52 = vpack.c.bf16 %v1856_v49, %v1854_v27  ;;  %v2058_v49 = vld [vmem:[#allocation2 + $0x6e0] sm:$0xff] }
 0x45f   :  { %4313 = vmatpush1.bf16.msra.mxu0 %v4312_v55  ;;  %v4350_v55 = vpack.c.bf16 %v1861_v30, %v1859_v48  ;;  %v2060_v48 = vld [vmem:[#allocation2 + $0x6f0] sm:$0xff]  ;;  %v2063_v30 = vld [vmem:[#allocation2 + $0x708] sm:$0xff] }
 0x460   :  { %4315 = vmatprep.subr.bf16.mxu0 %v4314_v53  ;;  %v1858_v53 = vld [vmem:[#allocation2 + $0x5e0] sm:$0xff] }
 0x461   :  { %v4352_v57 = vpack.c.bf16 %v1860_v59, %v1858_v53  ;;  %v2062_v59 = vld [vmem:[#allocation2 + $0x700] sm:$0xff] }
 0x463   :  { %4317 = vmatpush1.bf16.msra.mxu0 %v4316_v63  ;;  %v2031_v63 = vld [vmem:[#allocation2 + $0x608] sm:$0xff] }
 0x464   :  { %4319 = vmatprep.subr.bf16.mxu0 %v4318_v22  ;;  %v2033_v22 = vld [vmem:[#allocation2 + $0x618] sm:$0xff] }
 0x465   :  { %v4362_v0 = vpack.c.bf16 %v2033_v22, %v2031_v63 }
 0x467   :  { %4321 = vmatpush1.bf16.msra.mxu0 %v4320_v35  ;;  %v2032_v35 = vld [vmem:[#allocation2 + $0x610] sm:$0xff] }
 0x468   :  { %4323 = vmatprep.subr.bf16.mxu0 %v4322_v2  ;;  %v2035_v2 = vld [vmem:[#allocation2 + $0x628] sm:$0xff] }
 0x469   :  { %v4366_v17 = vpack.c.bf16 %v2037_v4, %v2035_v2  ;;  %v2070_v4 = vld [vmem:[#allocation2 + $0x740] sm:$0xff] }
 0x46b   :  { %4325 = vmatpush1.bf16.msra.mxu0 %v4324_v47  ;;  %v2041_v47 = vld [vmem:[#allocation2 + $0x658] sm:$0xff] }
 0x46c   :  { %4327 = vmatprep.subr.bf16.mxu0 %v4326_v36  ;;  %v4370_v3 = vpack.c.bf16 %v2041_v47, %v2039_v11  ;;  %v2074_v11 = vld [vmem:[#allocation2 + $0x760] sm:$0xff]  ;;  %v2076_v47 = vld [vmem:[#allocation2 + $0x770] sm:$0xff] }
 0x46f   :  { %4329 = vmatpush1.bf16.msra.mxu0 %v4328_v9  ;;  %v2045_v9 = vld [vmem:[#allocation2 + $0x678] sm:$0xff] }
 0x470   :  { %4331 = vmatprep.subr.bf16.mxu0 %v4330_v13  ;;  %v4372_v13 = vpack.c.bf16 %v2040_v46, %v2038_v12  ;;  %v4374_v10 = vpack.c.bf16 %v2045_v9, %v2043_v5  ;;  %v2078_v46 = vld [vmem:[#allocation2 + $0x780] sm:$0xff]  ;;  %v2080_v5 = vld [vmem:[#allocation2 + $0x790] sm:$0xff]  ;;  %v2083_v9 = vld [vmem:[#allocation2 + $0x7a8] sm:$0xff] }
 0x473   :  { %4333 = vmatpush1.bf16.msra.mxu0 %v4332_v19  ;;  %v2049_v19 = vld [vmem:[#allocation2 + $0x698] sm:$0xff] }
 0x474   :  { %4335 = vmatprep.subr.bf16.mxu0 %v4334_v21  ;;  %v4376_v21 = vpack.c.bf16 %v2044_v18, %v2042_v14  ;;  %v4378_v44 = vpack.c.bf16 %v2049_v19, %v2047_v61  ;;  %v2082_v18 = vld [vmem:[#allocation2 + $0x7a0] sm:$0xff]  ;;  %v2084_v61 = vld [vmem:[#allocation2 + $0x7b0] sm:$0xff]  ;;  %v2087_v19 = vld [vmem:[#allocation2 + $0x7c8] sm:$0xff] }
 0x477   :  { %4337 = vmatpush1.bf16.msra.mxu0 %v4336_v26  ;;  %v2053_v26 = vld [vmem:[#allocation2 + $0x6b8] sm:$0xff] }
 0x478   :  { %4339 = vmatprep.subr.bf16.mxu0 %v4338_v54  ;;  %v4380_v54 = vpack.c.bf16 %v2048_v34, %v2046_v16  ;;  %v4382_v28 = vpack.c.bf16 %v2053_v26, %v2051_v24  ;;  %v2086_v34 = vld [vmem:[#allocation2 + $0x7c0] sm:$0xff]  ;;  %v2088_v24 = vld [vmem:[#allocation2 + $0x7d0] sm:$0xff]  ;;  %v2091_v26 = vld [vmem:[#allocation2 + $0x7e8] sm:$0xff] }
 0x47b   :  { %4341 = vmatpush1.bf16.msra.mxu0 %v4340_v32  ;;  %v2057_v32 = vld [vmem:[#allocation2 + $0x6d8] sm:$0xff] }
 0x47c   :  { %4343 = vmatprep.subr.bf16.mxu0 %v4342_v33  ;;  %v4384_v33 = vpack.c.bf16 %v2052_v43, %v2050_v20  ;;  %v4386_v8 = vpack.c.bf16 %v2057_v32, %v2055_v39  ;;  %v2090_v43 = vld [vmem:[#allocation2 + $0x7e0] sm:$0xff]  ;;  %v2092_v39 = vld [vmem:[#allocation2 + $0x7f0] sm:$0xff] }
 0x47d   :  { %v4424_v32 = vpack.c.bf16 %v2092_v39, %v2090_v43 }
 0x47f   :  { %4345 = vmatpush1.bf16.msra.mxu0 %v4344_v41  ;;  %v2061_v41 = vld [vmem:[#allocation2 + $0x6f8] sm:$0xff] }
 0x480   :  { %4347 = vmatprep.subr.bf16.mxu0 %v4346_v40  ;;  %v4388_v40 = vpack.c.bf16 %v2056_v31, %v2054_v37  ;;  %v4390_v27 = vpack.c.bf16 %v2061_v41, %v2059_v38  ;;  %v1236_v38 = vld [vmem:[%s5909_s6] sm:$0x3] }
 0x481   :  { %v1468_v41 = vrot.slane %v1236_v38, %v308_v51 }
 0x483   :  { %4349 = vmatpush1.bf16.msra.mxu0 %v4348_v52  ;;  %v2065_v52 = vld [vmem:[#allocation2 + $0x718] sm:$0xff] }
 0x484   :  { %4351 = vmatprep.subr.bf16.mxu0 %v4350_v55  ;;  %v4392_v55 = vpack.c.bf16 %v2060_v48, %v2058_v49  ;;  %v4394_v53 = vpack.c.bf16 %v2065_v52, %v2063_v30 }
 0x487   :  { %4353 = vmatpush1.bf16.msra.mxu0 %v4352_v57  ;;  %v2064_v57 = vld [vmem:[#allocation2 + $0x710] sm:$0xff] }
 0x488   :  { %4355 = vmatprep.subr.bf16.mxu0 %v5600_v29  ;;  %v3520_v29 = vld [vmem:[%s5907_s4 + $0x30] sm:$0xff]  ;;  %v4396_v63 = vpack.c.bf16 %v2064_v57, %v2062_v59 }
 0x51d   :  { %v1786_v1 = vpop.f32.mrb[28].mxu0 }
 0x51e   :  { %v1788_v60 = vpop.f32.mrb[29].mxu0 }
 0x51f   :  { %1926 = vmatprep.mubr.f32.mxu0 %v1788_v60  ;;  %v2069_v60 = vld [vmem:[#allocation2 + $0x738] sm:$0xff] }
 0x520   :  { %1927 = vmatmul.mubr.f32.vlgmr.msra.gmra.mrb[20].mxu0 %v1786_v1  ;;  %v2067_v1 = vld [vmem:[#allocation2 + $0x728] sm:$0xff] }
 0x521   :  { %4357 = vmatpush1.bf16.msra.mxu0 %v5596_v42  ;;  %v1792_v62 = vpop.f32.mrb[30].mxu0  ;;  %v4364_v42 = vpack.c.bf16 %v2032_v35, %v2030_v7  ;;  %v4398_v22 = vpack.c.bf16 %v2069_v60, %v2067_v1  ;;  %v2073_v7 = vld [vmem:[#allocation2 + $0x758] sm:$0xff] }
 0x522   :  { %4359 = vmatprep.subr.bf16.mxu0 %v5619_v23  ;;  %v1794_v58 = vpop.f32.mrb[31].mxu0  ;;  %v2034_v23 = vld [vmem:[#allocation2 + $0x620] sm:$0xff] }
 0x523   :  { %1932 = vmatprep.mubr.f32.mxu0 %v1794_v58  ;;  %v4368_v36 = vpack.c.bf16 %v2036_v6, %v2034_v23  ;;  %v2068_v58 = vld [vmem:[#allocation2 + $0x730] sm:$0xff] }
 0x524   :  { %1933 = vmatmul.mubr.f32.gmra.mrb[22].mxu0 %v1792_v62  ;;  %v2066_v62 = vld [vmem:[#allocation2 + $0x720] sm:$0xff] }
 0x525   :  { %4361 = vmatpush1.bf16.msra.mxu0 %v5617_v56  ;;  %2016 = vmatprep.mubr.f32.mxu0 %v4810_v15  ;;  %v3521_v56 = vld [vmem:[%s5907_s4 + $0x38] sm:$0xff]  ;;  %v4400_v35 = vpack.c.bf16 %v2068_v58, %v2066_v62  ;;  %s4814_s4 = smov [#allocation7]  }
 0x526   :  { %4363 = vmatprep.subr.bf16.mxu0 %v4362_v0  ;;  %v2071_v0 = vld [vmem:[#allocation2 + $0x748] sm:$0xff]  ;;  %s3376_s28 = sshll.u32 %s4814_s4, 4  ;;  %s3377_s28 = int_to_ptr.vmem [resolvable:$true] %s3376_s28 }
 0x527   :  { %v4402_v2 = vpack.c.bf16 %v2073_v7, %v2071_v0  ;;  %p4781_p3 = scmp.lt.s32.totalorder %s3377_s28, %s3377_s28 }
 0x528   :  { %3522 = vmatmul.mubr.msk.f32.vlgmr.msra.gmra.mrb[32].mxu0 %vm1239_vm9, %v3520_v29  ;;  %v2072_v29 = vld [vmem:[#allocation2 + $0x750] sm:$0xff] }
 0x529   :  { %2022 = vmatprep.mubr.f32.mxu0 %v4810_v15  ;;  %4365 = vmatpush1.bf16.msra.mxu0 %v4364_v42  ;;  %v2075_v42 = vld [vmem:[#allocation2 + $0x768] sm:$0xff]  ;;  %v4404_v23 = vpack.c.bf16 %v2072_v29, %v2070_v4 }
 0x52a   :  { %4367 = vmatprep.subr.bf16.mxu0 %v4366_v17  ;;  %v2077_v17 = vld [vmem:[#allocation2 + $0x778] sm:$0xff] }
 0x52b   :  { %v4406_v6 = vpack.c.bf16 %v2077_v17, %v2075_v42 }
 0x52c   :  { %3523 = vmatmul.mubr.msk.f32.gmra.mrb[34].mxu0 %vm1239_vm9, %v3521_v56  ;;  %v2079_v56 = vld [vmem:[#allocation2 + $0x788] sm:$0xff] }
 0x52d   :  { %4369 = vmatpush1.bf16.msra.mxu0 %v4368_v36  ;;  %v2081_v36 = vld [vmem:[#allocation2 + $0x798] sm:$0xff] }
 0x52e   :  { %4371 = vmatprep.subr.bf16.mxu0 %v4370_v3  ;;  %v4408_v3 = vpack.c.bf16 %v2076_v47, %v2074_v11  ;;  %v4410_v12 = vpack.c.bf16 %v2081_v36, %v2079_v56 }
 0x531   :  { %4373 = vmatpush1.bf16.msra.mxu0 %v4372_v13  ;;  %v2085_v13 = vld [vmem:[#allocation2 + $0x7b8] sm:$0xff] }
 0x532   :  { %4375 = vmatprep.subr.bf16.mxu0 %v4374_v10  ;;  %v4412_v10 = vpack.c.bf16 %v2080_v5, %v2078_v46  ;;  %v4414_v14 = vpack.c.bf16 %v2085_v13, %v2083_v9 }
 0x535   :  { %4377 = vmatpush1.bf16.msra.mxu0 %v4376_v21  ;;  %v2089_v21 = vld [vmem:[#allocation2 + $0x7d8] sm:$0xff] }
 0x536   :  { %4379 = vmatprep.subr.bf16.mxu0 %v4378_v44  ;;  %v4416_v44 = vpack.c.bf16 %v2084_v61, %v2082_v18  ;;  %v4418_v16 = vpack.c.bf16 %v2089_v21, %v2087_v19 }
 0x539   :  { %4381 = vmatpush1.bf16.msra.mxu0 %v4380_v54  ;;  %v2093_v54 = vld [vmem:[#allocation2 + $0x7f8] sm:$0xff] }
 0x53a   :  { %4383 = vmatprep.subr.bf16.mxu0 %v4382_v28  ;;  %v4420_v28 = vpack.c.bf16 %v2088_v24, %v2086_v34  ;;  %v4422_v20 = vpack.c.bf16 %v2093_v54, %v2091_v26 }
 0x53d   :  { %4385 = vmatpush1.bf16.msra.mxu0 %v4384_v33 }
 0x53e   :  { %4387 = vmatprep.subr.bf16.mxu0 %v4386_v8 }
 0x541   :  { %4389 = vmatpush1.bf16.msra.mxu0 %v4388_v40  ;;  %v1472_v40 = vrot.slane %v1236_v38, %v312_v45 }
 0x542   :  { %4391 = vmatprep.subr.bf16.mxu0 %v4390_v27 }
 0x545   :  { %4393 = vmatpush1.bf16.msra.mxu0 %v4392_v55 }
 0x546   :  { %4395 = vmatprep.subr.bf16.mxu0 %v4394_v53 }
 0x549   :  { %4397 = vmatpush1.bf16.msra.mxu0 %v4396_v63 }
 0x54a   :  { %4399 = vmatprep.subr.bf16.mxu0 %v4398_v22 }
 0x54d   :  { %4401 = vmatpush1.bf16.msra.mxu0 %v4400_v35 }
 0x54e   :  { %4403 = vmatprep.subr.bf16.mxu0 %v4402_v2 }
 0x551   :  { %4405 = vmatpush1.bf16.msra.mxu0 %v4404_v23 }
 0x552   :  { %4407 = vmatprep.subr.bf16.mxu0 %v4406_v6 }
 0x555   :  { %4409 = vmatpush1.bf16.msra.mxu0 %v4408_v3 }
 0x556   :  { %4411 = vmatprep.subr.bf16.mxu0 %v4410_v12 }
 0x559   :  { %4413 = vmatpush1.bf16.msra.mxu0 %v4412_v10 }
 0x55a   :  { %4415 = vmatprep.subr.bf16.mxu0 %v4414_v14 }
 0x55d   :  { %4417 = vmatpush1.bf16.msra.mxu0 %v4416_v44 }
 0x55e   :  { %4419 = vmatprep.subr.bf16.mxu0 %v4418_v16 }
 0x561   :  { %4421 = vmatpush1.bf16.msra.mxu0 %v4420_v28 }
 0x562   :  { %4423 = vmatprep.subr.bf16.mxu0 %v4422_v20 }
 0x565   :  { %4425 = vmatpush1.bf16.msra.mxu0 %v4424_v32 }
 0x5fb   :  { %v2018_v33 = vpop.f32.mrb[32].mxu0 }
 0x5fc   :  { %v2020_v8 = vpop.f32.mrb[33].mxu0 }
 0x5fd   :  { %2158 = vmatprep.mubr.f32.mxu0 %v2020_v8 }
 0x5fe   :  { %2159 = vmatmul.mubr.f32.vlgmr.msra.gmra.mrb[20].mxu0 %v2018_v33 }
 0x5ff   :  { %v2024_v37 = vpop.f32.mrb[34].mxu0 }
 0x600   :  { %v2026_v31 = vpop.f32.mrb[35].mxu0 }
 0x601   :  { %2164 = vmatprep.mubr.f32.mxu0 %v2026_v31 }
 0x602   :  { %2165 = vmatmul.mubr.f32.gmra.mrb[22].mxu0 %v2024_v37 }
 0x6d1   :  { %v2160_v27 = vpop.f32.mrb[20].mxu0 }
 0x6d2   :  { %v5681_v49 = vadd.f32 %v2160_v27, %v1468_v41  ;;  %v2162_v48 = vpop.f32.mrb[21].mxu0 }
 0x6d3   :  { %v5683_v30 = vadd.f32 %v2162_v48, %v1472_v40 }
 0x6d4   :  { %v5686_v52 = vmul.f32 0.70710677, %v5681_v49 }
 0x6d5   :  { %v5689_v55 = vmul.f32 0.70710677, %v5683_v30  ;;  %v2166_v53 = vpop.f32.mrb[22].mxu0 }
 0x6d6   :  { %v2191_v59 = vand.u32 2147483647, %v5686_v52  ;;  %v5692_v57 = vadd.f32 %v2166_v53, %v1468_v41  ;;  %v2168_v51 = vpop.f32.mrb[23].mxu0  ;;  %vm2183_vm10 = vcmp.ge.f32.partialorder %v5686_v52, 0.0 }
 0x6d7   :  { %v2192_v50 = vand.u32 2147483647, %v5689_v55  ;;  %v5695_v45 = vadd.f32 %v2168_v51, %v1472_v40  ;;  %vm2184_vm11 = vcmp.ge.f32.partialorder %v5689_v55, 0.0 }
 0x6d8   :  { %v2195_v1 = vmul.f32 0.3275911, %v2191_v59  ;;  %v5698_v63 = vmul.f32 0.70710677, %v5692_v57  ;;  %v2247_v29 = vsub.f32 0.0, %v2191_v59  ;;  %v2188_v52 = vsel %vm2184_vm11, 1.0, %v4811_v25 }
 0x6d9   :  { %v2196_v60 = vmul.f32 0.3275911, %v2192_v50  ;;  %v5701_v62 = vmul.f32 0.70710677, %v5695_v45  ;;  %v2248_v17 = vsub.f32 0.0, %v2192_v50 }
 0x6da   :  { %v2199_v22 = vadd.f32 1.0, %v2195_v1  ;;  %v2193_v0 = vand.u32 2147483647, %v5698_v63  ;;  %v2251_v6 = vmul.f32 %v2247_v29, %v2191_v59  ;;  %vm2185_vm12 = vcmp.ge.f32.partialorder %v5698_v63, 0.0 }
 0x6db   :  { %v2200_v58 = vadd.f32 1.0, %v2196_v60  ;;  %v2194_v35 = vand.u32 2147483647, %v5701_v62  ;;  %v2252_v56 = vmul.f32 %v2248_v17, %v2192_v50  ;;  %vm2186_vm13 = vcmp.ge.f32.partialorder %v5701_v62, 0.0 }
 0x6dc   :  { %4712 = vrcp.f32 %v2199_v22  ;;  %v2197_v7 = vmul.f32 0.3275911, %v2193_v0  ;;  %v2249_v36 = vsub.f32 0.0, %v2193_v0  ;;  %v2255_v46 = vmul.f32 1.442695, %v2251_v6 }
 0x6dd   :  { %4714 = vrcp.f32 %v2200_v58  ;;  %v2198_v4 = vmul.f32 0.3275911, %v2194_v35  ;;  %v2250_v9 = vsub.f32 0.0, %v2194_v35  ;;  %v2257_v14 = vmul.f32 1.442695, %v2252_v56 }
 0x6de   :  { %v2201_v2 = vadd.f32 1.0, %v2197_v7  ;;  %v2253_v18 = vmul.f32 %v2249_v36, %v2193_v0  ;;  %v2187_v6 = vsel %vm2183_vm10, 1.0, %v4811_v25 }
 0x6df   :  { %v2202_v42 = vadd.f32 1.0, %v2198_v4  ;;  %v2254_v24 = vmul.f32 %v2250_v9, %v2194_v35 }
 0x6e0   :  { %4716 = vrcp.f32 %v2201_v2  ;;  %v2259_v54 = vmul.f32 1.442695, %v2253_v18  ;;  %v2177_v18 = vmul.f32 0.5, %v5692_v57 }
 0x6e1   :  { %4718 = vrcp.f32 %v2202_v42  ;;  %v2261_v37 = vmul.f32 1.442695, %v2254_v24  ;;  %v2178_v24 = vmul.f32 0.5, %v5695_v45 }
 0x6e2   :  { %4720 = vpow2.f32 %v2255_v46 }
 0x6e3   :  { %4722 = vpow2.f32 %v2257_v14  ;;  %v2175_v14 = vmul.f32 0.5, %v5681_v49 }
 0x6e4   :  { %4724 = vpow2.f32 %v2259_v54  ;;  %v2376_v54 = vld [vmem:[#allocation5 + $0x80] sm:$0xff] }
 0x6e5   :  { %4726 = vpow2.f32 %v2261_v37 }
 0x6e6   :  { %v4713_v23 = vpop.eup %4712 }
 0x6e7   :  { %v4715_v11 = vpop.eup %4714  ;;  %v2211_v47 = vmul.f32 1.0614054, %v4713_v23 }
 0x6e8   :  { %v2212_v3 = vmul.f32 1.0614054, %v4715_v11 }
 0x6e9   :  { %v2215_v12 = vadd.f32 -1.4531521, %v2211_v47 }
 0x6ea   :  { %v2216_v5 = vadd.f32 -1.4531521, %v2212_v3  ;;  %v4717_v13 = vpop.eup %4716 }
 0x6eb   :  { %v2219_v10 = vmul.f32 %v4713_v23, %v2215_v12  ;;  %v2213_v19 = vmul.f32 1.0614054, %v4717_v13  ;;  %v4719_v44 = vpop.eup %4718 }
 0x6ec   :  { %v2220_v61 = vmul.f32 %v4715_v11, %v2216_v5  ;;  %v2214_v28 = vmul.f32 1.0614054, %v4719_v44  ;;  %v4721_v1 = vpop.eup %4720  ;;  %v2189_v5 = vsel %vm2185_vm12, 1.0, %v4811_v25 }
 0x6ed   :  { %v2223_v21 = vadd.f32 1.4214138, %v2219_v10  ;;  %v2217_v34 = vadd.f32 -1.4531521, %v2213_v19  ;;  %v4723_v58 = vpop.eup %4722 }
 0x6ee   :  { %v2224_v16 = vadd.f32 1.4214138, %v2220_v61  ;;  %v2218_v32 = vadd.f32 -1.4531521, %v2214_v28  ;;  %v4725_v17 = vpop.eup %4724  ;;  %v2190_v61 = vsel %vm2186_vm13, 1.0, %v4811_v25  ;;  %v2377_v28 = vld [vmem:[#allocation5 + $0x88] sm:$0xff] }
 0x6ef   :  { %v2227_v26 = vmul.f32 %v4713_v23, %v2223_v21  ;;  %v2221_v43 = vmul.f32 %v4717_v13, %v2217_v34  ;;  %v4727_v3 = vpop.eup %4726  ;;  %v2176_v34 = vmul.f32 0.5, %v5683_v30  ;;  %v4430_v57 = vpack.c.bf16 %v2377_v28, %v2376_v54  ;;  %v2284_v30 = vld [vmem:[%s5910_s7] sm:$0xff]  ;;  %v3526_v54 = vld [vmem:[%s5910_s7 + $0x8] sm:$0xff] }
 0x6f0   :  { %v2228_v20 = vmul.f32 %v4715_v11, %v2224_v16  ;;  %v2222_v38 = vmul.f32 %v4719_v44, %v2218_v32  ;;  %v2361_v32 = vld [vmem:[#allocation5 + $0x8] sm:$0xff] }
 0x6f1   :  { %v2231_v39 = vadd.f32 -0.28449672, %v2227_v26  ;;  %v2225_v8 = vadd.f32 1.4214138, %v2221_v43 }
 0x6f2   :  { %v2232_v33 = vadd.f32 -0.28449672, %v2228_v20  ;;  %v2226_v48 = vadd.f32 1.4214138, %v2222_v38  ;;  %v2363_v38 = vld [vmem:[#allocation5 + $0x18] sm:$0xff] }
 0x6f3   :  { %v2235_v31 = vmul.f32 %v4713_v23, %v2231_v39  ;;  %v2229_v40 = vmul.f32 %v4717_v13, %v2225_v8  ;;  %v2360_v39 = vld [vmem:[#allocation5] sm:$0xff]  ;;  %v2379_v8 = vld [vmem:[#allocation5 + $0x98] sm:$0xff] }
 0x6f4   :  { %v2236_v41 = vmul.f32 %v4715_v11, %v2232_v33  ;;  %v2230_v50 = vmul.f32 %v4719_v44, %v2226_v48  ;;  %v2378_v33 = vld [vmem:[#allocation5 + $0x90] sm:$0xff]  ;;  %v4432_v45 = vpack.c.bf16 %v2361_v32, %v2360_v39  ;;  %v2566_v39 = vld [vmem:[#allocation5 + $0x1a0] sm:$0xff]  ;;  %v2567_v32 = vld [vmem:[#allocation5 + $0x1a8] sm:$0xff] }
 0x6f5   :  { %v2239_v27 = vadd.f32 0.2548296, %v2235_v31  ;;  %v2233_v59 = vadd.f32 -0.28449672, %v2229_v40  ;;  %v4434_v37 = vpack.c.bf16 %v2379_v8, %v2378_v33  ;;  %v2362_v31 = vld [vmem:[#allocation5 + $0x10] sm:$0xff]  ;;  %v2381_v40 = vld [vmem:[#allocation5 + $0xa8] sm:$0xff]  ;;  %v4474_v8 = vpack.c.bf16 %v2567_v32, %v2566_v39 }
 0x6f6   :  { %v2240_v53 = vadd.f32 0.2548296, %v2236_v41  ;;  %v2234_v7 = vadd.f32 -0.28449672, %v2230_v50  ;;  %v2380_v41 = vld [vmem:[#allocation5 + $0xa0] sm:$0xff]  ;;  %v2383_v50 = vld [vmem:[#allocation5 + $0xb8] sm:$0xff] }
 0x6f7   :  { %v2243_v51 = vmul.f32 %v4713_v23, %v2239_v27  ;;  %v2237_v22 = vmul.f32 %v4717_v13, %v2233_v59  ;;  %v4436_v27 = vpack.c.bf16 %v2363_v38, %v2362_v31  ;;  %v4438_v48 = vpack.c.bf16 %v2381_v40, %v2380_v41  ;;  %v2365_v59 = vld [vmem:[#allocation5 + $0x28] sm:$0xff]  ;;  %v2569_v31 = vld [vmem:[#allocation5 + $0x1b8] sm:$0xff]  ;;  %v2552_v40 = vld [vmem:[#allocation5 + $0x130] sm:$0xff] }
 0x6f8   :  { %v2244_v60 = vmul.f32 %v4715_v11, %v2240_v53  ;;  %v2238_v29 = vmul.f32 %v4719_v44, %v2234_v7  ;;  %v2364_v53 = vld [vmem:[#allocation5 + $0x20] sm:$0xff]  ;;  %v2385_v7 = vld [vmem:[#allocation5 + $0xc8] sm:$0xff]  ;;  %v2748_v39 = vld [vmem:[#allocation5 + $0x2b0] sm:$0xff] }
 0x6f9   :  { %v2263_v0 = vmul.f32 %v4721_v1, %v2243_v51  ;;  %v2241_v2 = vadd.f32 0.2548296, %v2237_v22  ;;  %v2382_v51 = vld [vmem:[#allocation5 + $0xb0] sm:$0xff]  ;;  %v4440_v1 = vpack.c.bf16 %v2365_v59, %v2364_v53  ;;  %v2571_v53 = vld [vmem:[#allocation5 + $0x1c8] sm:$0xff]  ;;  %v2749_v32 = vld [vmem:[#allocation5 + $0x2b8] sm:$0xff] }
 0x6fa   :  { %v2264_v35 = vmul.f32 %v4723_v58, %v2244_v60  ;;  %v2242_v47 = vadd.f32 0.2548296, %v2238_v29  ;;  %v4442_v60 = vpack.c.bf16 %v2383_v50, %v2382_v51  ;;  %v2366_v22 = vld [vmem:[#allocation5 + $0x30] sm:$0xff]  ;;  %v2367_v58 = vld [vmem:[#allocation5 + $0x38] sm:$0xff]  ;;  %v2369_v29 = vld [vmem:[#allocation5 + $0x48] sm:$0xff] }
 0x6fb   :  { %v2267_v4 = vsub.f32 1.0, %v2263_v0  ;;  %v2245_v42 = vmul.f32 %v4717_v13, %v2241_v2  ;;  %v2384_v0 = vld [vmem:[#allocation5 + $0xc0] sm:$0xff] }
 0x6fc   :  { %v2268_v23 = vsub.f32 1.0, %v2264_v35  ;;  %v2246_v36 = vmul.f32 %v4719_v44, %v2242_v47  ;;  %v4444_v35 = vpack.c.bf16 %v2367_v58, %v2366_v22  ;;  %v4446_v2 = vpack.c.bf16 %v2385_v7, %v2384_v0  ;;  %v2370_v47 = vld [vmem:[#allocation5 + $0x50] sm:$0xff]  ;;  %v2554_v50 = vld [vmem:[#allocation5 + $0x140] sm:$0xff]  ;;  %v2573_v22 = vld [vmem:[#allocation5 + $0x1d8] sm:$0xff] }
 0x6fd   :  { %v2271_v56 = vmul.f32 %v2267_v4, %v2187_v6  ;;  %v2265_v11 = vmul.f32 %v4725_v17, %v2245_v42  ;;  %v2368_v4 = vld [vmem:[#allocation5 + $0x40] sm:$0xff]  ;;  %v2386_v42 = vld [vmem:[#allocation5 + $0xd0] sm:$0xff]  ;;  %v2387_v17 = vld [vmem:[#allocation5 + $0xd8] sm:$0xff] }
 0x6fe   :  { %v2272_v46 = vmul.f32 %v2268_v23, %v2188_v52  ;;  %v2266_v9 = vmul.f32 %v4727_v3, %v2246_v36  ;;  %v4448_v6 = vpack.c.bf16 %v2369_v29, %v2368_v4  ;;  %v4450_v23 = vpack.c.bf16 %v2387_v17, %v2386_v42  ;;  %v2389_v36 = vld [vmem:[#allocation5 + $0xe8] sm:$0xff]  ;;  %v2556_v7 = vld [vmem:[#allocation5 + $0x150] sm:$0xff]  ;;  %v2558_v17 = vld [vmem:[#allocation5 + $0x160] sm:$0xff] }
 0x6ff   :  { %v2269_v12 = vsub.f32 1.0, %v2265_v11  ;;  %v2275_v13 = vadd.f32 1.0, %v2271_v56  ;;  %v2371_v56 = vld [vmem:[#allocation5 + $0x58] sm:$0xff]  ;;  %v2388_v11 = vld [vmem:[#allocation5 + $0xe0] sm:$0xff]  ;;  %v2575_v4 = vld [vmem:[#allocation5 + $0x1e8] sm:$0xff] }
 0x700   :  { %v2270_v55 = vsub.f32 1.0, %v2266_v9  ;;  %v2276_v19 = vadd.f32 1.0, %v2272_v46  ;;  %v4452_v3 = vpack.c.bf16 %v2371_v56, %v2370_v47  ;;  %v4454_v52 = vpack.c.bf16 %v2389_v36, %v2388_v11  ;;  %v2373_v46 = vld [vmem:[#allocation5 + $0x68] sm:$0xff]  ;;  %v2391_v9 = vld [vmem:[#allocation5 + $0xf8] sm:$0xff]  ;;  %v2560_v36 = vld [vmem:[#allocation5 + $0x170] sm:$0xff] }
 0x701   :  { %v2273_v10 = vmul.f32 %v2269_v12, %v2189_v5  ;;  %v2279_v44 = vmul.f32 %v2275_v13, %v2175_v14  ;;  %v2372_v12 = vld [vmem:[#allocation5 + $0x60] sm:$0xff]  ;;  %v2390_v5 = vld [vmem:[#allocation5 + $0xf0] sm:$0xff]  ;;  %v2375_v14 = vld [vmem:[#allocation5 + $0x78] sm:$0xff] }
 0x702   :  { %v2274_v21 = vmul.f32 %v2270_v55, %v2190_v61  ;;  %v2280_v20 = vmul.f32 %v2276_v19, %v2176_v34  ;;  %v4456_v13 = vpack.c.bf16 %v2373_v46, %v2372_v12  ;;  %v2374_v55 = vld [vmem:[#allocation5 + $0x70] sm:$0xff]  ;;  %v2563_v61 = vld [vmem:[#allocation5 + $0x188] sm:$0xff]  ;;  %v2577_v47 = vld [vmem:[#allocation5 + $0x1f8] sm:$0xff] }
 0x703   :  { %v2277_v63 = vadd.f32 1.0, %v2273_v10  ;;  %v4458_v10 = vpack.c.bf16 %v2391_v9, %v2390_v5  ;;  %v2547_v34 = vld [vmem:[#allocation5 + $0x108] sm:$0xff]  ;;  %v2742_v9 = vld [vmem:[#allocation5 + $0x280] sm:$0xff] }
 0x704   :  { %v2278_v62 = vadd.f32 1.0, %v2274_v21 }
 0x705   :  { %v2281_v16 = vmul.f32 %v2277_v63, %v2177_v18  ;;  %v4460_v18 = vpack.c.bf16 %v2375_v14, %v2374_v55  ;;  %v2562_v63 = vld [vmem:[#allocation5 + $0x180] sm:$0xff] }
 0x706   :  { %v2282_v49 = vmul.f32 %v2278_v62, %v2178_v24  ;;  %v2564_v24 = vld [vmem:[#allocation5 + $0x190] sm:$0xff]  ;;  %v2565_v62 = vld [vmem:[#allocation5 + $0x198] sm:$0xff] }
 0x707   :  { %v5717_v26 = vpack.c.bf16 %v2281_v16, %v2279_v44  ;;  %v4466_v44 = vpack.c.bf16 %v2563_v61, %v2562_v63  ;;  %v2546_v16 = vld [vmem:[#allocation5 + $0x100] sm:$0xff]  ;;  %v2727_v63 = vld [vmem:[#allocation5 + $0x208] sm:$0xff]  ;;  %v2744_v61 = vld [vmem:[#allocation5 + $0x290] sm:$0xff] }
 0x708   :  { %v5719_v43 = vpack.c.bf16 %v2282_v49, %v2280_v20  ;;  %v4468_v28 = vpack.c.bf16 %v2547_v34, %v2546_v16  ;;  %v4470_v20 = vpack.c.bf16 %v2565_v62, %v2564_v24  ;;  %v2548_v49 = vld [vmem:[#allocation5 + $0x110] sm:$0xff]  ;;  %v2729_v24 = vld [vmem:[#allocation5 + $0x218] sm:$0xff]  ;;  %v2746_v62 = vld [vmem:[#allocation5 + $0x2a0] sm:$0xff] }
 0x709   :  { %v2728_v34 = vld [vmem:[#allocation5 + $0x210] sm:$0xff] }
 0x70a   :  { %4427 = vmatprep.subr.bf16.mxu1 %v5719_v43 }
 0x70b   :  { %4429 = vmatpush1.bf16.msra.mxu1 %v5717_v26 }
 0x70c   :  { %4431 = vmatprep.subr.bf16.mxu1 %v4430_v57  ;;  %v2549_v57 = vld [vmem:[#allocation5 + $0x118] sm:$0xff] }
 0x70d   :  { %v4472_v33 = vpack.c.bf16 %v2549_v57, %v2548_v49  ;;  %v2730_v49 = vld [vmem:[#allocation5 + $0x220] sm:$0xff]  ;;  %v2731_v57 = vld [vmem:[#allocation5 + $0x228] sm:$0xff] }
 0x70e   :  { %3524 = vmatmul.mubr.msk.f32.vlgmr.msra.gmra.mrb[8].mxu1 %vm2285_vm14, %v2284_v30  ;;  %v2550_v30 = vld [vmem:[#allocation5 + $0x120] sm:$0xff] }
 0x70f   :  { %4433 = vmatpush3.bf16.msra.mxu1 %v4432_v45  ;;  %v2551_v45 = vld [vmem:[#allocation5 + $0x128] sm:$0xff] }
 0x710   :  { %4435 = vmatprep.subr.bf16.mxu1 %v4434_v37  ;;  %v2568_v37 = vld [vmem:[#allocation5 + $0x1b0] sm:$0xff]  ;;  %v4476_v38 = vpack.c.bf16 %v2551_v45, %v2550_v30  ;;  %v2733_v45 = vld [vmem:[#allocation5 + $0x238] sm:$0xff] }
 0x711   :  { %v4478_v41 = vpack.c.bf16 %v2569_v31, %v2568_v37  ;;  %v2732_v30 = vld [vmem:[#allocation5 + $0x230] sm:$0xff]  ;;  %v2750_v37 = vld [vmem:[#allocation5 + $0x2c0] sm:$0xff]  ;;  %v2751_v31 = vld [vmem:[#allocation5 + $0x2c8] sm:$0xff] }
 0x713   :  { %4437 = vmatpush3.bf16.msra.mxu1 %v4436_v27  ;;  %v2553_v27 = vld [vmem:[#allocation5 + $0x138] sm:$0xff] }
 0x714   :  { %4439 = vmatprep.subr.bf16.mxu1 %v4438_v48  ;;  %v2570_v48 = vld [vmem:[#allocation5 + $0x1c0] sm:$0xff]  ;;  %v4480_v59 = vpack.c.bf16 %v2553_v27, %v2552_v40  ;;  %v2735_v27 = vld [vmem:[#allocation5 + $0x248] sm:$0xff] }
 0x715   :  { %v4482_v51 = vpack.c.bf16 %v2571_v53, %v2570_v48  ;;  %v2734_v40 = vld [vmem:[#allocation5 + $0x240] sm:$0xff]  ;;  %v2752_v48 = vld [vmem:[#allocation5 + $0x2d0] sm:$0xff]  ;;  %v2753_v53 = vld [vmem:[#allocation5 + $0x2d8] sm:$0xff] }
 0x717   :  { %4441 = vmatpush3.bf16.msra.mxu1 %v4440_v1  ;;  %v2555_v1 = vld [vmem:[#allocation5 + $0x148] sm:$0xff] }
 0x718   :  { %4443 = vmatprep.subr.bf16.mxu1 %v4442_v60  ;;  %v2572_v60 = vld [vmem:[#allocation5 + $0x1d0] sm:$0xff]  ;;  %v4484_v58 = vpack.c.bf16 %v2555_v1, %v2554_v50  ;;  %v2737_v1 = vld [vmem:[#allocation5 + $0x258] sm:$0xff] }
 0x719   :  { %v4486_v0 = vpack.c.bf16 %v2573_v22, %v2572_v60  ;;  %v2736_v50 = vld [vmem:[#allocation5 + $0x250] sm:$0xff]  ;;  %v2754_v60 = vld [vmem:[#allocation5 + $0x2e0] sm:$0xff]  ;;  %v2755_v22 = vld [vmem:[#allocation5 + $0x2e8] sm:$0xff] }
 0x71b   :  { %4445 = vmatpush3.bf16.msra.mxu1 %v4444_v35  ;;  %v2557_v35 = vld [vmem:[#allocation5 + $0x158] sm:$0xff] }
 0x71c   :  { %4447 = vmatprep.subr.bf16.mxu1 %v4446_v2  ;;  %v2574_v2 = vld [vmem:[#allocation5 + $0x1e0] sm:$0xff]  ;;  %v4488_v29 = vpack.c.bf16 %v2557_v35, %v2556_v7  ;;  %v2739_v35 = vld [vmem:[#allocation5 + $0x268] sm:$0xff] }
 0x71d   :  { %v4490_v42 = vpack.c.bf16 %v2575_v4, %v2574_v2  ;;  %v2738_v7 = vld [vmem:[#allocation5 + $0x260] sm:$0xff]  ;;  %v2756_v2 = vld [vmem:[#allocation5 + $0x2f0] sm:$0xff]  ;;  %v2757_v4 = vld [vmem:[#allocation5 + $0x2f8] sm:$0xff] }
 0x71f   :  { %4449 = vmatpush3.bf16.msra.mxu1 %v4448_v6  ;;  %v2559_v6 = vld [vmem:[#allocation5 + $0x168] sm:$0xff] }
 0x720   :  { %4451 = vmatprep.subr.bf16.mxu1 %v4450_v23  ;;  %v2576_v23 = vld [vmem:[#allocation5 + $0x1f0] sm:$0xff]  ;;  %v4492_v56 = vpack.c.bf16 %v2559_v6, %v2558_v17  ;;  %v2741_v6 = vld [vmem:[#allocation5 + $0x278] sm:$0xff] }
 0x721   :  { %v4494_v11 = vpack.c.bf16 %v2577_v47, %v2576_v23  ;;  %v2740_v17 = vld [vmem:[#allocation5 + $0x270] sm:$0xff]  ;;  %v3525_v47 = vld [vmem:[%s5912_s9] ss:$0 sm:$0xff] }
 0x722   :  { %v4532_v23 = vpack.c.bf16 %v2741_v6, %v2740_v17 }
 0x723   :  { %4453 = vmatpush3.bf16.msra.mxu1 %v4452_v3  ;;  %v2561_v3 = vld [vmem:[#allocation5 + $0x178] sm:$0xff] }
 0x724   :  { %4455 = vmatprep.subr.bf16.mxu1 %v4454_v52  ;;  %v4496_v52 = vpack.c.bf16 %v2561_v3, %v2560_v36 }
 0x727   :  { %4457 = vmatpush3.bf16.msra.mxu1 %v4456_v13  ;;  %v2743_v13 = vld [vmem:[#allocation5 + $0x288] sm:$0xff] }
 0x728   :  { %4459 = vmatprep.subr.bf16.mxu1 %v4458_v10  ;;  %v4502_v14 = vpack.c.bf16 %v2743_v13, %v2742_v9 }
 0x72b   :  { %4461 = vmatpush3.bf16.msra.mxu1 %v4460_v18  ;;  %v2726_v18 = vld [vmem:[#allocation5 + $0x200] sm:$0xff] }
 0x72c   :  { %4463 = vmatprep.subr.bf16.mxu1 %v5719_v43 }
 0x7e1   :  { %v2355_v19 = vpop.f32.mrb[8].mxu1 }
 0x7e2   :  { %v2357_v21 = vpop.f32.mrb[9].mxu1 }
 0x7e3   :  { %2456 = vmatprep.mubr.f32.mxu1 %v2357_v21  ;;  %v3528_v21 = vld [vmem:[%s5910_s7 + $0x10] sm:$0xff] }
 0x7e4   :  { %2457 = vmatmul.mubr.f32.vlgmr.msra.gmra.mrb[10].mxu1 %v2355_v19  ;;  %v2745_v19 = vld [vmem:[#allocation5 + $0x298] sm:$0xff] }
 0x7e5   :  { %4465 = vmatpush1.bf16.msra.mxu1 %v5717_v26  ;;  %2538 = vmatprep.mubr.f32.mxu1 %v4810_v15  ;;  %v4506_v16 = vpack.c.bf16 %v2745_v19, %v2744_v61  ;;  %v2908_v19 = vld [vmem:[#allocation5 + $0x310] sm:$0xff] }
 0x7e6   :  { %4467 = vmatprep.subr.bf16.mxu1 %v4466_v44  ;;  %v4504_v44 = vpack.c.bf16 %v2727_v63, %v2726_v18  ;;  %v2925_v18 = vld [vmem:[#allocation5 + $0x398] sm:$0xff] }
 0x7e8   :  { %3527 = vmatmul.mubr.msk.f32.vlgmr.msra.gmra.mrb[12].mxu1 %vm2285_vm14, %v3526_v54  ;;  %v2747_v54 = vld [vmem:[#allocation5 + $0x2a8] sm:$0xff] }
 0x7e9   :  { %4469 = vmatpush3.bf16.msra.mxu1 %v4468_v28  ;;  %v4508_v28 = vpack.c.bf16 %v2729_v24, %v2728_v34 }
 0x7ea   :  { %4471 = vmatprep.subr.bf16.mxu1 %v4470_v20  ;;  %v4510_v20 = vpack.c.bf16 %v2747_v54, %v2746_v62  ;;  %v2911_v62 = vld [vmem:[#allocation5 + $0x328] sm:$0xff]  ;;  %v2928_v54 = vld [vmem:[#allocation5 + $0x3b0] sm:$0xff] }
 0x7ed   :  { %4473 = vmatpush3.bf16.msra.mxu1 %v4472_v33  ;;  %v4512_v33 = vpack.c.bf16 %v2731_v57, %v2730_v49  ;;  %v2912_v57 = vld [vmem:[#allocation5 + $0x330] sm:$0xff] }
 0x7ee   :  { %4475 = vmatprep.subr.bf16.mxu1 %v4474_v8  ;;  %v4514_v8 = vpack.c.bf16 %v2749_v32, %v2748_v39  ;;  %v2913_v39 = vld [vmem:[#allocation5 + $0x338] sm:$0xff]  ;;  %v2930_v32 = vld [vmem:[#allocation5 + $0x3c0] sm:$0xff] }
 0x7f1   :  { %4477 = vmatpush3.bf16.msra.mxu1 %v4476_v38  ;;  %v4516_v38 = vpack.c.bf16 %v2733_v45, %v2732_v30  ;;  %v2914_v45 = vld [vmem:[#allocation5 + $0x340] sm:$0xff] }
 0x7f2   :  { %4479 = vmatprep.subr.bf16.mxu1 %v4478_v41  ;;  %v4518_v41 = vpack.c.bf16 %v2751_v31, %v2750_v37  ;;  %v2915_v37 = vld [vmem:[#allocation5 + $0x348] sm:$0xff]  ;;  %v2932_v31 = vld [vmem:[#allocation5 + $0x3d0] sm:$0xff] }
 0x7f5   :  { %4481 = vmatpush3.bf16.msra.mxu1 %v4480_v59  ;;  %v4520_v59 = vpack.c.bf16 %v2735_v27, %v2734_v40  ;;  %v2916_v27 = vld [vmem:[#allocation5 + $0x350] sm:$0xff] }
 0x7f6   :  { %4483 = vmatprep.subr.bf16.mxu1 %v4482_v51  ;;  %v4522_v51 = vpack.c.bf16 %v2753_v53, %v2752_v48  ;;  %v2917_v48 = vld [vmem:[#allocation5 + $0x358] sm:$0xff]  ;;  %v2934_v53 = vld [vmem:[#allocation5 + $0x3e0] sm:$0xff] }
 0x7f9   :  { %4485 = vmatpush3.bf16.msra.mxu1 %v4484_v58  ;;  %v4524_v58 = vpack.c.bf16 %v2737_v1, %v2736_v50  ;;  %v2918_v1 = vld [vmem:[#allocation5 + $0x360] sm:$0xff] }
 0x7fa   :  { %4487 = vmatprep.subr.bf16.mxu1 %v4486_v0  ;;  %v4526_v0 = vpack.c.bf16 %v2755_v22, %v2754_v60  ;;  %v2919_v60 = vld [vmem:[#allocation5 + $0x368] sm:$0xff] }
 0x7fb   :  { %v4564_v22 = vpack.c.bf16 %v2919_v60, %v2918_v1  ;;  %v3124_v60 = vld [vmem:[%s5914_s11 + $0x60] sm:$0xff] }
 0x7fd   :  { %4489 = vmatpush3.bf16.msra.mxu1 %v4488_v29  ;;  %v4528_v29 = vpack.c.bf16 %v2739_v35, %v2738_v7  ;;  %v2920_v35 = vld [vmem:[#allocation5 + $0x370] sm:$0xff] }
 0x7fe   :  { %4491 = vmatprep.subr.bf16.mxu1 %v4490_v42  ;;  %v4530_v42 = vpack.c.bf16 %v2757_v4, %v2756_v2  ;;  %v2921_v2 = vld [vmem:[#allocation5 + $0x378] sm:$0xff] }
 0x7ff   :  { %v4568_v4 = vpack.c.bf16 %v2921_v2, %v2920_v35  ;;  %v3536_v2 = vld [vmem:[%s5914_s11 + $0x80] sm:$0xff] }
 0x801   :  { %4493 = vmatpush3.bf16.msra.mxu1 %v4492_v56 }
 0x802   :  { %4495 = vmatprep.subr.bf16.mxu1 %v4494_v11 }
 0x805   :  { %4497 = vmatpush3.bf16.msra.mxu1 %v4496_v52  ;;  %v2922_v52 = vld [vmem:[#allocation5 + $0x380] sm:$0xff] }
 0x806   :  { %4499 = vmatprep.subr.bf16.mxu1 %v5719_v43 }
 0x8b7   :  { %v3632_v12 = vpop.f32.mrb[10].mxu1 }
 0x8b8   :  { %v3633_v46 = vpop.f32.mrb[11].mxu1 }
 0x8b9   :  { %v5735_v5 = vadd.f32 %v3633_v46, %v3632_v12  ;;  %v2923_v12 = vld [vmem:[#allocation5 + $0x388] sm:$0xff] }
 0x8bb   :  { %v2540_v10 = vpop.f32.mrb[12].mxu1  ;;  %v2468_v36 = vadd.f32 %v5735_v5, %v3525_v47  ;;  %v3530_v5 = vld [vmem:[%s5910_s7 + $0x18] sm:$0xff] }
 0x8bc   :  { %v2542_v55 = vpop.f32.mrb[13].mxu1 }
 0x8bd   :  { %2642 = vmatprep.mubr.f32.mxu1 %v2542_v55  ;;  %v2906_v55 = vld [vmem:[#allocation5 + $0x300] sm:$0xff] }
 0x8be   :  { %2643 = vmatmul.mubr.f32.vlgmr.msra.gmra.mrb[14].mxu1 %v2540_v10  ;;  %v4538_v10 = vpack.c.bf16 %v2923_v12, %v2922_v52 }
 0x8bf   :  { %4501 = vmatpush1.bf16.msra.mxu1 %v5717_v26  ;;  %2718 = vmatprep.mubr.f32.mxu1 %v4810_v15 }
 0x8c0   :  { %4503 = vmatprep.subr.bf16.mxu1 %v4502_v14  ;;  %v2907_v14 = vld [vmem:[#allocation5 + $0x308] sm:$0xff] }
 0x8c1   :  { %v4540_v63 = vpack.c.bf16 %v2907_v14, %v2906_v55 }
 0x8c2   :  { %3529 = vmatmul.mubr.msk.f32.vlgmr.msra.gmra.mrb[16].mxu1 %vm2285_vm14, %v3528_v21  ;;  %v2909_v21 = vld [vmem:[#allocation5 + $0x318] sm:$0xff] }
 0x8c3   :  { %4505 = vmatpush3.bf16.msra.mxu1 %v4504_v44  ;;  %v2926_v44 = vld [vmem:[#allocation5 + $0x3a0] sm:$0xff]  ;;  %v4544_v34 = vpack.c.bf16 %v2909_v21, %v2908_v19 }
 0x8c4   :  { %4507 = vmatprep.subr.bf16.mxu1 %v4506_v16  ;;  %v2927_v16 = vld [vmem:[#allocation5 + $0x3a8] sm:$0xff] }
 0x8c5   :  { %v4546_v24 = vpack.c.bf16 %v2927_v16, %v2926_v44 }
 0x8c7   :  { %4509 = vmatpush3.bf16.msra.mxu1 %v4508_v28  ;;  %v2929_v28 = vld [vmem:[#allocation5 + $0x3b8] sm:$0xff] }
 0x8c8   :  { %4511 = vmatprep.subr.bf16.mxu1 %v4510_v20  ;;  %v4550_v49 = vpack.c.bf16 %v2929_v28, %v2928_v54  ;;  %v3112_v28 = vld [vmem:[%s5914_s11] sm:$0xff] }
 0x8cb   :  { %4513 = vmatpush3.bf16.msra.mxu1 %v4512_v33  ;;  %v2931_v33 = vld [vmem:[#allocation5 + $0x3c8] sm:$0xff] }
 0x8cc   :  { %4515 = vmatprep.subr.bf16.mxu1 %v4514_v8  ;;  %v4552_v8 = vpack.c.bf16 %v2913_v39, %v2912_v57  ;;  %v4554_v30 = vpack.c.bf16 %v2931_v33, %v2930_v32  ;;  %v3037_v32 = vld [vmem:[%s5913_s10] sm:$0x3] }
 0x8cf   :  { %4517 = vmatpush3.bf16.msra.mxu1 %v4516_v38  ;;  %v2933_v38 = vld [vmem:[#allocation5 + $0x3d8] sm:$0xff] }
 0x8d0   :  { %4519 = vmatprep.subr.bf16.mxu1 %v4518_v41  ;;  %v4556_v41 = vpack.c.bf16 %v2915_v37, %v2914_v45  ;;  %v4558_v40 = vpack.c.bf16 %v2933_v38, %v2932_v31  ;;  %v3116_v37 = vld [vmem:[%s5914_s11 + $0x20] sm:$0xff]  ;;  %v3117_v31 = vld [vmem:[%s5914_s11 + $0x28] sm:$0xff] }
 0x8d1   :  { %v4577_v38 = vpack.c.bf16 %v3117_v31, %v3116_v37 }
 0x8d3   :  { %4521 = vmatpush3.bf16.msra.mxu1 %v4520_v59  ;;  %v2935_v59 = vld [vmem:[#allocation5 + $0x3e8] sm:$0xff] }
 0x8d4   :  { %4523 = vmatprep.subr.bf16.mxu1 %v4522_v51  ;;  %v4560_v51 = vpack.c.bf16 %v2917_v48, %v2916_v27  ;;  %v4562_v50 = vpack.c.bf16 %v2935_v59, %v2934_v53  ;;  %v3120_v48 = vld [vmem:[%s5914_s11 + $0x40] sm:$0xff]  ;;  %v3121_v53 = vld [vmem:[%s5914_s11 + $0x48] sm:$0xff] }
 0x8d5   :  { %v4583_v59 = vpack.c.bf16 %v3121_v53, %v3120_v48 }
 0x8d7   :  { %4525 = vmatpush3.bf16.msra.mxu1 %v4524_v58  ;;  %v2936_v58 = vld [vmem:[#allocation5 + $0x3f0] sm:$0xff] }
 0x8d8   :  { %4527 = vmatprep.subr.bf16.mxu1 %v4526_v0  ;;  %v2937_v0 = vld [vmem:[#allocation5 + $0x3f8] sm:$0xff] }
 0x8d9   :  { %v4566_v7 = vpack.c.bf16 %v2937_v0, %v2936_v58  ;;  %v3126_v0 = vld [vmem:[%s5914_s11 + $0x70] sm:$0xff] }
 0x8db   :  { %4529 = vmatpush3.bf16.msra.mxu1 %v4528_v29 }
 0x8dc   :  { %4531 = vmatprep.subr.bf16.mxu1 %v4530_v42 }
 0x8df   :  { %4533 = vmatpush3.bf16.msra.mxu1 %v4532_v23 }
 0x8e0   :  { %4535 = vmatprep.subr.bf16.mxu1 %v5719_v43  ;;  %v2924_v43 = vld [vmem:[#allocation5 + $0x390] sm:$0xff] }
 0x8e1   :  { %v4542_v61 = vpack.c.bf16 %v2925_v18, %v2924_v43 }
 0x991   :  { %v3667_v56 = vpop.f32.mrb[14].mxu1 }
 0x992   :  { %v3668_v11 = vpop.f32.mrb[15].mxu1 }
 0x993   :  { %v3669_v3 = vadd.f32 %v3668_v11, %v3667_v56 }
 0x995   :  { %v5748_v46 = vadd.f32 %v3669_v3, %v2468_v36  ;;  %v2720_v9 = vpop.f32.mrb[16].mxu1 }
 0x996   :  { %v2722_v13 = vpop.f32.mrb[17].mxu1 }
 0x997   :  { %2822 = vmatprep.mubr.f32.mxu1 %v2722_v13 }
 0x998   :  { %2823 = vmatmul.mubr.f32.vlgmr.msra.gmra.mrb[18].mxu1 %v2720_v9 }
 0x999   :  { %4537 = vmatpush1.bf16.msra.mxu1 %v5717_v26  ;;  %2898 = vmatprep.mubr.f32.mxu1 %v4810_v15  ;;  %v2910_v26 = vld [vmem:[#allocation5 + $0x320] sm:$0xff] }
 0x99a   :  { %4539 = vmatprep.subr.bf16.mxu1 %v4538_v10  ;;  %v4548_v20 = vpack.c.bf16 %v2911_v62, %v2910_v26 }
 0x99c   :  { %3531 = vmatmul.mubr.msk.f32.vlgmr.msra.gmra.mrb[20].mxu1 %vm2285_vm14, %v3530_v5 }
 0x99d   :  { %4541 = vmatpush3.bf16.msra.mxu1 %v4540_v63 }
 0x99e   :  { %4543 = vmatprep.subr.bf16.mxu1 %v4542_v61 }
 0x9a1   :  { %4545 = vmatpush3.bf16.msra.mxu1 %v4544_v34 }
 0x9a2   :  { %4547 = vmatprep.subr.bf16.mxu1 %v4546_v24 }
 0x9a5   :  { %4549 = vmatpush3.bf16.msra.mxu1 %v4548_v20  ;;  %v3113_v20 = vld [vmem:[%s5914_s11 + $0x8] sm:$0xff] }
 0x9a6   :  { %4551 = vmatprep.subr.bf16.mxu1 %v4550_v49  ;;  %v4571_v33 = vpack.c.bf16 %v3113_v20, %v3112_v28 }
 0x9a9   :  { %4553 = vmatpush3.bf16.msra.mxu1 %v4552_v8  ;;  %v3115_v8 = vld [vmem:[%s5914_s11 + $0x18] sm:$0xff] }
 0x9aa   :  { %4555 = vmatprep.subr.bf16.mxu1 %v4554_v30  ;;  %v4813_v30 = vmov 0.0|0.0  }
 0x9ad   :  { %4557 = vmatpush3.bf16.msra.mxu1 %v4556_v41  ;;  %v3118_v41 = vld [vmem:[%s5914_s11 + $0x30] sm:$0xff] }
 0x9ae   :  { %4559 = vmatprep.subr.bf16.mxu1 %v4558_v40  ;;  %v3119_v40 = vld [vmem:[%s5914_s11 + $0x38] sm:$0xff] }
 0x9af   :  { %v4580_v27 = vpack.c.bf16 %v3119_v40, %v3118_v41 }
 0x9b1   :  { %4561 = vmatpush3.bf16.msra.mxu1 %v4560_v51  ;;  %v3122_v51 = vld [vmem:[%s5914_s11 + $0x50] sm:$0xff] }
 0x9b2   :  { %4563 = vmatprep.subr.bf16.mxu1 %v4562_v50  ;;  %v3123_v50 = vld [vmem:[%s5914_s11 + $0x58] sm:$0xff] }
 0x9b3   :  { %v4586_v1 = vpack.c.bf16 %v3123_v50, %v3122_v51 }
 0x9b5   :  { %4565 = vmatpush3.bf16.msra.mxu1 %v4564_v22  ;;  %v3125_v22 = vld [vmem:[%s5914_s11 + $0x68] sm:$0xff] }
 0x9b6   :  { %4567 = vmatprep.subr.bf16.mxu1 %v4566_v7  ;;  %v4589_v58 = vpack.c.bf16 %v3125_v22, %v3124_v60  ;;  %v3127_v7 = vld [vmem:[%s5914_s11 + $0x78] sm:$0xff] }
 0x9b7   :  { %v4592_v35 = vpack.c.bf16 %v3127_v7, %v3126_v0 }
 0x9b9   :  { %4569 = vmatpush3.bf16.msra.mxu1 %v4568_v4  ;;  %v3537_v4 = vld [vmem:[%s5914_s11 + $0x88] sm:$0xff] }
 0x9ba   :  { %3866 = vmatprep.subr.mxu1 %v4810_v15 }
 0xa6b   :  { %v3702_v29 = vpop.f32.mrb[18].mxu1 }
 0xa6c   :  { %v3703_v42 = vpop.f32.mrb[19].mxu1 }
 0xa6d   :  { %v3704_v17 = vadd.f32 %v3703_v42, %v3702_v29 }
 0xa6f   :  { %v2828_v6 = vadd.f32 %v3704_v17, %v5748_v46  ;;  %v2900_v23 = vpop.f32.mrb[20].mxu1  ;;  %v3534_v17 = vld [vmem:[%s5913_s10 + $0x2] sm:$0x3] }
 0xa70   :  { %v2902_v47 = vpop.f32.mrb[21].mxu1 }
 0xa71   :  { %3002 = vmatprep.mubr.f32.mxu1 %v2902_v47  ;;  %v3539_v47 = vld [vmem:[%s5914_s11 + $0x98] sm:$0xff] }
 0xa72   :  { %3003 = vmatmul.mubr.f32.vlgmr.msra.gmra.mrb[22].mxu1 %v2900_v23  ;;  %v3538_v23 = vld [vmem:[%s5914_s11 + $0x90] sm:$0xff] }
 0xa73   :  { %3868 = vmatprep.mubr.msk.f32.mxu1 %vm4812_vm15, %v4810_v15 }
 0xb45   :  { %v3737_v56 = vpop.f32.mrb[22].mxu1 }
 0xb46   :  { %v3738_v11 = vpop.f32.mrb[23].mxu1 }
 0xb47   :  { %v3739_v36 = vadd.f32 %v3738_v11, %v3737_v56  ;;  %v4598_v56 = vpack.c.bf16 %v3539_v47, %v3538_v23  ;;  %v3540_v11 = vld [vmem:[%s5914_s11 + $0xa0] sm:$0xff] }
 0xb49   :  { %v3008_v3 = vadd.f32 %v3739_v36, %v2828_v6  ;;  %v4595_v6 = vpack.c.bf16 %v3537_v4, %v3536_v2  ;;  %v3541_v36 = vld [vmem:[%s5914_s11 + $0xa8] sm:$0xff] }
 0xb4b   :  { %v3010_v52 = vmul.f32 0.70710677, %v3008_v3  ;;  %v3009_v49 = vmul.f32 0.5, %v3008_v3  ;;  %v4601_v3 = vpack.c.bf16 %v3541_v36, %v3540_v11 }
 0xb4d   :  { %v3013_v12 = vand.u32 2147483647, %v3010_v52  ;;  %vm3011_vm0 = vcmp.ge.f32.partialorder %v3010_v52, 0.0  ;;  %v3542_v52 = vld [vmem:[%s5914_s11 + $0xb0] sm:$0xff] }
 0xb4e   :  { %v3012_v62 = vsel %vm3011_vm0, 1.0, %v4811_v25  ;;  %v3114_v25 = vld [vmem:[%s5914_s11 + $0x10] sm:$0xff] }
 0xb4f   :  { %v3014_v9 = vmul.f32 0.3275911, %v3013_v12  ;;  %v3027_v10 = vsub.f32 0.0, %v3013_v12  ;;  %v4574_v45 = vpack.c.bf16 %v3115_v8, %v3114_v25 }
 0xb51   :  { %v3015_v13 = vadd.f32 1.0, %v3014_v9  ;;  %v3028_v46 = vmul.f32 %v3027_v10, %v3013_v12  ;;  %v3544_v9 = vld [vmem:[%s5914_s11 + $0xc0] sm:$0xff] }
 0xb53   :  { %4728 = vrcp.f32 %v3015_v13  ;;  %v3029_v18 = vmul.f32 1.442695, %v3028_v46  ;;  %v3545_v13 = vld [vmem:[%s5914_s11 + $0xc8] sm:$0xff]  ;;  %v3547_v46 = vld [vmem:[%s5914_s11 + $0xd8] sm:$0xff] }
 0xb54   :  { %v4607_v10 = vpack.c.bf16 %v3545_v13, %v3544_v9 }
 0xb55   :  { %4730 = vpow2.f32 %v3029_v18  ;;  %v3549_v18 = vld [vmem:[%s5914_s11 + $0xe8] sm:$0xff] }
 0xb5d   :  { %v4729_v55 = vpop.eup %4728 }
 0xb5e   :  { %v3018_v14 = vmul.f32 1.0614054, %v4729_v55 }
 0xb5f   :  { %v4731_v34 = vpop.eup %4730 }
 0xb60   :  { %v3019_v43 = vadd.f32 -1.4531521, %v3018_v14 }
 0xb62   :  { %v3020_v5 = vmul.f32 %v4729_v55, %v3019_v43  ;;  %v3548_v43 = vld [vmem:[%s5914_s11 + $0xe0] sm:$0xff] }
 0xb64   :  { %v3021_v63 = vadd.f32 1.4214138, %v3020_v5  ;;  %v4613_v5 = vpack.c.bf16 %v3549_v18, %v3548_v43 }
 0xb66   :  { %v3022_v61 = vmul.f32 %v4729_v55, %v3021_v63  ;;  %v3550_v63 = vld [vmem:[%s5914_s11 + $0xf0] sm:$0xff] }
 0xb68   :  { %v3023_v19 = vadd.f32 -0.28449672, %v3022_v61  ;;  %v3551_v61 = vld [vmem:[%s5914_s11 + $0xf8] sm:$0xff] }
 0xb6a   :  { %v3024_v21 = vmul.f32 %v4729_v55, %v3023_v19  ;;  %v4616_v19 = vpack.c.bf16 %v3551_v61, %v3550_v63 }
 0xb6c   :  { %v3025_v44 = vadd.f32 0.2548296, %v3024_v21 }
 0xb6e   :  { %v3026_v16 = vmul.f32 %v4729_v55, %v3025_v44  ;;  %v3546_v55 = vld [vmem:[%s5914_s11 + $0xd0] sm:$0xff] }
 0xb6f   :  { %v4610_v14 = vpack.c.bf16 %v3547_v46, %v3546_v55 }
 0xb70   :  { %v3031_v24 = vmul.f32 %v4731_v34, %v3026_v16  ;;  %v3533_v16 = vld [vmem:[%s5915_s12] ss:$0 sm:$0xff] }
 0xb72   :  { %v3032_v26 = vsub.f32 1.0, %v3031_v24 }
 0xb74   :  { %v3033_v54 = vmul.f32 %v3032_v26, %v3012_v62 }
 0xb76   :  { %v3034_v57 = vadd.f32 1.0, %v3033_v54 }
 0xb78   :  { %v3035_v39 = vmul.f32 %v3034_v57, %v3009_v49 }
 0xb7a   :  { %3867 = vmatpush3.msra.mxu1 %v3035_v39 }
 0xb7b   :  { %3869 = vmatmul.mubr.msk.f32.vlgmr.msra.gmra.mrb[24].mxu1 %vm3038_vm1, %v3037_v32  ;;  %4570 = vmatprep.subr.bf16.mxu1 %v4813_v30 }
 0xb7c   :  { %4572 = vmatpush3.bf16.msra.mxu1 %v4571_v33  ;;  %3903 = vmatprep.mubr.msk.f32.mxu1 %vm4812_vm15, %v4810_v15 }
 0xb7d   :  { %4573 = vmatprep.subr.bf16.mxu1 %v4813_v30 }
 0xb80   :  { %4575 = vmatpush3.bf16.msra.mxu1 %v4574_v45 }
 0xb81   :  { %4576 = vmatprep.subr.bf16.mxu1 %v4813_v30 }
 0xb84   :  { %4578 = vmatpush3.bf16.msra.mxu1 %v4577_v38 }
 0xb85   :  { %4579 = vmatprep.subr.bf16.mxu1 %v4813_v30 }
 0xb88   :  { %4581 = vmatpush3.bf16.msra.mxu1 %v4580_v27 }
 0xb89   :  { %4582 = vmatprep.subr.bf16.mxu1 %v4813_v30 }
 0xb8c   :  { %4584 = vmatpush3.bf16.msra.mxu1 %v4583_v59 }
 0xb8d   :  { %4585 = vmatprep.subr.bf16.mxu1 %v4813_v30 }
 0xb90   :  { %4587 = vmatpush3.bf16.msra.mxu1 %v4586_v1 }
 0xb91   :  { %4588 = vmatprep.subr.bf16.mxu1 %v4813_v30 }
 0xb94   :  { %4590 = vmatpush3.bf16.msra.mxu1 %v4589_v58 }
 0xb95   :  { %4591 = vmatprep.subr.bf16.mxu1 %v4813_v30 }
 0xb98   :  { %4593 = vmatpush3.bf16.msra.mxu1 %v4592_v35 }
 0xb99   :  { %3906 = vmatprep.subr.mxu1 %v4810_v15 }
 0xc4e   :  { %v3108_v29 = vpop.f32.mrb[24].mxu1 }
 0xc4f   :  { %3904 = vmatmul.mubr.f32.vlgmr.msra.gmra.mrb[26].mxu1 %v3108_v29  ;;  %v3870_v42 = vpop.f32.mrb[25].mxu1 }
 0xc50   :  { %3907 = vmatpush3.msra.mxu1 %v3035_v39  ;;  %3908 = vmatprep.mubr.msk.f32.mxu1 %vm4812_vm15, %v4810_v15 }
 0xc51   :  { %4594 = vmatprep.subr.bf16.mxu1 %v4813_v30 }
 0xc53   :  { %3909 = vmatmul.mubr.msk.f32.vlgmr.msra.gmra.mrb[28].mxu1 %vm3038_vm1, %v3534_v17 }
 0xc54   :  { %4596 = vmatpush3.bf16.msra.mxu1 %v4595_v6  ;;  %3943 = vmatprep.mubr.msk.f32.mxu1 %vm4812_vm15, %v4810_v15  ;;  %v3543_v15 = vld [vmem:[%s5914_s11 + $0xb8] sm:$0xff]  ;;  %s4776_s11 = scalar_lea.vmem %s3377_s28, 32 }
 0xc55   :  { %4597 = vmatprep.subr.bf16.mxu1 %v4813_v30  ;;  %v4604_v12 = vpack.c.bf16 %v3543_v15, %v3542_v52  ;;  %p4777_p2 = scmp.ne.s32.totalorder %s3377_s28, %s4776_s11  ;;  %p4782_p4 = scmp.lt.s32.totalorder %s4776_s11, %s4776_s11 }
 0xc57   :  { %p4783_p5 = por %p4782_p4, %p4781_p3 }
 0xc58   :  { %4599 = vmatpush3.bf16.msra.mxu1 %v4598_v56 }
 0xc59   :  { %4600 = vmatprep.subr.bf16.mxu1 %v4813_v30  ;;  %p4784_p6 = pnand %p4783_p5, %p4777_p2 }
 0xc5c   :  { %4602 = vmatpush3.bf16.msra.mxu1 %v4601_v3 }
 0xc5d   :  { %4603 = vmatprep.subr.bf16.mxu1 %v4813_v30 }
 0xc60   :  { %4605 = vmatpush3.bf16.msra.mxu1 %v4604_v12 }
 0xc61   :  { %4606 = vmatprep.subr.bf16.mxu1 %v4813_v30 }
 0xc64   :  { %4608 = vmatpush3.bf16.msra.mxu1 %v4607_v10 }
 0xc65   :  { %4609 = vmatprep.subr.bf16.mxu1 %v4813_v30 }
 0xc68   :  { %4611 = vmatpush3.bf16.msra.mxu1 %v4610_v14 }
 0xc69   :  { %4612 = vmatprep.subr.bf16.mxu1 %v4813_v30 }
 0xc6c   :  { %4614 = vmatpush3.bf16.msra.mxu1 %v4613_v5 }
 0xc6d   :  { %4615 = vmatprep.subr.bf16.mxu1 %v4813_v30 }
 0xc70   :  { %4617 = vmatpush3.bf16.msra.mxu1 %v4616_v19 }
 0xd26   :  { %v3276_v21 = vpop.f32.mrb[28].mxu1 }
 0xd27   :  { %3944 = vmatmul.mubr.f32.vlgmr.msra.gmra.mrb[26].mxu1 %v3276_v21  ;;  %v3910_v44 = vpop.f32.mrb[29].mxu1 }
 0xdfa   :  { %v3363_v34 = vpop.f32.mrb[26].mxu1 }
 0xdfb   :  { %v4630_v24 = vadd.f32 %v3533_v16, %v3363_v34  ;;  %v3945_v26 = vpop.f32.mrb[27].mxu1 }
 0xdfd   :  { %3369 = vst.msk [vmem:[#allocation7] sm:$0x3] %vm3368_vm2, %v4630_v24 }
 0xdfe   :  { %4787 = shalt.err (!%p4784_p6)
}
 0xdff   :  { %s4788_s29 = scalar_lea.hbm %s5916_s13, 32 }
 0xe00   :  { %p4789_p7 = scmp.ne.s32.totalorder %s5916_s13, %s4788_s29  ;;  %p4792_p8 = scmp.lt.u32.totalorder %s4788_s29, %s5916_s13 }
 0xe02   :  { %p4794_p9 = pnand %p4792_p8, %p4789_p7 }
 0xe04   :  { %4797 = shalt.err (!%p4794_p9)
}
 0xe05   :  { %3379 = dma.vmem_to_hbm [thread:$0]  %s3377_s28, 32, %s5916_s13, [#allocation4]  }
 0xe06   :  { %4802 = dma.done.wait [#allocation4], 32  }
 0xe07   :  { %4803 = vsyncadd [#allocation4], 4294967264 }
 0xe08   :  { %3383 = vsyncpa [#allocation3], 1 }
 0xe09   :  { %3384 = vsyncpa [#allocation6], 1 }
 0xe0a   :  { %3385 = vsyncpa [#allocation4], 1 }

</bundles_post_ra>
